<compile_context>
chip_gen: v7x
topology: tpu7x:2x2x1
jax: 0.10.0
libtpu: 0.0.40
codegen_flags: <defaults>
</compile_context>

<pallas_src>
import jax
import jax.numpy as jnp
import numpy as np
from jax.experimental import pallas as pl
from jax.experimental.pallas import tpu as pltpu


# ----------------------------- static geometry -----------------------------
CIN0 = 8                 # conv1 input channels padded 3 -> 8 (zero channels)
WP0, L1 = 30, 28 * 30    # conv1: padded-input row width, output flat length
X0W = 1024               # conv1 input flat width  (>= 62 + 840, lane aligned)
WP1, L2 = 14, 12 * 14    # conv2: pooled row width, output flat length
A1W = 256                # conv2 input flat width  (>= 30 + 168, lane aligned)
WP2, L3 = 6, 4 * 6       # conv3: pooled row width, output flat length
A2H = 40                 # conv3 input flat rows   (>= 14 + 24, sublane aligned)


# ------------------------------ fused kernel -------------------------------
def _ebasenet_kernel(x_ref, w1_ref, b1_ref, w2_ref, b2_ref, w3_ref, b3_ref,
                     p1_ref, p2t_ref, wfc1_ref, bfc1_ref, wfc2_ref, bfc2_ref,
                     o_ref):
    f32 = jnp.float32
    x0 = x_ref[0]                                            # [8, 1024]

    # ---- conv1 (3x3, input pre-padded) + bias + Square ----------------------
    acc1 = jnp.zeros((16, L1), f32)
    for t in range(9):
        i, j = divmod(t, 3)
        off = i * WP0 + j
        acc1 = acc1 + jnp.dot(w1_ref[t], x0[:, off:off + L1],
                              preferred_element_type=f32)
    acc1 = acc1 + b1_ref[...]
    acc1 = acc1 * acc1                                       # Square()

    # ---- AvgPool2d(2) as a matmul (drops junk columns, repacks to 14x14) ----
    a1 = jnp.dot(acc1, p1_ref[...], preferred_element_type=f32)   # [16, 256]

    # ---- conv2 + bias + Square ----------------------------------------------
    acc2 = jnp.zeros((32, L2), f32)
    for t in range(9):
        i, j = divmod(t, 3)
        off = i * WP1 + j
        acc2 = acc2 + jnp.dot(w2_ref[t], a1[:, off:off + L2],
                              preferred_element_type=f32)
    acc2 = acc2 + b2_ref[...]
    acc2 = acc2 * acc2

    # ---- AvgPool2d(2) + layout flip to [spatial, C]  (contract lanes/lanes) --
    a2 = jax.lax.dot_general(p2t_ref[...], acc2,
                             dimension_numbers=(((1,), (1,)), ((), ())),
                             preferred_element_type=f32)          # [40, 32]

    # ---- conv3 + bias + Square ----------------------------------------------
    acc3 = jnp.zeros((L3, 64), f32)
    for t in range(9):
        i, j = divmod(t, 3)
        off = i * WP2 + j
        acc3 = acc3 + jnp.dot(a2[off:off + L3, :], w3_ref[t],
                              preferred_element_type=f32)
    acc3 = acc3 + b3_ref[...]
    acc3 = acc3 * acc3                                       # [24, 64]

    # ---- flatten + fc1 + Square ---------------------------------------------
    # PyTorch's NCHW flatten order is folded into the fc1 weight layout
    # (wfc1_ref[s] holds the [64,128] columns for spatial position s), so the
    # flatten is 16 accumulating [1,64]x[64,128] matmuls — no scratch gather.
    # TODO(synk): nn.Dropout() training-mode masking not implemented (eval forward).
    h = bfc1_ref[...]                                        # [1, 128]
    for s in range(16):
        ho, wo = divmod(s, 4)
        m = ho * WP2 + wo
        h = h + jnp.dot(acc3[m:m + 1, :], wfc1_ref[s],
                        preferred_element_type=f32)
    h = h * h

    # ---- fc2 -----------------------------------------------------------------
    out = jnp.dot(h, wfc2_ref[...], preferred_element_type=f32) + bfc2_ref[...]
    o_ref[0] = out                                           # [1, 7]


# ------------------------- constant pooling matrices ------------------------
def _pool_matrix(ho_n, wo_n, wp, pad_cols):
    """0.25-valued matrix: conv-output flat index (ho*wp+wo, junk wo>=wo_n)
    -> pooled flat index hp*(wo_n//2)+wp_."""
    m = np.arange(ho_n * wp)
    ho, wo = m // wp, m % wp
    wh = wo_n // 2
    p = np.arange((ho_n // 2) * wh)
    hp, wp_ = p // wh, p % wh
    mat = ((wo[:, None] < wo_n)
           & ((ho[:, None] // 2) == hp[None, :])
           & ((wo[:, None] // 2) == wp_[None, :])).astype(np.float32) * 0.25
    if pad_cols > mat.shape[1]:
        mat = np.pad(mat, ((0, 0), (0, pad_cols - mat.shape[1])))
    return mat


_P1 = _pool_matrix(28, 28, WP0, A1W)                                      # [840, 256]
_P2T = np.pad(_pool_matrix(12, 12, WP1, 36).T, ((0, A2H - 36), (0, 0)))   # [40, 168]


# ------------------------------ forward wrapper -----------------------------
def ebasenet_forward(params, x):
    N, C, H, W = x.shape
    assert (C, H, W) == (3, 28, 28), "eBaseNet expects 3x28x28 inputs"

    # one-time, tiny layout prep (all heavy work happens inside the kernel)
    xp = jnp.pad(x, ((0, 0), (0, 0), (1, 1), (1, 1))).reshape(N, 3, WP0 * WP0)
    xp = jnp.pad(xp, ((0, 0), (0, CIN0 - 3), (0, X0W - WP0 * WP0)))  # [N,8,1024]

    w1t = jnp.pad(params["conv1_w"], ((0, 0), (0, CIN0 - 3), (0, 0), (0, 0)))
    w1t = w1t.transpose(2, 3, 0, 1).reshape(9, 16, CIN0)          # [9,16,8]
    w2t = params["conv2_w"].transpose(2, 3, 0, 1).reshape(9, 32, 16)
    w3t = params["conv3_w"].transpose(2, 3, 1, 0).reshape(9, 32, 64)
    b1 = params["conv1_b"].reshape(16, 1)
    b2 = params["conv2_b"].reshape(32, 1)
    b3 = params["conv3_b"].reshape(1, 64)
    # fold the NCHW flatten (f = c*16 + ho*4 + wo) into a per-spatial-position
    # fc1 weight stack: wfc1[s, c, o] = fc1_w[o, c*16 + s]
    wfc1 = params["fc1_w"].reshape(128, 64, 16).transpose(2, 1, 0)  # [16,64,128]
    bfc1 = params["fc1_b"].reshape(1, 128)
    wfc2 = params["fc2_w"].T                                        # [128, 7]
    bfc2 = params["fc2_b"].reshape(1, 7)
    p1 = jnp.asarray(_P1)
    p2t = jnp.asarray(_P2T)

    flops_per_sample = (
        9 * 2 * 16 * CIN0 * L1 + 2 * 16 * L1 * A1W +
        9 * 2 * 32 * 16 * L2 + 2 * A2H * L2 * 32 +
        9 * 2 * L3 * 32 * 64 + 2 * 1024 * 128 + 2 * 128 * 7)
    const_bytes = 4 * (9 * 16 * CIN0 + 16 + 9 * 32 * 16 + 32 + 9 * 32 * 64 + 64 +
                       L1 * A1W + A2H * L2 + 1024 * 128 + 128 + 128 * 7 + 7)

    out = pl.pallas_call(
        _ebasenet_kernel,
        out_shape=jax.ShapeDtypeStruct((N, 1, 7), jnp.float32),
        grid=(N,),
        in_specs=[
            pl.BlockSpec((1, CIN0, X0W), lambda n: (n, 0, 0)),     # x (per sample)
            pl.BlockSpec((9, 16, CIN0), lambda n: (0, 0, 0)),      # conv1 taps
            pl.BlockSpec((16, 1), lambda n: (0, 0)),               # conv1 bias
            pl.BlockSpec((9, 32, 16), lambda n: (0, 0, 0)),        # conv2 taps
            pl.BlockSpec((32, 1), lambda n: (0, 0)),               # conv2 bias
            pl.BlockSpec((9, 32, 64), lambda n: (0, 0, 0)),        # conv3 taps
            pl.BlockSpec((1, 64), lambda n: (0, 0)),               # conv3 bias
            pl.BlockSpec((L1, A1W), lambda n: (0, 0)),             # pool1 matrix
            pl.BlockSpec((A2H, L2), lambda n: (0, 0)),             # pool2 matrix^T
            pl.BlockSpec((16, 64, 128), lambda n: (0, 0, 0)),      # fc1 weight stack
            pl.BlockSpec((1, 128), lambda n: (0, 0)),              # fc1 bias
            pl.BlockSpec((128, 7), lambda n: (0, 0)),              # fc2 weight^T
            pl.BlockSpec((1, 7), lambda n: (0, 0)),                # fc2 bias
        ],
        out_specs=pl.BlockSpec((1, 1, 7), lambda n: (n, 0, 0)),
        compiler_params=pltpu.CompilerParams(
            dimension_semantics=("parallel",)),
        cost_estimate=pl.CostEstimate(
            flops=N * flops_per_sample,
            transcendentals=0,
            bytes_accessed=N * (CIN0 * X0W * 4 + 7 * 4) + const_bytes),
    )(xp, w1t, b1, w2t, b2, w3t, b3, p1, p2t, wfc1, bfc1, wfc2, bfc2)
    return out.reshape(N, 7)


# ------------------------------ params / reference --------------------------
def init_params(key):
    ks = jax.random.split(key, 10)

    def u(k, shape, fan_in):
        bound = 1.0 / jnp.sqrt(float(fan_in))
        return jax.random.uniform(k, shape, jnp.float32, -bound, bound)

    return {
        "conv1_w": u(ks[0], (16, 3, 3, 3), 3 * 9),
        "conv1_b": u(ks[1], (16,), 3 * 9),
        "conv2_w": u(ks[2], (32, 16, 3, 3), 16 * 9),
        "conv2_b": u(ks[3], (32,), 16 * 9),
        "conv3_w": u(ks[4], (64, 32, 3, 3), 32 * 9),
        "conv3_b": u(ks[5], (64,), 32 * 9),
        "fc1_w": u(ks[6], (128, 1024), 1024),
        "fc1_b": u(ks[7], (128,), 1024),
        "fc2_w": u(ks[8], (7, 128), 128),
        "fc2_b": u(ks[9], (7,), 128),
    }


def reference_forward(params, x):
    """Pure-JAX (XLA) reference, full-f32 precision."""
    prec = jax.lax.Precision.HIGHEST

    def conv(x, w, b, pad):
        y = jax.lax.conv_general_dilated(
            x, w, (1, 1), [(pad, pad), (pad, pad)],
            dimension_numbers=("NCHW", "OIHW", "NCHW"), precision=prec)
        return y + b[None, :, None, None]

    def pool(x):
        N, C, H, W = x.shape
        return x.reshape(N, C, H // 2, 2, W // 2, 2).mean(axis=(3, 5))

    x = conv(x, params["conv1_w"], params["conv1_b"], 1) ** 2
    x = pool(x)
    x = conv(x, params["conv2_w"], params["conv2_b"], 0) ** 2
    x = pool(x)
    x = conv(x, params["conv3_w"], params["conv3_b"], 0) ** 2
    x = x.reshape(x.shape[0], -1)
    x = (jnp.dot(x, params["fc1_w"].T, precision=prec) + params["fc1_b"]) ** 2
    x = jnp.dot(x, params["fc2_w"].T, precision=prec) + params["fc2_b"]
    return x


if __name__ == "__main__":
    key = jax.random.PRNGKey(0)
    pkey, xkey = jax.random.split(key)
    params = init_params(pkey)

    # eBaseNet expects 3x28x28 inputs (64 * 4 * 4 = 1024 flattened features).
    x = jax.random.normal(xkey, (2, 3, 28, 28), jnp.float32)

    out = jax.block_until_ready(jax.jit(ebasenet_forward)(params, x))
    assert out.shape == (2, 7) and out.dtype == jnp.float32

    ref = reference_forward(params, x)
    rel_err = jnp.linalg.norm(out - ref) / (jnp.linalg.norm(ref) + 1e-12)
    if not bool(rel_err < 1e-3):
        raise AssertionError(f"mismatch vs reference, rel_err={rel_err}")

    print("KERNEL_OK")
</pallas_src>

<mosaic_0001>
module attributes {stable_mosaic.version = 11 : i64} {
  func.func @_ebasenet_kernel(%arg0: i32, %arg1: memref<1x8x1024xf32, #tpu.memory_space<vmem>>, %arg2: memref<9x16x8xf32, #tpu.memory_space<vmem>>, %arg3: memref<16x1xf32, #tpu.memory_space<vmem>>, %arg4: memref<9x32x16xf32, #tpu.memory_space<vmem>>, %arg5: memref<32x1xf32, #tpu.memory_space<vmem>>, %arg6: memref<9x32x64xf32, #tpu.memory_space<vmem>>, %arg7: memref<1x64xf32, #tpu.memory_space<vmem>>, %arg8: memref<840x256xf32, #tpu.memory_space<vmem>>, %arg9: memref<40x168xf32, #tpu.memory_space<vmem>>, %arg10: memref<16x64x128xf32, #tpu.memory_space<vmem>>, %arg11: memref<1x128xf32, #tpu.memory_space<vmem>>, %arg12: memref<128x7xf32, #tpu.memory_space<vmem>>, %arg13: memref<1x7xf32, #tpu.memory_space<vmem>>, %arg14: memref<1x1x7xf32, #tpu.memory_space<vmem>>) attributes {dimension_semantics = [#tpu.dimension_semantics<parallel>], iteration_bounds = array<i64: 2>, scalar_prefetch = 0 : i64, scratch_operands = 0 : i64, tpu.core_type = #tpu.core_type<tc>, window_params = [{transform_indices = @transform_0, window_bounds = array<i64: 1, 8, 1024>}, {pipeline_mode = #tpu.pipeline_mode<synchronous>, transform_indices = @transform_1, window_bounds = array<i64: 9, 16, 8>}, {pipeline_mode = #tpu.pipeline_mode<synchronous>, transform_indices = @transform_2, window_bounds = array<i64: 16, 1>}, {pipeline_mode = #tpu.pipeline_mode<synchronous>, transform_indices = @transform_3, window_bounds = array<i64: 9, 32, 16>}, {pipeline_mode = #tpu.pipeline_mode<synchronous>, transform_indices = @transform_4, window_bounds = array<i64: 32, 1>}, {pipeline_mode = #tpu.pipeline_mode<synchronous>, transform_indices = @transform_5, window_bounds = array<i64: 9, 32, 64>}, {pipeline_mode = #tpu.pipeline_mode<synchronous>, transform_indices = @transform_6, window_bounds = array<i64: 1, 64>}, {pipeline_mode = #tpu.pipeline_mode<synchronous>, transform_indices = @transform_7, window_bounds = array<i64: 840, 256>}, {pipeline_mode = #tpu.pipeline_mode<synchronous>, transform_indices = @transform_8, window_bounds = array<i64: 40, 168>}, {pipeline_mode = #tpu.pipeline_mode<synchronous>, transform_indices = @transform_9, window_bounds = array<i64: 16, 64, 128>}, {pipeline_mode = #tpu.pipeline_mode<synchronous>, transform_indices = @transform_10, window_bounds = array<i64: 1, 128>}, {pipeline_mode = #tpu.pipeline_mode<synchronous>, transform_indices = @transform_11, window_bounds = array<i64: 128, 7>}, {pipeline_mode = #tpu.pipeline_mode<synchronous>, transform_indices = @transform_12, window_bounds = array<i64: 1, 7>}, {transform_indices = @transform_13, window_bounds = array<i64: 1, 1, 7>}]} {
    %c0 = arith.constant 0 : index
    %c0_0 = arith.constant 0 : index
    %c0_1 = arith.constant 0 : index
    %0 = vector.load %arg1[%c0, %c0_0, %c0_1] : memref<1x8x1024xf32, #tpu.memory_space<vmem>>, vector<1x8x1024xf32>
    %1 = vector.shape_cast %0 : vector<1x8x1024xf32> to vector<8x1024xf32>
    %cst = arith.constant 0.000000e+00 : f32
    %2 = vector.broadcast %cst : f32 to vector<16x840xf32>
    %c0_2 = arith.constant 0 : index
    %c0_3 = arith.constant 0 : index
    %c0_4 = arith.constant 0 : index
    %3 = vector.load %arg2[%c0_2, %c0_3, %c0_4] : memref<9x16x8xf32, #tpu.memory_space<vmem>>, vector<1x16x8xf32>
    %4 = vector.shape_cast %3 : vector<1x16x8xf32> to vector<16x8xf32>
    %5 = vector.extract_strided_slice %1 {offsets = [0, 0], sizes = [8, 840], strides = [1, 1]} : vector<8x1024xf32> to vector<8x840xf32>
    %cst_5 = arith.constant dense<0.000000e+00> : vector<16x840xf32>
    %6 = tpu.matmul %4, %5, %cst_5 {dimension_numbers = #tpu.dot_dimension_numbers<[1], [0], [0], [1], [0, 0, 1, 1], [], []>} : vector<16x8xf32>, vector<8x840xf32>, vector<16x840xf32> -> vector<16x840xf32>
    %7 = arith.addf %2, %6 : vector<16x840xf32>
    %c1 = arith.constant 1 : index
    %c0_6 = arith.constant 0 : index
    %c0_7 = arith.constant 0 : index
    %8 = vector.load %arg2[%c1, %c0_6, %c0_7] : memref<9x16x8xf32, #tpu.memory_space<vmem>>, vector<1x16x8xf32>
    %9 = vector.shape_cast %8 : vector<1x16x8xf32> to vector<16x8xf32>
    %10 = vector.extract_strided_slice %1 {offsets = [0, 1], sizes = [8, 840], strides = [1, 1]} : vector<8x1024xf32> to vector<8x840xf32>
    %cst_8 = arith.constant dense<0.000000e+00> : vector<16x840xf32>
    %11 = tpu.matmul %9, %10, %cst_8 {dimension_numbers = #tpu.dot_dimension_numbers<[1], [0], [0], [1], [0, 0, 1, 1], [], []>} : vector<16x8xf32>, vector<8x840xf32>, vector<16x840xf32> -> vector<16x840xf32>
    %12 = arith.addf %7, %11 : vector<16x840xf32>
    %c2 = arith.constant 2 : index
    %c0_9 = arith.constant 0 : index
    %c0_10 = arith.constant 0 : index
    %13 = vector.load %arg2[%c2, %c0_9, %c0_10] : memref<9x16x8xf32, #tpu.memory_space<vmem>>, vector<1x16x8xf32>
    %14 = vector.shape_cast %13 : vector<1x16x8xf32> to vector<16x8xf32>
    %15 = vector.extract_strided_slice %1 {offsets = [0, 2], sizes = [8, 840], strides = [1, 1]} : vector<8x1024xf32> to vector<8x840xf32>
    %cst_11 = arith.constant dense<0.000000e+00> : vector<16x840xf32>
    %16 = tpu.matmul %14, %15, %cst_11 {dimension_numbers = #tpu.dot_dimension_numbers<[1], [0], [0], [1], [0, 0, 1, 1], [], []>} : vector<16x8xf32>, vector<8x840xf32>, vector<16x840xf32> -> vector<16x840xf32>
    %17 = arith.addf %12, %16 : vector<16x840xf32>
    %c3 = arith.constant 3 : index
    %c0_12 = arith.constant 0 : index
    %c0_13 = arith.constant 0 : index
    %18 = vector.load %arg2[%c3, %c0_12, %c0_13] : memref<9x16x8xf32, #tpu.memory_space<vmem>>, vector<1x16x8xf32>
    %19 = vector.shape_cast %18 : vector<1x16x8xf32> to vector<16x8xf32>
    %20 = vector.extract_strided_slice %1 {offsets = [0, 30], sizes = [8, 840], strides = [1, 1]} : vector<8x1024xf32> to vector<8x840xf32>
    %cst_14 = arith.constant dense<0.000000e+00> : vector<16x840xf32>
    %21 = tpu.matmul %19, %20, %cst_14 {dimension_numbers = #tpu.dot_dimension_numbers<[1], [0], [0], [1], [0, 0, 1, 1], [], []>} : vector<16x8xf32>, vector<8x840xf32>, vector<16x840xf32> -> vector<16x840xf32>
    %22 = arith.addf %17, %21 : vector<16x840xf32>
    %c4 = arith.constant 4 : index
    %c0_15 = arith.constant 0 : index
    %c0_16 = arith.constant 0 : index
    %23 = vector.load %arg2[%c4, %c0_15, %c0_16] : memref<9x16x8xf32, #tpu.memory_space<vmem>>, vector<1x16x8xf32>
    %24 = vector.shape_cast %23 : vector<1x16x8xf32> to vector<16x8xf32>
    %25 = vector.extract_strided_slice %1 {offsets = [0, 31], sizes = [8, 840], strides = [1, 1]} : vector<8x1024xf32> to vector<8x840xf32>
    %cst_17 = arith.constant dense<0.000000e+00> : vector<16x840xf32>
    %26 = tpu.matmul %24, %25, %cst_17 {dimension_numbers = #tpu.dot_dimension_numbers<[1], [0], [0], [1], [0, 0, 1, 1], [], []>} : vector<16x8xf32>, vector<8x840xf32>, vector<16x840xf32> -> vector<16x840xf32>
    %27 = arith.addf %22, %26 : vector<16x840xf32>
    %c5 = arith.constant 5 : index
    %c0_18 = arith.constant 0 : index
    %c0_19 = arith.constant 0 : index
    %28 = vector.load %arg2[%c5, %c0_18, %c0_19] : memref<9x16x8xf32, #tpu.memory_space<vmem>>, vector<1x16x8xf32>
    %29 = vector.shape_cast %28 : vector<1x16x8xf32> to vector<16x8xf32>
    %30 = vector.extract_strided_slice %1 {offsets = [0, 32], sizes = [8, 840], strides = [1, 1]} : vector<8x1024xf32> to vector<8x840xf32>
    %cst_20 = arith.constant dense<0.000000e+00> : vector<16x840xf32>
    %31 = tpu.matmul %29, %30, %cst_20 {dimension_numbers = #tpu.dot_dimension_numbers<[1], [0], [0], [1], [0, 0, 1, 1], [], []>} : vector<16x8xf32>, vector<8x840xf32>, vector<16x840xf32> -> vector<16x840xf32>
    %32 = arith.addf %27, %31 : vector<16x840xf32>
    %c6 = arith.constant 6 : index
    %c0_21 = arith.constant 0 : index
    %c0_22 = arith.constant 0 : index
    %33 = vector.load %arg2[%c6, %c0_21, %c0_22] : memref<9x16x8xf32, #tpu.memory_space<vmem>>, vector<1x16x8xf32>
    %34 = vector.shape_cast %33 : vector<1x16x8xf32> to vector<16x8xf32>
    %35 = vector.extract_strided_slice %1 {offsets = [0, 60], sizes = [8, 840], strides = [1, 1]} : vector<8x1024xf32> to vector<8x840xf32>
    %cst_23 = arith.constant dense<0.000000e+00> : vector<16x840xf32>
    %36 = tpu.matmul %34, %35, %cst_23 {dimension_numbers = #tpu.dot_dimension_numbers<[1], [0], [0], [1], [0, 0, 1, 1], [], []>} : vector<16x8xf32>, vector<8x840xf32>, vector<16x840xf32> -> vector<16x840xf32>
    %37 = arith.addf %32, %36 : vector<16x840xf32>
    %c7 = arith.constant 7 : index
    %c0_24 = arith.constant 0 : index
    %c0_25 = arith.constant 0 : index
    %38 = vector.load %arg2[%c7, %c0_24, %c0_25] : memref<9x16x8xf32, #tpu.memory_space<vmem>>, vector<1x16x8xf32>
    %39 = vector.shape_cast %38 : vector<1x16x8xf32> to vector<16x8xf32>
    %40 = vector.extract_strided_slice %1 {offsets = [0, 61], sizes = [8, 840], strides = [1, 1]} : vector<8x1024xf32> to vector<8x840xf32>
    %cst_26 = arith.constant dense<0.000000e+00> : vector<16x840xf32>
    %41 = tpu.matmul %39, %40, %cst_26 {dimension_numbers = #tpu.dot_dimension_numbers<[1], [0], [0], [1], [0, 0, 1, 1], [], []>} : vector<16x8xf32>, vector<8x840xf32>, vector<16x840xf32> -> vector<16x840xf32>
    %42 = arith.addf %37, %41 : vector<16x840xf32>
    %c8 = arith.constant 8 : index
    %c0_27 = arith.constant 0 : index
    %c0_28 = arith.constant 0 : index
    %43 = vector.load %arg2[%c8, %c0_27, %c0_28] : memref<9x16x8xf32, #tpu.memory_space<vmem>>, vector<1x16x8xf32>
    %44 = vector.shape_cast %43 : vector<1x16x8xf32> to vector<16x8xf32>
    %45 = vector.extract_strided_slice %1 {offsets = [0, 62], sizes = [8, 840], strides = [1, 1]} : vector<8x1024xf32> to vector<8x840xf32>
    %cst_29 = arith.constant dense<0.000000e+00> : vector<16x840xf32>
    %46 = tpu.matmul %44, %45, %cst_29 {dimension_numbers = #tpu.dot_dimension_numbers<[1], [0], [0], [1], [0, 0, 1, 1], [], []>} : vector<16x8xf32>, vector<8x840xf32>, vector<16x840xf32> -> vector<16x840xf32>
    %47 = arith.addf %42, %46 : vector<16x840xf32>
    %c0_30 = arith.constant 0 : index
    %c0_31 = arith.constant 0 : index
    %48 = vector.load %arg3[%c0_30, %c0_31] : memref<16x1xf32, #tpu.memory_space<vmem>>, vector<16x1xf32>
    %49 = vector.broadcast %48 : vector<16x1xf32> to vector<16x840xf32>
    %50 = arith.addf %47, %49 : vector<16x840xf32>
    %51 = arith.mulf %50, %50 : vector<16x840xf32>
    %c0_32 = arith.constant 0 : index
    %c0_33 = arith.constant 0 : index
    %52 = vector.load %arg8[%c0_32, %c0_33] : memref<840x256xf32, #tpu.memory_space<vmem>>, vector<840x256xf32>
    %cst_34 = arith.constant dense<0.000000e+00> : vector<16x256xf32>
    %53 = tpu.matmul %51, %52, %cst_34 {dimension_numbers = #tpu.dot_dimension_numbers<[1], [0], [0], [1], [0, 0, 1, 1], [], []>} : vector<16x840xf32>, vector<840x256xf32>, vector<16x256xf32> -> vector<16x256xf32>
    %cst_35 = arith.constant 0.000000e+00 : f32
    %54 = vector.broadcast %cst_35 : f32 to vector<32x168xf32>
    %c0_36 = arith.constant 0 : index
    %c0_37 = arith.constant 0 : index
    %c0_38 = arith.constant 0 : index
    %55 = vector.load %arg4[%c0_36, %c0_37, %c0_38] : memref<9x32x16xf32, #tpu.memory_space<vmem>>, vector<1x32x16xf32>
    %56 = vector.shape_cast %55 : vector<1x32x16xf32> to vector<32x16xf32>
    %57 = vector.extract_strided_slice %53 {offsets = [0, 0], sizes = [16, 168], strides = [1, 1]} : vector<16x256xf32> to vector<16x168xf32>
    %cst_39 = arith.constant dense<0.000000e+00> : vector<32x168xf32>
    %58 = tpu.matmul %56, %57, %cst_39 {dimension_numbers = #tpu.dot_dimension_numbers<[1], [0], [0], [1], [0, 0, 1, 1], [], []>} : vector<32x16xf32>, vector<16x168xf32>, vector<32x168xf32> -> vector<32x168xf32>
    %59 = arith.addf %54, %58 : vector<32x168xf32>
    %c1_40 = arith.constant 1 : index
    %c0_41 = arith.constant 0 : index
    %c0_42 = arith.constant 0 : index
    %60 = vector.load %arg4[%c1_40, %c0_41, %c0_42] : memref<9x32x16xf32, #tpu.memory_space<vmem>>, vector<1x32x16xf32>
    %61 = vector.shape_cast %60 : vector<1x32x16xf32> to vector<32x16xf32>
    %62 = vector.extract_strided_slice %53 {offsets = [0, 1], sizes = [16, 168], strides = [1, 1]} : vector<16x256xf32> to vector<16x168xf32>
    %cst_43 = arith.constant dense<0.000000e+00> : vector<32x168xf32>
    %63 = tpu.matmul %61, %62, %cst_43 {dimension_numbers = #tpu.dot_dimension_numbers<[1], [0], [0], [1], [0, 0, 1, 1], [], []>} : vector<32x16xf32>, vector<16x168xf32>, vector<32x168xf32> -> vector<32x168xf32>
    %64 = arith.addf %59, %63 : vector<32x168xf32>
    %c2_44 = arith.constant 2 : index
    %c0_45 = arith.constant 0 : index
    %c0_46 = arith.constant 0 : index
    %65 = vector.load %arg4[%c2_44, %c0_45, %c0_46] : memref<9x32x16xf32, #tpu.memory_space<vmem>>, vector<1x32x16xf32>
    %66 = vector.shape_cast %65 : vector<1x32x16xf32> to vector<32x16xf32>
    %67 = vector.extract_strided_slice %53 {offsets = [0, 2], sizes = [16, 168], strides = [1, 1]} : vector<16x256xf32> to vector<16x168xf32>
    %cst_47 = arith.constant dense<0.000000e+00> : vector<32x168xf32>
    %68 = tpu.matmul %66, %67, %cst_47 {dimension_numbers = #tpu.dot_dimension_numbers<[1], [0], [0], [1], [0, 0, 1, 1], [], []>} : vector<32x16xf32>, vector<16x168xf32>, vector<32x168xf32> -> vector<32x168xf32>
    %69 = arith.addf %64, %68 : vector<32x168xf32>
    %c3_48 = arith.constant 3 : index
    %c0_49 = arith.constant 0 : index
    %c0_50 = arith.constant 0 : index
    %70 = vector.load %arg4[%c3_48, %c0_49, %c0_50] : memref<9x32x16xf32, #tpu.memory_space<vmem>>, vector<1x32x16xf32>
    %71 = vector.shape_cast %70 : vector<1x32x16xf32> to vector<32x16xf32>
    %72 = vector.extract_strided_slice %53 {offsets = [0, 14], sizes = [16, 168], strides = [1, 1]} : vector<16x256xf32> to vector<16x168xf32>
    %cst_51 = arith.constant dense<0.000000e+00> : vector<32x168xf32>
    %73 = tpu.matmul %71, %72, %cst_51 {dimension_numbers = #tpu.dot_dimension_numbers<[1], [0], [0], [1], [0, 0, 1, 1], [], []>} : vector<32x16xf32>, vector<16x168xf32>, vector<32x168xf32> -> vector<32x168xf32>
    %74 = arith.addf %69, %73 : vector<32x168xf32>
    %c4_52 = arith.constant 4 : index
    %c0_53 = arith.constant 0 : index
    %c0_54 = arith.constant 0 : index
    %75 = vector.load %arg4[%c4_52, %c0_53, %c0_54] : memref<9x32x16xf32, #tpu.memory_space<vmem>>, vector<1x32x16xf32>
    %76 = vector.shape_cast %75 : vector<1x32x16xf32> to vector<32x16xf32>
    %77 = vector.extract_strided_slice %53 {offsets = [0, 15], sizes = [16, 168], strides = [1, 1]} : vector<16x256xf32> to vector<16x168xf32>
    %cst_55 = arith.constant dense<0.000000e+00> : vector<32x168xf32>
    %78 = tpu.matmul %76, %77, %cst_55 {dimension_numbers = #tpu.dot_dimension_numbers<[1], [0], [0], [1], [0, 0, 1, 1], [], []>} : vector<32x16xf32>, vector<16x168xf32>, vector<32x168xf32> -> vector<32x168xf32>
    %79 = arith.addf %74, %78 : vector<32x168xf32>
    %c5_56 = arith.constant 5 : index
    %c0_57 = arith.constant 0 : index
    %c0_58 = arith.constant 0 : index
    %80 = vector.load %arg4[%c5_56, %c0_57, %c0_58] : memref<9x32x16xf32, #tpu.memory_space<vmem>>, vector<1x32x16xf32>
    %81 = vector.shape_cast %80 : vector<1x32x16xf32> to vector<32x16xf32>
    %82 = vector.extract_strided_slice %53 {offsets = [0, 16], sizes = [16, 168], strides = [1, 1]} : vector<16x256xf32> to vector<16x168xf32>
    %cst_59 = arith.constant dense<0.000000e+00> : vector<32x168xf32>
    %83 = tpu.matmul %81, %82, %cst_59 {dimension_numbers = #tpu.dot_dimension_numbers<[1], [0], [0], [1], [0, 0, 1, 1], [], []>} : vector<32x16xf32>, vector<16x168xf32>, vector<32x168xf32> -> vector<32x168xf32>
    %84 = arith.addf %79, %83 : vector<32x168xf32>
    %c6_60 = arith.constant 6 : index
    %c0_61 = arith.constant 0 : index
    %c0_62 = arith.constant 0 : index
    %85 = vector.load %arg4[%c6_60, %c0_61, %c0_62] : memref<9x32x16xf32, #tpu.memory_space<vmem>>, vector<1x32x16xf32>
    %86 = vector.shape_cast %85 : vector<1x32x16xf32> to vector<32x16xf32>
    %87 = vector.extract_strided_slice %53 {offsets = [0, 28], sizes = [16, 168], strides = [1, 1]} : vector<16x256xf32> to vector<16x168xf32>
    %cst_63 = arith.constant dense<0.000000e+00> : vector<32x168xf32>
    %88 = tpu.matmul %86, %87, %cst_63 {dimension_numbers = #tpu.dot_dimension_numbers<[1], [0], [0], [1], [0, 0, 1, 1], [], []>} : vector<32x16xf32>, vector<16x168xf32>, vector<32x168xf32> -> vector<32x168xf32>
    %89 = arith.addf %84, %88 : vector<32x168xf32>
    %c7_64 = arith.constant 7 : index
    %c0_65 = arith.constant 0 : index
    %c0_66 = arith.constant 0 : index
    %90 = vector.load %arg4[%c7_64, %c0_65, %c0_66] : memref<9x32x16xf32, #tpu.memory_space<vmem>>, vector<1x32x16xf32>
    %91 = vector.shape_cast %90 : vector<1x32x16xf32> to vector<32x16xf32>
    %92 = vector.extract_strided_slice %53 {offsets = [0, 29], sizes = [16, 168], strides = [1, 1]} : vector<16x256xf32> to vector<16x168xf32>
    %cst_67 = arith.constant dense<0.000000e+00> : vector<32x168xf32>
    %93 = tpu.matmul %91, %92, %cst_67 {dimension_numbers = #tpu.dot_dimension_numbers<[1], [0], [0], [1], [0, 0, 1, 1], [], []>} : vector<32x16xf32>, vector<16x168xf32>, vector<32x168xf32> -> vector<32x168xf32>
    %94 = arith.addf %89, %93 : vector<32x168xf32>
    %c8_68 = arith.constant 8 : index
    %c0_69 = arith.constant 0 : index
    %c0_70 = arith.constant 0 : index
    %95 = vector.load %arg4[%c8_68, %c0_69, %c0_70] : memref<9x32x16xf32, #tpu.memory_space<vmem>>, vector<1x32x16xf32>
    %96 = vector.shape_cast %95 : vector<1x32x16xf32> to vector<32x16xf32>
    %97 = vector.extract_strided_slice %53 {offsets = [0, 30], sizes = [16, 168], strides = [1, 1]} : vector<16x256xf32> to vector<16x168xf32>
    %cst_71 = arith.constant dense<0.000000e+00> : vector<32x168xf32>
    %98 = tpu.matmul %96, %97, %cst_71 {dimension_numbers = #tpu.dot_dimension_numbers<[1], [0], [0], [1], [0, 0, 1, 1], [], []>} : vector<32x16xf32>, vector<16x168xf32>, vector<32x168xf32> -> vector<32x168xf32>
    %99 = arith.addf %94, %98 : vector<32x168xf32>
    %c0_72 = arith.constant 0 : index
    %c0_73 = arith.constant 0 : index
    %100 = vector.load %arg5[%c0_72, %c0_73] : memref<32x1xf32, #tpu.memory_space<vmem>>, vector<32x1xf32>
    %101 = vector.broadcast %100 : vector<32x1xf32> to vector<32x168xf32>
    %102 = arith.addf %99, %101 : vector<32x168xf32>
    %103 = arith.mulf %102, %102 : vector<32x168xf32>
    %c0_74 = arith.constant 0 : index
    %c0_75 = arith.constant 0 : index
    %104 = vector.load %arg9[%c0_74, %c0_75] : memref<40x168xf32, #tpu.memory_space<vmem>>, vector<40x168xf32>
    %cst_76 = arith.constant dense<0.000000e+00> : vector<40x32xf32>
    %105 = tpu.matmul %104, %103, %cst_76 {dimension_numbers = #tpu.dot_dimension_numbers<[1], [1], [0], [0], [0, 0, 1, 0], [], []>} : vector<40x168xf32>, vector<32x168xf32>, vector<40x32xf32> -> vector<40x32xf32>
    %cst_77 = arith.constant 0.000000e+00 : f32
    %106 = vector.broadcast %cst_77 : f32 to vector<24x64xf32>
    %107 = vector.extract_strided_slice %105 {offsets = [0, 0], sizes = [24, 32], strides = [1, 1]} : vector<40x32xf32> to vector<24x32xf32>
    %c0_78 = arith.constant 0 : index
    %c0_79 = arith.constant 0 : index
    %c0_80 = arith.constant 0 : index
    %108 = vector.load %arg6[%c0_78, %c0_79, %c0_80] : memref<9x32x64xf32, #tpu.memory_space<vmem>>, vector<1x32x64xf32>
    %109 = vector.shape_cast %108 : vector<1x32x64xf32> to vector<32x64xf32>
    %cst_81 = arith.constant dense<0.000000e+00> : vector<24x64xf32>
    %110 = tpu.matmul %107, %109, %cst_81 {dimension_numbers = #tpu.dot_dimension_numbers<[1], [0], [0], [1], [0, 0, 1, 1], [], []>} : vector<24x32xf32>, vector<32x64xf32>, vector<24x64xf32> -> vector<24x64xf32>
    %111 = arith.addf %106, %110 : vector<24x64xf32>
    %112 = vector.extract_strided_slice %105 {offsets = [1, 0], sizes = [24, 32], strides = [1, 1]} : vector<40x32xf32> to vector<24x32xf32>
    %c1_82 = arith.constant 1 : index
    %c0_83 = arith.constant 0 : index
    %c0_84 = arith.constant 0 : index
    %113 = vector.load %arg6[%c1_82, %c0_83, %c0_84] : memref<9x32x64xf32, #tpu.memory_space<vmem>>, vector<1x32x64xf32>
    %114 = vector.shape_cast %113 : vector<1x32x64xf32> to vector<32x64xf32>
    %cst_85 = arith.constant dense<0.000000e+00> : vector<24x64xf32>
    %115 = tpu.matmul %112, %114, %cst_85 {dimension_numbers = #tpu.dot_dimension_numbers<[1], [0], [0], [1], [0, 0, 1, 1], [], []>} : vector<24x32xf32>, vector<32x64xf32>, vector<24x64xf32> -> vector<24x64xf32>
    %116 = arith.addf %111, %115 : vector<24x64xf32>
    %117 = vector.extract_strided_slice %105 {offsets = [2, 0], sizes = [24, 32], strides = [1, 1]} : vector<40x32xf32> to vector<24x32xf32>
    %c2_86 = arith.constant 2 : index
    %c0_87 = arith.constant 0 : index
    %c0_88 = arith.constant 0 : index
    %118 = vector.load %arg6[%c2_86, %c0_87, %c0_88] : memref<9x32x64xf32, #tpu.memory_space<vmem>>, vector<1x32x64xf32>
    %119 = vector.shape_cast %118 : vector<1x32x64xf32> to vector<32x64xf32>
    %cst_89 = arith.constant dense<0.000000e+00> : vector<24x64xf32>
    %120 = tpu.matmul %117, %119, %cst_89 {dimension_numbers = #tpu.dot_dimension_numbers<[1], [0], [0], [1], [0, 0, 1, 1], [], []>} : vector<24x32xf32>, vector<32x64xf32>, vector<24x64xf32> -> vector<24x64xf32>
    %121 = arith.addf %116, %120 : vector<24x64xf32>
    %122 = vector.extract_strided_slice %105 {offsets = [6, 0], sizes = [24, 32], strides = [1, 1]} : vector<40x32xf32> to vector<24x32xf32>
    %c3_90 = arith.constant 3 : index
    %c0_91 = arith.constant 0 : index
    %c0_92 = arith.constant 0 : index
    %123 = vector.load %arg6[%c3_90, %c0_91, %c0_92] : memref<9x32x64xf32, #tpu.memory_space<vmem>>, vector<1x32x64xf32>
    %124 = vector.shape_cast %123 : vector<1x32x64xf32> to vector<32x64xf32>
    %cst_93 = arith.constant dense<0.000000e+00> : vector<24x64xf32>
    %125 = tpu.matmul %122, %124, %cst_93 {dimension_numbers = #tpu.dot_dimension_numbers<[1], [0], [0], [1], [0, 0, 1, 1], [], []>} : vector<24x32xf32>, vector<32x64xf32>, vector<24x64xf32> -> vector<24x64xf32>
    %126 = arith.addf %121, %125 : vector<24x64xf32>
    %127 = vector.extract_strided_slice %105 {offsets = [7, 0], sizes = [24, 32], strides = [1, 1]} : vector<40x32xf32> to vector<24x32xf32>
    %c4_94 = arith.constant 4 : index
    %c0_95 = arith.constant 0 : index
    %c0_96 = arith.constant 0 : index
    %128 = vector.load %arg6[%c4_94, %c0_95, %c0_96] : memref<9x32x64xf32, #tpu.memory_space<vmem>>, vector<1x32x64xf32>
    %129 = vector.shape_cast %128 : vector<1x32x64xf32> to vector<32x64xf32>
    %cst_97 = arith.constant dense<0.000000e+00> : vector<24x64xf32>
    %130 = tpu.matmul %127, %129, %cst_97 {dimension_numbers = #tpu.dot_dimension_numbers<[1], [0], [0], [1], [0, 0, 1, 1], [], []>} : vector<24x32xf32>, vector<32x64xf32>, vector<24x64xf32> -> vector<24x64xf32>
    %131 = arith.addf %126, %130 : vector<24x64xf32>
    %132 = vector.extract_strided_slice %105 {offsets = [8, 0], sizes = [24, 32], strides = [1, 1]} : vector<40x32xf32> to vector<24x32xf32>
    %c5_98 = arith.constant 5 : index
    %c0_99 = arith.constant 0 : index
    %c0_100 = arith.constant 0 : index
    %133 = vector.load %arg6[%c5_98, %c0_99, %c0_100] : memref<9x32x64xf32, #tpu.memory_space<vmem>>, vector<1x32x64xf32>
    %134 = vector.shape_cast %133 : vector<1x32x64xf32> to vector<32x64xf32>
    %cst_101 = arith.constant dense<0.000000e+00> : vector<24x64xf32>
    %135 = tpu.matmul %132, %134, %cst_101 {dimension_numbers = #tpu.dot_dimension_numbers<[1], [0], [0], [1], [0, 0, 1, 1], [], []>} : vector<24x32xf32>, vector<32x64xf32>, vector<24x64xf32> -> vector<24x64xf32>
    %136 = arith.addf %131, %135 : vector<24x64xf32>
    %137 = vector.extract_strided_slice %105 {offsets = [12, 0], sizes = [24, 32], strides = [1, 1]} : vector<40x32xf32> to vector<24x32xf32>
    %c6_102 = arith.constant 6 : index
    %c0_103 = arith.constant 0 : index
    %c0_104 = arith.constant 0 : index
    %138 = vector.load %arg6[%c6_102, %c0_103, %c0_104] : memref<9x32x64xf32, #tpu.memory_space<vmem>>, vector<1x32x64xf32>
    %139 = vector.shape_cast %138 : vector<1x32x64xf32> to vector<32x64xf32>
    %cst_105 = arith.constant dense<0.000000e+00> : vector<24x64xf32>
    %140 = tpu.matmul %137, %139, %cst_105 {dimension_numbers = #tpu.dot_dimension_numbers<[1], [0], [0], [1], [0, 0, 1, 1], [], []>} : vector<24x32xf32>, vector<32x64xf32>, vector<24x64xf32> -> vector<24x64xf32>
    %141 = arith.addf %136, %140 : vector<24x64xf32>
    %142 = vector.extract_strided_slice %105 {offsets = [13, 0], sizes = [24, 32], strides = [1, 1]} : vector<40x32xf32> to vector<24x32xf32>
    %c7_106 = arith.constant 7 : index
    %c0_107 = arith.constant 0 : index
    %c0_108 = arith.constant 0 : index
    %143 = vector.load %arg6[%c7_106, %c0_107, %c0_108] : memref<9x32x64xf32, #tpu.memory_space<vmem>>, vector<1x32x64xf32>
    %144 = vector.shape_cast %143 : vector<1x32x64xf32> to vector<32x64xf32>
    %cst_109 = arith.constant dense<0.000000e+00> : vector<24x64xf32>
    %145 = tpu.matmul %142, %144, %cst_109 {dimension_numbers = #tpu.dot_dimension_numbers<[1], [0], [0], [1], [0, 0, 1, 1], [], []>} : vector<24x32xf32>, vector<32x64xf32>, vector<24x64xf32> -> vector<24x64xf32>
    %146 = arith.addf %141, %145 : vector<24x64xf32>
    %147 = vector.extract_strided_slice %105 {offsets = [14, 0], sizes = [24, 32], strides = [1, 1]} : vector<40x32xf32> to vector<24x32xf32>
    %c8_110 = arith.constant 8 : index
    %c0_111 = arith.constant 0 : index
    %c0_112 = arith.constant 0 : index
    %148 = vector.load %arg6[%c8_110, %c0_111, %c0_112] : memref<9x32x64xf32, #tpu.memory_space<vmem>>, vector<1x32x64xf32>
    %149 = vector.shape_cast %148 : vector<1x32x64xf32> to vector<32x64xf32>
    %cst_113 = arith.constant dense<0.000000e+00> : vector<24x64xf32>
    %150 = tpu.matmul %147, %149, %cst_113 {dimension_numbers = #tpu.dot_dimension_numbers<[1], [0], [0], [1], [0, 0, 1, 1], [], []>} : vector<24x32xf32>, vector<32x64xf32>, vector<24x64xf32> -> vector<24x64xf32>
    %151 = arith.addf %146, %150 : vector<24x64xf32>
    %c0_114 = arith.constant 0 : index
    %c0_115 = arith.constant 0 : index
    %152 = vector.load %arg7[%c0_114, %c0_115] : memref<1x64xf32, #tpu.memory_space<vmem>>, vector<1x64xf32>
    %153 = vector.broadcast %152 : vector<1x64xf32> to vector<24x64xf32>
    %154 = arith.addf %151, %153 : vector<24x64xf32>
    %155 = arith.mulf %154, %154 : vector<24x64xf32>
    %c0_116 = arith.constant 0 : index
    %c0_117 = arith.constant 0 : index
    %156 = vector.load %arg11[%c0_116, %c0_117] : memref<1x128xf32, #tpu.memory_space<vmem>>, vector<1x128xf32>
    %157 = vector.extract_strided_slice %155 {offsets = [0, 0], sizes = [1, 64], strides = [1, 1]} : vector<24x64xf32> to vector<1x64xf32>
    %c0_118 = arith.constant 0 : index
    %c0_119 = arith.constant 0 : index
    %c0_120 = arith.constant 0 : index
    %158 = vector.load %arg10[%c0_118, %c0_119, %c0_120] : memref<16x64x128xf32, #tpu.memory_space<vmem>>, vector<1x64x128xf32>
    %159 = vector.shape_cast %158 : vector<1x64x128xf32> to vector<64x128xf32>
    %cst_121 = arith.constant dense<0.000000e+00> : vector<1x128xf32>
    %160 = tpu.matmul %157, %159, %cst_121 {dimension_numbers = #tpu.dot_dimension_numbers<[1], [0], [0], [1], [0, 0, 1, 1], [], []>} : vector<1x64xf32>, vector<64x128xf32>, vector<1x128xf32> -> vector<1x128xf32>
    %161 = arith.addf %156, %160 : vector<1x128xf32>
    %162 = vector.extract_strided_slice %155 {offsets = [1, 0], sizes = [1, 64], strides = [1, 1]} : vector<24x64xf32> to vector<1x64xf32>
    %c1_122 = arith.constant 1 : index
    %c0_123 = arith.constant 0 : index
    %c0_124 = arith.constant 0 : index
    %163 = vector.load %arg10[%c1_122, %c0_123, %c0_124] : memref<16x64x128xf32, #tpu.memory_space<vmem>>, vector<1x64x128xf32>
    %164 = vector.shape_cast %163 : vector<1x64x128xf32> to vector<64x128xf32>
    %cst_125 = arith.constant dense<0.000000e+00> : vector<1x128xf32>
    %165 = tpu.matmul %162, %164, %cst_125 {dimension_numbers = #tpu.dot_dimension_numbers<[1], [0], [0], [1], [0, 0, 1, 1], [], []>} : vector<1x64xf32>, vector<64x128xf32>, vector<1x128xf32> -> vector<1x128xf32>
    %166 = arith.addf %161, %165 : vector<1x128xf32>
    %167 = vector.extract_strided_slice %155 {offsets = [2, 0], sizes = [1, 64], strides = [1, 1]} : vector<24x64xf32> to vector<1x64xf32>
    %c2_126 = arith.constant 2 : index
    %c0_127 = arith.constant 0 : index
    %c0_128 = arith.constant 0 : index
    %168 = vector.load %arg10[%c2_126, %c0_127, %c0_128] : memref<16x64x128xf32, #tpu.memory_space<vmem>>, vector<1x64x128xf32>
    %169 = vector.shape_cast %168 : vector<1x64x128xf32> to vector<64x128xf32>
    %cst_129 = arith.constant dense<0.000000e+00> : vector<1x128xf32>
    %170 = tpu.matmul %167, %169, %cst_129 {dimension_numbers = #tpu.dot_dimension_numbers<[1], [0], [0], [1], [0, 0, 1, 1], [], []>} : vector<1x64xf32>, vector<64x128xf32>, vector<1x128xf32> -> vector<1x128xf32>
    %171 = arith.addf %166, %170 : vector<1x128xf32>
    %172 = vector.extract_strided_slice %155 {offsets = [3, 0], sizes = [1, 64], strides = [1, 1]} : vector<24x64xf32> to vector<1x64xf32>
    %c3_130 = arith.constant 3 : index
    %c0_131 = arith.constant 0 : index
    %c0_132 = arith.constant 0 : index
    %173 = vector.load %arg10[%c3_130, %c0_131, %c0_132] : memref<16x64x128xf32, #tpu.memory_space<vmem>>, vector<1x64x128xf32>
    %174 = vector.shape_cast %173 : vector<1x64x128xf32> to vector<64x128xf32>
    %cst_133 = arith.constant dense<0.000000e+00> : vector<1x128xf32>
    %175 = tpu.matmul %172, %174, %cst_133 {dimension_numbers = #tpu.dot_dimension_numbers<[1], [0], [0], [1], [0, 0, 1, 1], [], []>} : vector<1x64xf32>, vector<64x128xf32>, vector<1x128xf32> -> vector<1x128xf32>
    %176 = arith.addf %171, %175 : vector<1x128xf32>
    %177 = vector.extract_strided_slice %155 {offsets = [6, 0], sizes = [1, 64], strides = [1, 1]} : vector<24x64xf32> to vector<1x64xf32>
    %c4_134 = arith.constant 4 : index
    %c0_135 = arith.constant 0 : index
    %c0_136 = arith.constant 0 : index
    %178 = vector.load %arg10[%c4_134, %c0_135, %c0_136] : memref<16x64x128xf32, #tpu.memory_space<vmem>>, vector<1x64x128xf32>
    %179 = vector.shape_cast %178 : vector<1x64x128xf32> to vector<64x128xf32>
    %cst_137 = arith.constant dense<0.000000e+00> : vector<1x128xf32>
    %180 = tpu.matmul %177, %179, %cst_137 {dimension_numbers = #tpu.dot_dimension_numbers<[1], [0], [0], [1], [0, 0, 1, 1], [], []>} : vector<1x64xf32>, vector<64x128xf32>, vector<1x128xf32> -> vector<1x128xf32>
    %181 = arith.addf %176, %180 : vector<1x128xf32>
    %182 = vector.extract_strided_slice %155 {offsets = [7, 0], sizes = [1, 64], strides = [1, 1]} : vector<24x64xf32> to vector<1x64xf32>
    %c5_138 = arith.constant 5 : index
    %c0_139 = arith.constant 0 : index
    %c0_140 = arith.constant 0 : index
    %183 = vector.load %arg10[%c5_138, %c0_139, %c0_140] : memref<16x64x128xf32, #tpu.memory_space<vmem>>, vector<1x64x128xf32>
    %184 = vector.shape_cast %183 : vector<1x64x128xf32> to vector<64x128xf32>
    %cst_141 = arith.constant dense<0.000000e+00> : vector<1x128xf32>
    %185 = tpu.matmul %182, %184, %cst_141 {dimension_numbers = #tpu.dot_dimension_numbers<[1], [0], [0], [1], [0, 0, 1, 1], [], []>} : vector<1x64xf32>, vector<64x128xf32>, vector<1x128xf32> -> vector<1x128xf32>
    %186 = arith.addf %181, %185 : vector<1x128xf32>
    %187 = vector.extract_strided_slice %155 {offsets = [8, 0], sizes = [1, 64], strides = [1, 1]} : vector<24x64xf32> to vector<1x64xf32>
    %c6_142 = arith.constant 6 : index
    %c0_143 = arith.constant 0 : index
    %c0_144 = arith.constant 0 : index
    %188 = vector.load %arg10[%c6_142, %c0_143, %c0_144] : memref<16x64x128xf32, #tpu.memory_space<vmem>>, vector<1x64x128xf32>
    %189 = vector.shape_cast %188 : vector<1x64x128xf32> to vector<64x128xf32>
    %cst_145 = arith.constant dense<0.000000e+00> : vector<1x128xf32>
    %190 = tpu.matmul %187, %189, %cst_145 {dimension_numbers = #tpu.dot_dimension_numbers<[1], [0], [0], [1], [0, 0, 1, 1], [], []>} : vector<1x64xf32>, vector<64x128xf32>, vector<1x128xf32> -> vector<1x128xf32>
    %191 = arith.addf %186, %190 : vector<1x128xf32>
    %192 = vector.extract_strided_slice %155 {offsets = [9, 0], sizes = [1, 64], strides = [1, 1]} : vector<24x64xf32> to vector<1x64xf32>
    %c7_146 = arith.constant 7 : index
    %c0_147 = arith.constant 0 : index
    %c0_148 = arith.constant 0 : index
    %193 = vector.load %arg10[%c7_146, %c0_147, %c0_148] : memref<16x64x128xf32, #tpu.memory_space<vmem>>, vector<1x64x128xf32>
    %194 = vector.shape_cast %193 : vector<1x64x128xf32> to vector<64x128xf32>
    %cst_149 = arith.constant dense<0.000000e+00> : vector<1x128xf32>
    %195 = tpu.matmul %192, %194, %cst_149 {dimension_numbers = #tpu.dot_dimension_numbers<[1], [0], [0], [1], [0, 0, 1, 1], [], []>} : vector<1x64xf32>, vector<64x128xf32>, vector<1x128xf32> -> vector<1x128xf32>
    %196 = arith.addf %191, %195 : vector<1x128xf32>
    %197 = vector.extract_strided_slice %155 {offsets = [12, 0], sizes = [1, 64], strides = [1, 1]} : vector<24x64xf32> to vector<1x64xf32>
    %c8_150 = arith.constant 8 : index
    %c0_151 = arith.constant 0 : index
    %c0_152 = arith.constant 0 : index
    %198 = vector.load %arg10[%c8_150, %c0_151, %c0_152] : memref<16x64x128xf32, #tpu.memory_space<vmem>>, vector<1x64x128xf32>
    %199 = vector.shape_cast %198 : vector<1x64x128xf32> to vector<64x128xf32>
    %cst_153 = arith.constant dense<0.000000e+00> : vector<1x128xf32>
    %200 = tpu.matmul %197, %199, %cst_153 {dimension_numbers = #tpu.dot_dimension_numbers<[1], [0], [0], [1], [0, 0, 1, 1], [], []>} : vector<1x64xf32>, vector<64x128xf32>, vector<1x128xf32> -> vector<1x128xf32>
    %201 = arith.addf %196, %200 : vector<1x128xf32>
    %202 = vector.extract_strided_slice %155 {offsets = [13, 0], sizes = [1, 64], strides = [1, 1]} : vector<24x64xf32> to vector<1x64xf32>
    %c9 = arith.constant 9 : index
    %c0_154 = arith.constant 0 : index
    %c0_155 = arith.constant 0 : index
    %203 = vector.load %arg10[%c9, %c0_154, %c0_155] : memref<16x64x128xf32, #tpu.memory_space<vmem>>, vector<1x64x128xf32>
    %204 = vector.shape_cast %203 : vector<1x64x128xf32> to vector<64x128xf32>
    %cst_156 = arith.constant dense<0.000000e+00> : vector<1x128xf32>
    %205 = tpu.matmul %202, %204, %cst_156 {dimension_numbers = #tpu.dot_dimension_numbers<[1], [0], [0], [1], [0, 0, 1, 1], [], []>} : vector<1x64xf32>, vector<64x128xf32>, vector<1x128xf32> -> vector<1x128xf32>
    %206 = arith.addf %201, %205 : vector<1x128xf32>
    %207 = vector.extract_strided_slice %155 {offsets = [14, 0], sizes = [1, 64], strides = [1, 1]} : vector<24x64xf32> to vector<1x64xf32>
    %c10 = arith.constant 10 : index
    %c0_157 = arith.constant 0 : index
    %c0_158 = arith.constant 0 : index
    %208 = vector.load %arg10[%c10, %c0_157, %c0_158] : memref<16x64x128xf32, #tpu.memory_space<vmem>>, vector<1x64x128xf32>
    %209 = vector.shape_cast %208 : vector<1x64x128xf32> to vector<64x128xf32>
    %cst_159 = arith.constant dense<0.000000e+00> : vector<1x128xf32>
    %210 = tpu.matmul %207, %209, %cst_159 {dimension_numbers = #tpu.dot_dimension_numbers<[1], [0], [0], [1], [0, 0, 1, 1], [], []>} : vector<1x64xf32>, vector<64x128xf32>, vector<1x128xf32> -> vector<1x128xf32>
    %211 = arith.addf %206, %210 : vector<1x128xf32>
    %212 = vector.extract_strided_slice %155 {offsets = [15, 0], sizes = [1, 64], strides = [1, 1]} : vector<24x64xf32> to vector<1x64xf32>
    %c11 = arith.constant 11 : index
    %c0_160 = arith.constant 0 : index
    %c0_161 = arith.constant 0 : index
    %213 = vector.load %arg10[%c11, %c0_160, %c0_161] : memref<16x64x128xf32, #tpu.memory_space<vmem>>, vector<1x64x128xf32>
    %214 = vector.shape_cast %213 : vector<1x64x128xf32> to vector<64x128xf32>
    %cst_162 = arith.constant dense<0.000000e+00> : vector<1x128xf32>
    %215 = tpu.matmul %212, %214, %cst_162 {dimension_numbers = #tpu.dot_dimension_numbers<[1], [0], [0], [1], [0, 0, 1, 1], [], []>} : vector<1x64xf32>, vector<64x128xf32>, vector<1x128xf32> -> vector<1x128xf32>
    %216 = arith.addf %211, %215 : vector<1x128xf32>
    %217 = vector.extract_strided_slice %155 {offsets = [18, 0], sizes = [1, 64], strides = [1, 1]} : vector<24x64xf32> to vector<1x64xf32>
    %c12 = arith.constant 12 : index
    %c0_163 = arith.constant 0 : index
    %c0_164 = arith.constant 0 : index
    %218 = vector.load %arg10[%c12, %c0_163, %c0_164] : memref<16x64x128xf32, #tpu.memory_space<vmem>>, vector<1x64x128xf32>
    %219 = vector.shape_cast %218 : vector<1x64x128xf32> to vector<64x128xf32>
    %cst_165 = arith.constant dense<0.000000e+00> : vector<1x128xf32>
    %220 = tpu.matmul %217, %219, %cst_165 {dimension_numbers = #tpu.dot_dimension_numbers<[1], [0], [0], [1], [0, 0, 1, 1], [], []>} : vector<1x64xf32>, vector<64x128xf32>, vector<1x128xf32> -> vector<1x128xf32>
    %221 = arith.addf %216, %220 : vector<1x128xf32>
    %222 = vector.extract_strided_slice %155 {offsets = [19, 0], sizes = [1, 64], strides = [1, 1]} : vector<24x64xf32> to vector<1x64xf32>
    %c13 = arith.constant 13 : index
    %c0_166 = arith.constant 0 : index
    %c0_167 = arith.constant 0 : index
    %223 = vector.load %arg10[%c13, %c0_166, %c0_167] : memref<16x64x128xf32, #tpu.memory_space<vmem>>, vector<1x64x128xf32>
    %224 = vector.shape_cast %223 : vector<1x64x128xf32> to vector<64x128xf32>
    %cst_168 = arith.constant dense<0.000000e+00> : vector<1x128xf32>
    %225 = tpu.matmul %222, %224, %cst_168 {dimension_numbers = #tpu.dot_dimension_numbers<[1], [0], [0], [1], [0, 0, 1, 1], [], []>} : vector<1x64xf32>, vector<64x128xf32>, vector<1x128xf32> -> vector<1x128xf32>
    %226 = arith.addf %221, %225 : vector<1x128xf32>
    %227 = vector.extract_strided_slice %155 {offsets = [20, 0], sizes = [1, 64], strides = [1, 1]} : vector<24x64xf32> to vector<1x64xf32>
    %c14 = arith.constant 14 : index
    %c0_169 = arith.constant 0 : index
    %c0_170 = arith.constant 0 : index
    %228 = vector.load %arg10[%c14, %c0_169, %c0_170] : memref<16x64x128xf32, #tpu.memory_space<vmem>>, vector<1x64x128xf32>
    %229 = vector.shape_cast %228 : vector<1x64x128xf32> to vector<64x128xf32>
    %cst_171 = arith.constant dense<0.000000e+00> : vector<1x128xf32>
    %230 = tpu.matmul %227, %229, %cst_171 {dimension_numbers = #tpu.dot_dimension_numbers<[1], [0], [0], [1], [0, 0, 1, 1], [], []>} : vector<1x64xf32>, vector<64x128xf32>, vector<1x128xf32> -> vector<1x128xf32>
    %231 = arith.addf %226, %230 : vector<1x128xf32>
    %232 = vector.extract_strided_slice %155 {offsets = [21, 0], sizes = [1, 64], strides = [1, 1]} : vector<24x64xf32> to vector<1x64xf32>
    %c15 = arith.constant 15 : index
    %c0_172 = arith.constant 0 : index
    %c0_173 = arith.constant 0 : index
    %233 = vector.load %arg10[%c15, %c0_172, %c0_173] : memref<16x64x128xf32, #tpu.memory_space<vmem>>, vector<1x64x128xf32>
    %234 = vector.shape_cast %233 : vector<1x64x128xf32> to vector<64x128xf32>
    %cst_174 = arith.constant dense<0.000000e+00> : vector<1x128xf32>
    %235 = tpu.matmul %232, %234, %cst_174 {dimension_numbers = #tpu.dot_dimension_numbers<[1], [0], [0], [1], [0, 0, 1, 1], [], []>} : vector<1x64xf32>, vector<64x128xf32>, vector<1x128xf32> -> vector<1x128xf32>
    %236 = arith.addf %231, %235 : vector<1x128xf32>
    %237 = arith.mulf %236, %236 : vector<1x128xf32>
    %c0_175 = arith.constant 0 : index
    %c0_176 = arith.constant 0 : index
    %238 = vector.load %arg12[%c0_175, %c0_176] : memref<128x7xf32, #tpu.memory_space<vmem>>, vector<128x7xf32>
    %cst_177 = arith.constant dense<0.000000e+00> : vector<1x7xf32>
    %239 = tpu.matmul %237, %238, %cst_177 {dimension_numbers = #tpu.dot_dimension_numbers<[1], [0], [0], [1], [0, 0, 1, 1], [], []>} : vector<1x128xf32>, vector<128x7xf32>, vector<1x7xf32> -> vector<1x7xf32>
    %c0_178 = arith.constant 0 : index
    %c0_179 = arith.constant 0 : index
    %240 = vector.load %arg13[%c0_178, %c0_179] : memref<1x7xf32, #tpu.memory_space<vmem>>, vector<1x7xf32>
    %241 = arith.addf %239, %240 : vector<1x7xf32>
    %c0_180 = arith.constant 0 : index
    %c0_181 = arith.constant 0 : index
    %c0_182 = arith.constant 0 : index
    %242 = vector.load %arg14[%c0_180, %c0_181, %c0_182] : memref<1x1x7xf32, #tpu.memory_space<vmem>>, vector<1x1x7xf32>
    %243 = vector.shape_cast %242 : vector<1x1x7xf32> to vector<1x7xf32>
    %244 = vector.shape_cast %241 : vector<1x7xf32> to vector<1x1x7xf32>
    tpu.vector_store %arg14[%c0_180, %c0_181, %c0_182], %244 {strides = array<i32>} : memref<1x1x7xf32, #tpu.memory_space<vmem>>, vector<1x1x7xf32>,
    return
  }
  func.func @transform_0(%arg0: i32) -> (i32, i32, i32) {
    %c0_i32 = arith.constant 0 : i32
    %c0_i32_0 = arith.constant 0 : i32
    %c0_i32_1 = arith.constant 0 : i32
    return %arg0, %c0_i32, %c0_i32_0 : i32, i32, i32
  }
  func.func @transform_1(%arg0: i32) -> (i32, i32, i32) {
    %c0_i32 = arith.constant 0 : i32
    %c0_i32_0 = arith.constant 0 : i32
    %c0_i32_1 = arith.constant 0 : i32
    %c0_i32_2 = arith.constant 0 : i32
    return %c0_i32, %c0_i32_0, %c0_i32_1 : i32, i32, i32
  }
  func.func @transform_2(%arg0: i32) -> (i32, i32) {
    %c0_i32 = arith.constant 0 : i32
    %c0_i32_0 = arith.constant 0 : i32
    %c0_i32_1 = arith.constant 0 : i32
    return %c0_i32, %c0_i32_0 : i32, i32
  }
  func.func @transform_3(%arg0: i32) -> (i32, i32, i32) {
    %c0_i32 = arith.constant 0 : i32
    %c0_i32_0 = arith.constant 0 : i32
    %c0_i32_1 = arith.constant 0 : i32
    %c0_i32_2 = arith.constant 0 : i32
    return %c0_i32, %c0_i32_0, %c0_i32_1 : i32, i32, i32
  }
  func.func @transform_4(%arg0: i32) -> (i32, i32) {
    %c0_i32 = arith.constant 0 : i32
    %c0_i32_0 = arith.constant 0 : i32
    %c0_i32_1 = arith.constant 0 : i32
    return %c0_i32, %c0_i32_0 : i32, i32
  }
  func.func @transform_5(%arg0: i32) -> (i32, i32, i32) {
    %c0_i32 = arith.constant 0 : i32
    %c0_i32_0 = arith.constant 0 : i32
    %c0_i32_1 = arith.constant 0 : i32
    %c0_i32_2 = arith.constant 0 : i32
    return %c0_i32, %c0_i32_0, %c0_i32_1 : i32, i32, i32
  }
  func.func @transform_6(%arg0: i32) -> (i32, i32) {
    %c0_i32 = arith.constant 0 : i32
    %c0_i32_0 = arith.constant 0 : i32
    %c0_i32_1 = arith.constant 0 : i32
    return %c0_i32, %c0_i32_0 : i32, i32
  }
  func.func @transform_7(%arg0: i32) -> (i32, i32) {
    %c0_i32 = arith.constant 0 : i32
    %c0_i32_0 = arith.constant 0 : i32
    %c0_i32_1 = arith.constant 0 : i32
    return %c0_i32, %c0_i32_0 : i32, i32
  }
  func.func @transform_8(%arg0: i32) -> (i32, i32) {
    %c0_i32 = arith.constant 0 : i32
    %c0_i32_0 = arith.constant 0 : i32
    %c0_i32_1 = arith.constant 0 : i32
    return %c0_i32, %c0_i32_0 : i32, i32
  }
  func.func @transform_9(%arg0: i32) -> (i32, i32, i32) {
    %c0_i32 = arith.constant 0 : i32
    %c0_i32_0 = arith.constant 0 : i32
    %c0_i32_1 = arith.constant 0 : i32
    %c0_i32_2 = arith.constant 0 : i32
    return %c0_i32, %c0_i32_0, %c0_i32_1 : i32, i32, i32
  }
  func.func @transform_10(%arg0: i32) -> (i32, i32) {
    %c0_i32 = arith.constant 0 : i32
    %c0_i32_0 = arith.constant 0 : i32
    %c0_i32_1 = arith.constant 0 : i32
    return %c0_i32, %c0_i32_0 : i32, i32
  }
  func.func @transform_11(%arg0: i32) -> (i32, i32) {
    %c0_i32 = arith.constant 0 : i32
    %c0_i32_0 = arith.constant 0 : i32
    %c0_i32_1 = arith.constant 0 : i32
    return %c0_i32, %c0_i32_0 : i32, i32
  }
  func.func @transform_12(%arg0: i32) -> (i32, i32) {
    %c0_i32 = arith.constant 0 : i32
    %c0_i32_0 = arith.constant 0 : i32
    %c0_i32_1 = arith.constant 0 : i32
    return %c0_i32, %c0_i32_0 : i32, i32
  }
  func.func @transform_13(%arg0: i32) -> (i32, i32, i32) {
    %c0_i32 = arith.constant 0 : i32
    %c0_i32_0 = arith.constant 0 : i32
    %c0_i32_1 = arith.constant 0 : i32
    return %arg0, %c0_i32, %c0_i32_0 : i32, i32, i32
  }
}

</mosaic_0001>

<bundles_post_ra>
// kernel: ebasenet_forward.1
= control target key start
LH: loop header
LB: loop body
LE: loop exit
PB: predicated region body
PF: predicated region fallthrough
CT: control target
= control target key end

     0   :  { %s12613_s0 = inlined_call_operand.vmem [shape: f32[2,8,1024], index: 0, kind: input, shape index: {}]   ;;  %s12614_s1 = inlined_call_operand.vmem [shape: f32[9,16,8], index: 1, kind: input, shape index: {}]   ;;  %s12615_s2 = inlined_call_operand.vmem [shape: f32[16,1], index: 2, kind: input, shape index: {}]   ;;  %s12616_s3 = inlined_call_operand.vmem [shape: f32[9,32,16], index: 3, kind: input, shape index: {}]   ;;  %s12617_s4 = inlined_call_operand.vmem [shape: f32[32,1], index: 4, kind: input, shape index: {}]   ;;  %s12618_s5 = inlined_call_operand.vmem [shape: f32[9,32,64], index: 5, kind: input, shape index: {}]   ;;  %s12619_s6 = inlined_call_operand.vmem [shape: f32[1,64], index: 6, kind: input, shape index: {}]   ;;  %s12620_s7 = inlined_call_operand.vmem [shape: f32[840,256], index: 7, kind: input, shape index: {}]   ;;  %s12621_s8 = inlined_call_operand.vmem [shape: f32[40,168], index: 8, kind: input, shape index: {}]   ;;  %s12622_s9 = inlined_call_operand.vmem [shape: f32[16,64,128], index: 9, kind: input, shape index: {}]   ;;  %s12623_s10 = inlined_call_operand.vmem [shape: f32[1,128], index: 10, kind: input, shape index: {}]   ;;  %s12624_s11 = inlined_call_operand.vmem [shape: f32[128,7], index: 11, kind: input, shape index: {}]   ;;  %s12625_s12 = inlined_call_operand.vmem [shape: f32[1,7], index: 12, kind: input, shape index: {}]   ;;  %s12626_s13 = inlined_call_operand.hbm [shape: f32[2,1,7], index: 13, kind: output, shape index: {}]  }
   0x1   :  { %12633 = sst [smem:[#allocation5_spill]] %s12613_s0 }
   0x2   :  { %12634 = sst [smem:[#allocation6_spill]] %s12614_s1 }
   0x3   :  { %12635 = sst [smem:[#allocation7_spill]] %s12615_s2 }
   0x4   :  { %18 = vsyncpa [#allocation3], 0 }
   0x5   :  { %20 = vsyncpa [#allocation3 + $0x1], 0  ;;  %s10066_s25 = smov 0   ;;  %s10068_s26 = smov 0  }
   0x6   :  { %s10070_s27 = smov 0   ;;  %s10072_s28 = smov 0  }
   0x7 LB: > { %s10087_s29 = sadd.s32 4294967295, %s9976_s28   ;;  %s7872_s30 = sadd.s32 4294967294, %s9976_s28   ;;  %s9976_s28 = sphi %s10072_s28, %s12649_s28   ;;  %s9972_s27 = sphi %s10070_s27, %s12648_s27   ;;  %s9968_s26 = sphi %s10068_s26, %s12647_s26   ;;  %s9964_s25 = sphi %s10066_s25, %s12646_s25  }
   0x8   : > { %s10091_s14 = sadd.s32 1, %s9976_s28   ;;  %s311_s15 = sadd.s32 1, %s9972_s27 }
   0x9   : > { %s308_s16 = ssub.s32 %s9976_s28, %s10091_s14  ;;  %p321_p0 = scmp.ne.s32.totalorder %s9972_s27, %s9968_s26 }
   0xa   : > { %p309_p1 = scmp.eq.s32.totalorder %s308_s16, 0  ;;  %p322_p2 = scmp.eq.s32.totalorder %s10087_s29, 1 }
   0xb   : > { %p327_p3 = scmp.ne.s32.totalorder %s9968_s26, %s9964_s25  ;;  %p328_p4 = scmp.eq.s32.totalorder %s7872_s30, 1 }
   0xc   : > { %s10102_s17 = scalar_select %p309_p1, %s9972_s27, %s311_s15  }
   0xd   : > { %p10104_p5 = por %p322_p2, %p321_p0  ;;  %p10108_p6 = por %p328_p4, %p327_p3 }
   0xe   : > { %p7875_p7 = scmp.ge.s32.totalorder %s9976_s28, 1  ;;  %p390_p8 = scmp.lt.s32.totalorder %s9976_s28, 3 }
  0x10   : > { %p391_p9 = pnand %p7875_p7, %p390_p8 }
  0x11   : > { %p433_p10 = scmp.lt.s32.totalorder (!%p391_p9), %s10087_s29, 1  ;;  %v9978_v0 = vmov (!%p391_p9), 0.0   ;;  %s12638_s0 = sld [smem:[#allocation5_spill]] (!%p391_p9)  ;;  %vm472_vm0 = vcmask (!%p391_p9), 1039360   ;;  %vm486_vm1 = vcmask (!%p391_p9), 64512   ;;  %vm1128_vm2 = vcmask (!%p391_p9), 1031168  }
  0x12   : > { %394 = sbr.rel (%p391_p9) target bundleno = 2461 (0x99d), region = 72  ;;  %557 = vmatprep.mubr.f32.mxu0 (!%p391_p9), %v9978_v0  ;;  %634 = vmatprep.mubr.f32.mxu1 (!%p391_p9), %v9978_v0  ;;  %s12627_s30 = smov (!%p391_p9), 127   ;;  %vm1485_vm3 = vcmask (!%p391_p9), 801792   ;;  %v9987_v48 = vmov (!%p391_p9), 0   ;;  %vm1842_vm4 = vcmask (!%p391_p9), 793600   ;;  %vm2199_vm5 = vcmask (!%p391_p9), 785408  }
  0x13   : > { %s12631_s15 = smov (!%p391_p9), 126   ;;  %s12629_s16 = smov (!%p391_p9), 98   ;;  %9832 = vset.pattern.permute.xlu1 (!%p391_p9), %v9987_v48  ;;  %9833 = vset.pattern.permute.xlu0 (!%p391_p9), %v9987_v48  ;;  %vm2559_vm6 = vcmask (!%p391_p9), 556032   ;;  %vm2919_vm7 = vcmask (!%p391_p9), 547840   ;;  %vm3279_vm8 = vcmask (!%p391_p9), 539648   ;;  %vm3870_vm9 = vcmask (!%p391_p9), 588800  }
  0x14   : > { %s9984_s22 = smov (!%p391_p9), 68   ;;  %s9985_s23 = smov (!%p391_p9), 67   ;;  %vm4814_vm10 = vcmask (!%p391_p9), 916480   ;;  %vm4212_vm11 = vcmask (!%p391_p9), 130048   ;;  %vm4943_vm12 = vcmask (!%p391_p9), 818176   ;;  %vm5072_vm13 = vcmask (!%p391_p9), 809984  }
  0x15   : > { %s12639_s1 = sld [smem:[#allocation6_spill]] (!%p391_p9)  ;;  %s12640_s2 = sld [smem:[#allocation7_spill]] (!%p391_p9)  ;;  %vm4556_vm14 = vcmask (!%p391_p9), 932864   ;;  %vm4685_vm15 = vcmask (!%p391_p9), 924672  }
  0x19   : > { %s434_s20 = scalar_select %p433_p10, %s10087_s29, 1 }
  0x1b   : > { %s8244_s21 = sshll.u32 %s434_s20, 6  ;;  %s9982_s20 = smov 97   ;;  %v10243_v14 = vld [vmem:[%s12639_s1 + $0x10] sm:$0xff]  ;;  %v10260_v20 = vld [vmem:[%s12639_s1 + $0x18] sm:$0xff]  ;;  %v10283_v27 = vld [vmem:[%s12639_s1] sm:$0xff] }
  0x1c   : > { %s10121_s24 = scalar_lea.vmem %s12638_s0, %s8244_s21  ;;  %s9983_s21 = smov 96   ;;  %v10295_v31 = vld [vmem:[%s12639_s1 + $0x8] sm:$0xff]  ;;  %v10319_v40 = vld [vmem:[%s12639_s1 + $0x20] sm:$0xff]  ;;  %v10368_v57 = vld [vmem:[%s12639_s1 + $0x30] sm:$0xff] }
  0x1d   : > { %v10124_v1 = vld [vmem:[%s10121_s24 + $0x8] sm:$0xff]  ;;  %v10127_v2 = vld [vmem:[%s10121_s24] sm:$0xff]  ;;  %v10134_v3 = vld [vmem:[%s10121_s24 + $0x10] sm:$0xff] }
  0x1e   : > { %460 = vrot.lane.b32.xlu0 %v10124_v1, %s12627_s30  ;;  %458 = vrot.lane.b32.xlu1 %v10127_v2, %s12627_s30  ;;  %v10137_v4 = vld [vmem:[%s10121_s24 + $0x28] sm:$0xff]  ;;  %v10144_v5 = vld [vmem:[%s10121_s24 + $0x30] sm:$0xff] }
  0x1f   : > { %v10147_v6 = vld [vmem:[%s10121_s24 + $0x20] sm:$0xff]  ;;  %v10202_v7 = vld [vmem:[%s10121_s24 + $0x18] sm:$0xff]  ;;  %v10336_v46 = vld [vmem:[%s12639_s1 + $0x28] sm:$0xff] }
  0x20   : > { %v445_v8 = vld [vmem:[%s10121_s24 + $0x38] sm:$0xff]  ;;  %v3620_v45 = vld [vmem:[%s12640_s2] sm:$0xff]  ;;  %v3621_v47 = vld [vmem:[%s12640_s2 + $0x8] sm:$0xff]  ;;  %s9990_s24 = smov 114  }
  0x21   : > { %v10384_v62 = vld [vmem:[%s12639_s1 + $0x38] sm:$0xff] }
  0x22   : > { %462 = vrot.lane.b32.xlu0 %v10134_v3, %s12627_s30  ;;  %468 = vrot.lane.b32.xlu1 %v10137_v4, %s12627_s30 }
  0x26   : > { %470 = vrot.lane.b32.xlu0 %v10144_v5, %s12627_s30  ;;  %466 = vrot.lane.b32.xlu1 %v10147_v6, %s12627_s30 }
  0x2a   : > { %1116 = vrot.lane.b32.xlu0 %v10124_v1, %s12631_s15  ;;  %1118 = vrot.lane.b32.xlu1 %v10134_v3, %s12631_s15 }
  0x2e   : > { %1114 = vrot.lane.b32.xlu0 %v10127_v2, %s12631_s15  ;;  %1124 = vrot.lane.b32.xlu1 %v10137_v4, %s12631_s15 }
  0x32   : > { %1126 = vrot.lane.b32.xlu0 %v10144_v5, %s12631_s15  ;;  %1122 = vrot.lane.b32.xlu1 %v10147_v6, %s12631_s15 }
  0x36   : > { %1473 = vrot.lane.b32.xlu0 %v10124_v1, %s12629_s16  ;;  %1475 = vrot.lane.b32.xlu1 %v10134_v3, %s12629_s16 }
  0x3a   : > { %1471 = vrot.lane.b32.xlu0 %v10127_v2, %s12629_s16  ;;  %1481 = vrot.lane.b32.xlu1 %v10137_v4, %s12629_s16 }
  0x3e   : > { %1483 = vrot.lane.b32.xlu0 %v10144_v5, %s12629_s16  ;;  %1479 = vrot.lane.b32.xlu1 %v10147_v6, %s12629_s16 }
  0x42   : > { %1830 = vrot.lane.b32.xlu0 %v10124_v1, %s9982_s20  ;;  %1832 = vrot.lane.b32.xlu1 %v10134_v3, %s9982_s20 }
  0x46   : > { %1828 = vrot.lane.b32.xlu0 %v10127_v2, %s9982_s20  ;;  %1838 = vrot.lane.b32.xlu1 %v10137_v4, %s9982_s20 }
  0x4a   : > { %1840 = vrot.lane.b32.xlu0 %v10144_v5, %s9982_s20  ;;  %1836 = vrot.lane.b32.xlu1 %v10147_v6, %s9982_s20 }
  0x4e   : > { %2187 = vrot.lane.b32.xlu0 %v10124_v1, %s9983_s21  ;;  %2189 = vrot.lane.b32.xlu1 %v10134_v3, %s9983_s21 }
  0x52   : > { %2185 = vrot.lane.b32.xlu0 %v10127_v2, %s9983_s21  ;;  %2195 = vrot.lane.b32.xlu1 %v10137_v4, %s9983_s21 }
  0x56   : > { %2197 = vrot.lane.b32.xlu0 %v10144_v5, %s9983_s21  ;;  %2193 = vrot.lane.b32.xlu1 %v10147_v6, %s9983_s21 }
  0x5a   : > { %464 = vrot.lane.b32.xlu0 %v10202_v7, %s12627_s30  ;;  %2545 = vrot.lane.b32.xlu1 %v10124_v1, %s9984_s22  ;;  %s9986_s30 = smov 66  }
  0x5e   : > { %2547 = vrot.lane.b32.xlu0 %v10134_v3, %s9984_s22  ;;  %2543 = vrot.lane.b32.xlu1 %v10127_v2, %s9984_s22 }
  0x62   : > { %2553 = vrot.lane.b32.xlu0 %v10137_v4, %s9984_s22  ;;  %2555 = vrot.lane.b32.xlu1 %v10144_v5, %s9984_s22 }
  0x66   : > { %2551 = vrot.lane.b32.xlu0 %v10147_v6, %s9984_s22  ;;  %2905 = vrot.lane.b32.xlu1 %v10124_v1, %s9985_s23 }
  0x6a   : > { %2907 = vrot.lane.b32.xlu0 %v10134_v3, %s9985_s23  ;;  %2903 = vrot.lane.b32.xlu1 %v10127_v2, %s9985_s23 }
  0x6e   : > { %1120 = vrot.lane.b32.xlu0 %v10202_v7, %s12631_s15  ;;  %2913 = vrot.lane.b32.xlu1 %v10137_v4, %s9985_s23  ;;  %s9992_s15 = smov 113  }
  0x72   : > { %2915 = vrot.lane.b32.xlu0 %v10144_v5, %s9985_s23  ;;  %2911 = vrot.lane.b32.xlu1 %v10147_v6, %s9985_s23 }
  0x76   : > { %3265 = vrot.lane.b32.xlu0 %v10124_v1, %s9986_s30  ;;  %3267 = vrot.lane.b32.xlu1 %v10134_v3, %s9986_s30 }
  0x7a   : > { %3263 = vrot.lane.b32.xlu0 %v10127_v2, %s9986_s30  ;;  %1477 = vrot.lane.b32.xlu1 %v10202_v7, %s12629_s16  ;;  %s12643_s16 = smov 98  }
  0x7e   : > { %1834 = vrot.lane.b32.xlu0 %v10202_v7, %s9982_s20  ;;  %2191 = vrot.lane.b32.xlu1 %v10202_v7, %s9983_s21  ;;  %s12641_s21 = smov 127   ;;  %s9991_s20 = smov 99  }
  0x82   : > { %2549 = vrot.lane.b32.xlu0 %v10202_v7, %s9984_s22  ;;  %2557 = vrot.lane.b32.xlu1 %v445_v8, %s9984_s22  ;;  %s12642_s22 = smov 126  }
  0x86   : > { %2909 = vrot.lane.b32.xlu0 %v10202_v7, %s9985_s23  ;;  %2917 = vrot.lane.b32.xlu1 %v445_v8, %s9985_s23  ;;  %s9989_s23 = smov 100  }
  0x8a   : > { %3269 = vrot.lane.b32.xlu0 %v10202_v7, %s9986_s30  ;;  %3271 = vrot.lane.b32.xlu1 %v10147_v6, %s9986_s30 }
  0x8e   : > { %3273 = vrot.lane.b32.xlu0 %v10137_v4, %s9986_s30  ;;  %3275 = vrot.lane.b32.xlu1 %v10144_v5, %s9986_s30 }
  0x90   : > { %v461_v9 = vpop.permute.xlu0 %460  ;;  %v459_v10 = vpop.permute.xlu1 %458 }
  0x91   : > { %v473_v15 = vsel %vm472_vm0, %v459_v10, %v461_v9 }
  0x92   : > { %3277 = vrot.lane.b32.xlu0 %v445_v8, %s9986_s30  ;;  %3624 = vperm.xlu1 %9832, %v3620_v45   ;;  %s9988_s30 = smov 112  }
  0x94   : > { %v10236_v11 = vpop.permute.xlu0 %462  ;;  %v469_v12 = vpop.permute.xlu1 %468 }
  0x95   : > { %v474_v13 = vsel %vm472_vm0, %v461_v9, %v10236_v11 }
  0x96   : > { %493 = vmatprep.subr.mxu0 %v474_v13  ;;  %3629 = vperm.xlu0 %9833, %v3621_v47   ;;  %v10426_v13 = vld [vmem:[%s12639_s1 + $0x40] sm:$0xff] }
  0x97   : > { %494 = vmatpush1.msra.mxu0 %v473_v15 }
  0x98   : > { %v10246_v16 = vpop.permute.xlu0 %470  ;;  %7880 = vmatmul.mubr.msk.f32.vlgmr.msra.gmra.mrb[0].mxu0 %vm486_vm1, %v10243_v14  ;;  %v10250_v17 = vpop.permute.xlu1 %466 }
  0x99   : > { %v477_v18 = vsel %vm472_vm0, %v10250_v17, %v469_v12  ;;  %v478_v19 = vsel %vm472_vm0, %v469_v12, %v10246_v16  ;;  %563 = vmatprep.mubr.f32.mxu0 %v9978_v0 }
  0x9a   : > { %647 = vmatprep.subr.mxu0 %v478_v19 }
  0x9b   : > { %648 = vmatpush1.msra.mxu0 %v477_v18 }
  0x9c   : > { %v1117_v21 = vpop.permute.xlu0 %1116  ;;  %7881 = vmatmul.mubr.msk.f32.gmra.mrb[2].mxu0 %vm486_vm1, %v10260_v20  ;;  %v10264_v22 = vpop.permute.xlu1 %1118  ;;  %805 = vmatprep.subr.mxu0 %v10124_v1 }
  0x9d   : > { %711 = vmatprep.mubr.f32.mxu0 %v9978_v0  ;;  %v1130_v28 = vsel %vm1128_vm2, %v1117_v21, %v10264_v22 }
  0xa0   : > { %v1115_v23 = vpop.permute.xlu0 %1114  ;;  %7884 = vmatmul.mubr.msk.f32.vlgmr.msra.gmra.mrb[4].mxu0 %vm486_vm1, %v10243_v14  ;;  %v1125_v24 = vpop.permute.xlu1 %1124 }
  0xa1   : > { %717 = vmatprep.mubr.f32.mxu0 %v9978_v0  ;;  %806 = vmatpush1.msra.mxu0 %v10127_v2  ;;  %v1129_v34 = vsel %vm1128_vm2, %v1115_v23, %v1117_v21 }
  0xa2   : > { %959 = vmatprep.subr.mxu0 %v10137_v4 }
  0xa4   : > { %v10273_v25 = vpop.permute.xlu0 %1126  ;;  %7885 = vmatmul.mubr.msk.f32.gmra.mrb[6].mxu0 %vm486_vm1, %v10260_v20  ;;  %v10277_v26 = vpop.permute.xlu1 %1122 }
  0xa5   : > { %869 = vmatprep.mubr.f32.mxu0 %v9978_v0  ;;  %v1134_v35 = vsel %vm1128_vm2, %v1125_v24, %v10273_v25  ;;  %v1133_v41 = vsel %vm1128_vm2, %v10277_v26, %v1125_v24 }
  0xa8   : > { %v1474_v29 = vpop.permute.xlu0 %1473  ;;  %7888 = vmatmul.mubr.msk.f32.vlgmr.msra.gmra.mrb[0].mxu0 %vm486_vm1, %v10283_v27  ;;  %v10289_v30 = vpop.permute.xlu1 %1475 }
  0xa9   : > { %875 = vmatprep.mubr.f32.mxu0 %v9978_v0  ;;  %960 = vmatpush1.msra.mxu0 %v10147_v6  ;;  %v1487_v42 = vsel %vm1485_vm3, %v1474_v29, %v10289_v30 }
  0xaa   : > { %1148 = vmatprep.subr.mxu0 %v1130_v28 }
  0xac   : > { %v1472_v32 = vpop.permute.xlu0 %1471  ;;  %7889 = vmatmul.mubr.msk.f32.gmra.mrb[2].mxu0 %vm486_vm1, %v10295_v31  ;;  %v1482_v33 = vpop.permute.xlu1 %1481 }
  0xad   : > { %1023 = vmatprep.mubr.f32.mxu0 %v9978_v0  ;;  %v1486_v51 = vsel %vm1485_vm3, %v1472_v32, %v1474_v29 }
  0xb0   : > { %v10304_v36 = vpop.permute.xlu0 %1483  ;;  %7892 = vmatmul.mubr.msk.f32.vlgmr.msra.gmra.mrb[4].mxu0 %vm486_vm1, %v10283_v27  ;;  %v10308_v37 = vpop.permute.xlu1 %1479 }
  0xb1   : > { %1149 = vmatpush1.msra.mxu0 %v1129_v34  ;;  %1029 = vmatprep.mubr.f32.mxu0 %v9978_v0  ;;  %v1491_v52 = vsel %vm1485_vm3, %v1482_v33, %v10304_v36  ;;  %v1490_v58 = vsel %vm1485_vm3, %v10308_v37, %v1482_v33  ;;  %v10516_v33 = vld [vmem:[%s12639_s1 + $0x58] sm:$0xff] }
  0xb2   : > { %1302 = vmatprep.subr.mxu0 %v1134_v35 }
  0xb4   : > { %v1831_v38 = vpop.permute.xlu0 %1830  ;;  %7893 = vmatmul.mubr.msk.f32.gmra.mrb[6].mxu0 %vm486_vm1, %v10295_v31  ;;  %v10313_v39 = vpop.permute.xlu1 %1832 }
  0xb5   : > { %1212 = vmatprep.mubr.f32.mxu0 %v9978_v0  ;;  %v1844_v59 = vsel %vm1842_vm4, %v1831_v38, %v10313_v39 }
  0xb8   : > { %v1829_v43 = vpop.permute.xlu0 %1828  ;;  %7898 = vmatmul.mubr.msk.f32.vlgmr.msra.gmra.mrb[0].mxu0 %vm486_vm1, %v10319_v40  ;;  %v10327_v44 = vpop.permute.xlu1 %1838 }
  0xb9   : > { %1303 = vmatpush1.msra.mxu0 %v1133_v41  ;;  %1218 = vmatprep.mubr.f32.mxu0 %v9978_v0  ;;  %v1843_v6 = vsel %vm1842_vm4, %v1829_v43, %v1831_v38 }
  0xba   : > { %1505 = vmatprep.subr.mxu0 %v1487_v42  ;;  %v10556_v42 = vld [vmem:[%s12639_s1 + $0x60] sm:$0xff] }
  0xbc   : > { %v10341_v49 = vpop.permute.xlu0 %1840  ;;  %7899 = vmatmul.mubr.msk.f32.gmra.mrb[2].mxu0 %vm486_vm1, %v10336_v46  ;;  %v10345_v50 = vpop.permute.xlu1 %1836 }
  0xbd   : > { %1366 = vmatprep.mubr.f32.mxu0 %v9978_v0  ;;  %v1848_v10 = vsel %vm1842_vm4, %v10327_v44, %v10341_v49  ;;  %v1847_v15 = vsel %vm1842_vm4, %v10345_v50, %v10327_v44  ;;  %v10575_v44 = vld [vmem:[%s12639_s1 + $0x68] sm:$0xff] }
  0xc0   : > { %v10351_v53 = vpop.permute.xlu0 %2187  ;;  %7902 = vmatmul.mubr.msk.f32.vlgmr.msra.gmra.mrb[4].mxu0 %vm486_vm1, %v10319_v40  ;;  %v10355_v54 = vpop.permute.xlu1 %2189 }
  0xc1   : > { %1506 = vmatpush1.msra.mxu0 %v1486_v51  ;;  %1372 = vmatprep.mubr.f32.mxu0 %v9978_v0 }
  0xc2   : > { %1659 = vmatprep.subr.mxu0 %v1491_v52 }
  0xc4   : > { %v10358_v55 = vpop.permute.xlu0 %2185  ;;  %7903 = vmatmul.mubr.msk.f32.gmra.mrb[6].mxu0 %vm486_vm1, %v10336_v46  ;;  %v10362_v56 = vpop.permute.xlu1 %2195 }
  0xc5   : > { %1569 = vmatprep.mubr.f32.mxu0 %v9978_v0  ;;  %v2200_v19 = vsel %vm2199_vm5, %v10358_v55, %v10351_v53 }
  0xc8   : > { %v10374_v60 = vpop.permute.xlu0 %2197  ;;  %7908 = vmatmul.mubr.msk.f32.vlgmr.msra.gmra.mrb[0].mxu0 %vm486_vm1, %v10368_v57  ;;  %v10378_v61 = vpop.permute.xlu1 %2193 }
  0xc9   : > { %1660 = vmatpush1.msra.mxu0 %v1490_v58  ;;  %1575 = vmatprep.mubr.f32.mxu0 %v9978_v0  ;;  %v2205_v23 = vsel %vm2199_vm5, %v10362_v56, %v10374_v60 }
  0xca   : > { %1862 = vmatprep.subr.mxu0 %v1844_v59 }
  0xcc   : > { %v465_v63 = vpop.permute.xlu0 %464  ;;  %7909 = vmatmul.mubr.msk.f32.gmra.mrb[2].mxu0 %vm486_vm1, %v10384_v62  ;;  %v10388_v1 = vpop.permute.xlu1 %2545 }
  0xcd   : > { %v476_v2 = vsel %vm472_vm0, %v465_v63, %v10250_v17  ;;  %v475_v4 = vsel %vm472_vm0, %v10236_v11, %v465_v63  ;;  %1723 = vmatprep.mubr.f32.mxu0 %v9978_v0  ;;  %v10447_v17 = vld [vmem:[%s12639_s1 + $0x48] sm:$0xff] }
  0xce   : > { %570 = vmatprep.subr.mxu1 %v476_v2 }
  0xcf   : > { %571 = vmatpush1.msra.mxu1 %v475_v4 }
  0xd0   : > { %v10396_v8 = vpop.permute.xlu0 %2547  ;;  %7882 = vmatmul.mubr.msk.f32.vlgmr.msra.gmra.mrb[0].mxu1 %vm486_vm1, %v10243_v14  ;;  %8496 = vmatprep.subr.mxu1 %v10246_v16  ;;  %v10401_v9 = vpop.permute.xlu1 %2543 }
  0xd1   : > { %7912 = vmatmul.mubr.msk.f32.vlgmr.msra.gmra.mrb[4].mxu0 %vm486_vm1, %v10368_v57  ;;  %8497 = vmatpush3.msra.mxu1 %v10246_v16  ;;  %v2561_v32 = vsel %vm2559_vm6, %v10388_v1, %v10396_v8  ;;  %v2560_v38 = vsel %vm2559_vm6, %v10401_v9, %v10388_v1 }
  0xd2   : > { %1863 = vmatpush1.msra.mxu0 %v1843_v6  ;;  %640 = vmatprep.mubr.f32.mxu1 %v9978_v0  ;;  %v7956_v6 = vld [vmem:[%s12639_s1 + $0x80] sm:$0xff] }
  0xd3   : > { %1729 = vmatprep.mubr.f32.mxu0 %v9978_v0  ;;  %2016 = vmatprep.subr.mxu0 %v1848_v10  ;;  %v7957_v10 = vld [vmem:[%s12639_s1 + $0x88] sm:$0xff] }
  0xd4   : > { %v10411_v11 = vpop.permute.xlu0 %2553  ;;  %7883 = vmatmul.mubr.msk.f32.gmra.mrb[2].mxu1 %vm486_vm1, %v10260_v20  ;;  %v10415_v12 = vpop.permute.xlu1 %2555  ;;  %882 = vmatprep.subr.mxu1 %v10202_v7 }
  0xd5   : > { %7913 = vmatmul.mubr.msk.f32.gmra.mrb[6].mxu0 %vm486_vm1, %v10384_v62  ;;  %8498 = vmatprep.mubr.msk.f32.mxu1 %vm486_vm1, %v10243_v14  ;;  %v2201_v14 = vsel %vm2199_vm5, %v10351_v53, %v10355_v54  ;;  %v10613_v53 = vld [vmem:[%s12639_s1 + $0x70] sm:$0xff] }
  0xd6   : > { %1926 = vmatprep.mubr.f32.mxu0 %v9978_v0 }
  0xd8   : > { %v10431_v16 = vpop.permute.xlu0 %2551  ;;  %8499 = vmatmul.mubr.msk.f32.vlgmr.msra.gmra.mrb[4].mxu1 %vm486_vm1, %v10260_v20  ;;  %v10435_v7 = vpop.permute.xlu1 %2905 }
  0xd9   : > { %7918 = vmatmul.mubr.msk.f32.vlgmr.msra.gmra.mrb[0].mxu0 %vm486_vm1, %v10426_v13  ;;  %883 = vmatpush1.msra.mxu1 %v10134_v3  ;;  %v2564_v43 = vsel %vm2559_vm6, %v10431_v16, %v10411_v11 }
  0xda   : > { %2017 = vmatpush1.msra.mxu0 %v1847_v15  ;;  %946 = vmatprep.mubr.f32.mxu1 %v9978_v0 }
  0xdb   : > { %1932 = vmatprep.mubr.f32.mxu0 %v9978_v0  ;;  %8501 = vmatprep.subr.mxu1 %v10144_v5 }
  0xdc   : > { %v10451_v18 = vpop.permute.xlu0 %2907  ;;  %7890 = vmatmul.mubr.msk.f32.vlgmr.msra.gmra.mrb[0].mxu1 %vm486_vm1, %v10283_v27  ;;  %v10455_v3 = vpop.permute.xlu1 %2903  ;;  %2219 = vmatprep.subr.mxu0 %v2201_v14  ;;  %v3663_v14 = vld [vmem:[%s12620_s7 + $0x18] sm:$0xff] }
  0xdd   : > { %7919 = vmatmul.mubr.msk.f32.gmra.mrb[2].mxu0 %vm486_vm1, %v10447_v17  ;;  %952 = vmatprep.mubr.f32.mxu1 %v9978_v0  ;;  %v2920_v47 = vsel %vm2919_vm7, %v10455_v3, %v10435_v7  ;;  %v3660_v3 = vld [vmem:[%s12620_s7] sm:$0xff] }
  0xde   : > { %2080 = vmatprep.mubr.f32.mxu0 %v9978_v0  ;;  %8502 = vmatpush3.msra.mxu1 %v10144_v5 }
  0xe0   : > { %v1121_v20 = vpop.permute.xlu0 %1120  ;;  %7891 = vmatmul.mubr.msk.f32.gmra.mrb[2].mxu1 %vm486_vm1, %v10295_v31  ;;  %v10467_v21 = vpop.permute.xlu1 %2913 }
  0xe1   : > { %7922 = vmatmul.mubr.msk.f32.vlgmr.msra.gmra.mrb[4].mxu0 %vm486_vm1, %v10426_v13  ;;  %v1132_v5 = vsel %vm1128_vm2, %v1121_v20, %v10277_v26  ;;  %8503 = vmatprep.mubr.msk.f32.mxu1 %vm486_vm1, %v10283_v27  ;;  %v1131_v24 = vsel %vm1128_vm2, %v10264_v22, %v1121_v20  ;;  %v10494_v22 = vld [vmem:[%s12639_s1 + $0x50] sm:$0xff]  ;;  %v2204_v26 = vsel %vm2199_vm5, %v10378_v61, %v10362_v56  ;;  %v3665_v20 = vld [vmem:[%s12620_s7 + $0x28] sm:$0xff] }
  0xe2   : > { %2220 = vmatpush1.msra.mxu0 %v2200_v19  ;;  %1225 = vmatprep.subr.mxu1 %v1132_v5  ;;  %v3662_v19 = vld [vmem:[%s12620_s7 + $0x10] sm:$0xff] }
  0xe3   : > { %2086 = vmatprep.mubr.f32.mxu0 %v9978_v0  ;;  %2373 = vmatprep.subr.mxu0 %v2205_v23  ;;  %v9035_v23 = vpack.c.bf16 %v3662_v19, %v3660_v3  ;;  %v3707_v3 = vld [vmem:[%s12620_s7 + $0x178] sm:$0xff] }
  0xe4   : > { %v10481_v28 = vpop.permute.xlu0 %2915  ;;  %8504 = vmatmul.mubr.msk.f32.vlgmr.msra.gmra.mrb[4].mxu1 %vm486_vm1, %v10295_v31  ;;  %v10485_v29 = vpop.permute.xlu1 %2911 }
  0xe5   : > { %1226 = vmatpush1.msra.mxu1 %v1131_v24  ;;  %7923 = vmatmul.mubr.msk.f32.gmra.mrb[6].mxu0 %vm486_vm1, %v10447_v17  ;;  %v2925_v51 = vsel %vm2919_vm7, %v10467_v21, %v10481_v28  ;;  %v2924_v55 = vsel %vm2919_vm7, %v10485_v29, %v10467_v21  ;;  %v3667_v21 = vld [vmem:[%s12620_s7 + $0x38] sm:$0xff]  ;;  %v3664_v24 = vld [vmem:[%s12620_s7 + $0x20] sm:$0xff] }
  0xe6   : > { %8506 = vmatprep.subr.mxu1 %v10273_v25  ;;  %1289 = vmatprep.mubr.f32.mxu1 %v9978_v0  ;;  %v9037_v5 = vpack.c.bf16 %v3667_v21, %v3665_v20  ;;  %v3704_v21 = vld [vmem:[%s12620_s7 + $0x160] sm:$0xff] }
  0xe7   : > { %2283 = vmatprep.mubr.f32.mxu0 %v9978_v0 }
  0xe8   : > { %v10500_v27 = vpop.permute.xlu0 %3265  ;;  %7900 = vmatmul.mubr.msk.f32.vlgmr.msra.gmra.mrb[0].mxu1 %vm486_vm1, %v10319_v40  ;;  %v10504_v31 = vpop.permute.xlu1 %3267 }
  0xe9   : > { %8507 = vmatpush3.msra.mxu1 %v10273_v25  ;;  %7928 = vmatmul.mubr.msk.f32.vlgmr.msra.gmra.mrb[0].mxu0 %vm486_vm1, %v10494_v22  ;;  %v3281_v58 = vsel %vm3279_vm8, %v10500_v27, %v10504_v31 }
  0xea   : > { %2374 = vmatpush1.msra.mxu0 %v2204_v26  ;;  %1295 = vmatprep.mubr.f32.mxu1 %v9978_v0 }
  0xeb   : > { %2289 = vmatprep.mubr.f32.mxu0 %v9978_v0  ;;  %2580 = vmatprep.subr.mxu0 %v2561_v32  ;;  %v3670_v32 = vld [vmem:[%s12620_s7 + $0x50] sm:$0xff] }
  0xec   : > { %v10519_v34 = vpop.permute.xlu0 %3263  ;;  %7901 = vmatmul.mubr.msk.f32.gmra.mrb[2].mxu1 %vm486_vm1, %v10336_v46  ;;  %v1478_v25 = vpop.permute.xlu1 %1477 }
  0xed   : > { %7929 = vmatmul.mubr.msk.f32.gmra.mrb[2].mxu0 %vm486_vm1, %v10516_v33  ;;  %v1489_v35 = vsel %vm1485_vm3, %v1478_v25, %v10308_v37  ;;  %8508 = vmatprep.mubr.msk.f32.mxu1 %vm486_vm1, %v10319_v40  ;;  %v1488_v41 = vsel %vm1485_vm3, %v10289_v30, %v1478_v25  ;;  %v2565_v37 = vsel %vm2559_vm6, %v10411_v11, %v10415_v12 }
  0xee   : > { %1582 = vmatprep.subr.mxu1 %v1489_v35  ;;  %2437 = vmatprep.mubr.f32.mxu0 %v9978_v0  ;;  %v3280_v1 = vsel %vm3279_vm8, %v10519_v34, %v10500_v27  ;;  %v3675_v34 = vld [vmem:[%s12620_s7 + $0x78] sm:$0xff] }
  0xf0   : > { %8509 = vmatmul.mubr.msk.f32.vlgmr.msra.gmra.mrb[4].mxu1 %vm486_vm1, %v10336_v46  ;;  %v1835_v40 = vpop.permute.xlu0 %1834  ;;  %v2192_v45 = vpop.permute.xlu1 %2191 }
  0xf1   : > { %1583 = vmatpush1.msra.mxu1 %v1488_v41  ;;  %7932 = vmatmul.mubr.msk.f32.vlgmr.msra.gmra.mrb[4].mxu0 %vm486_vm1, %v10494_v22  ;;  %v1846_v30 = vsel %vm1842_vm4, %v1835_v40, %v10345_v50  ;;  %v1845_v46 = vsel %vm1842_vm4, %v10313_v39, %v1835_v40  ;;  %v2203_v50 = vsel %vm2199_vm5, %v2192_v45, %v10378_v61  ;;  %v3674_v41 = vld [vmem:[%s12620_s7 + $0x70] sm:$0xff]  ;;  %v3679_v40 = vld [vmem:[%s12620_s7 + $0x98] sm:$0xff]  ;;  %vm5497_vm4 = vcmask 1046528  }
  0xf2   : > { %8511 = vmatprep.subr.mxu1 %v10304_v36  ;;  %2581 = vmatpush1.msra.mxu0 %v2560_v38  ;;  %v3672_v38 = vld [vmem:[%s12620_s7 + $0x60] sm:$0xff] }
  0xf3   : > { %1646 = vmatprep.mubr.f32.mxu1 %v9978_v0  ;;  %2443 = vmatprep.mubr.f32.mxu0 %v9978_v0 }
  0xf4   : > { %7910 = vmatmul.mubr.msk.f32.vlgmr.msra.gmra.mrb[0].mxu1 %vm486_vm1, %v10368_v57  ;;  %2734 = vmatprep.subr.mxu0 %v2565_v37  ;;  %v2558_v48 = vpop.permute.xlu1 %2557  ;;  %v2550_v39 = vpop.permute.xlu0 %2549  ;;  %v3677_v37 = vld [vmem:[%s12620_s7 + $0x88] sm:$0xff] }
  0xf5   : > { %8512 = vmatpush3.msra.mxu1 %v10304_v36  ;;  %7933 = vmatmul.mubr.msk.f32.gmra.mrb[6].mxu0 %vm486_vm1, %v10516_v33  ;;  %v2921_v36 = vsel %vm2919_vm7, %v10435_v7, %v10451_v18  ;;  %v2563_v61 = vsel %vm2559_vm6, %v2550_v39, %v10431_v16  ;;  %v2562_v2 = vsel %vm2559_vm6, %v10396_v8, %v2550_v39  ;;  %v3661_v7 = vld [vmem:[%s12620_s7 + $0x8] sm:$0xff]  ;;  %v3682_v39 = vld [vmem:[%s12620_s7 + $0xb0] sm:$0xff] }
  0xf6   : > { %1939 = vmatprep.subr.mxu1 %v1846_v30  ;;  %1652 = vmatprep.mubr.f32.mxu1 %v9978_v0  ;;  %v2566_v4 = vsel %vm2559_vm6, %v10415_v12, %v2558_v48  ;;  %v9047_v30 = vpack.c.bf16 %v3674_v41, %v3672_v38  ;;  %v3680_v48 = vld [vmem:[%s12620_s7 + $0xa0] sm:$0xff]  ;;  %v3719_v38 = vld [vmem:[%s12620_s7 + $0x1d8] sm:$0xff]  ;;  %vm5683_vm6 = vcmask 1045504  }
  0xf7   : > { %2644 = vmatprep.mubr.f32.mxu0 %v9978_v0 }
  0xf8   : > { %7911 = vmatmul.mubr.msk.f32.gmra.mrb[2].mxu1 %vm486_vm1, %v10384_v62  ;;  %v10601_v52 = vpop.permute.xlu1 %2917 }
  0xf9   : > { %7938 = vmatmul.mubr.msk.f32.vlgmr.msra.gmra.mrb[0].mxu0 %vm486_vm1, %v10556_v42  ;;  %8513 = vmatprep.mubr.msk.f32.mxu1 %vm486_vm1, %v10368_v57  ;;  %v2202_v57 = vsel %vm2199_vm5, %v10355_v54, %v2192_v45  ;;  %v10633_v54 = vld [vmem:[%s12639_s1 + $0x78] sm:$0xff]  ;;  %v2926_v12 = vsel %vm2919_vm7, %v10481_v28, %v10601_v52  ;;  %v3666_v28 = vld [vmem:[%s12620_s7 + $0x30] sm:$0xff]  ;;  %v9055_v52 = vpack.c.bf16 %v3682_v39, %v3680_v48  ;;  %vm5785_vm5 = vcmask 1041408  }
  0xfa   : > { %2735 = vmatpush1.msra.mxu0 %v2564_v43  ;;  %2650 = vmatprep.mubr.f32.mxu0 %v9978_v0  ;;  %v9039_v26 = vpack.c.bf16 %v3666_v28, %v3664_v24  ;;  %v3676_v43 = vld [vmem:[%s12620_s7 + $0x80] sm:$0xff]  ;;  %v3683_v45 = vld [vmem:[%s12620_s7 + $0xb8] sm:$0xff] }
  0xfb   : > { %2940 = vmatprep.subr.mxu0 %v2921_v36  ;;  %v3678_v36 = vld [vmem:[%s12620_s7 + $0x90] sm:$0xff]  ;;  %v3711_v24 = vld [vmem:[%s12620_s7 + $0x198] sm:$0xff] }
  0xfc   : > { %8514 = vmatmul.mubr.msk.f32.vlgmr.msra.gmra.mrb[4].mxu1 %vm486_vm1, %v10384_v62  ;;  %v3272_v56 = vpop.permute.xlu1 %3271  ;;  %v3727_v48 = vld [vmem:[%s12620_s7 + $0x218] sm:$0xff] }
  0xfd   : > { %1940 = vmatpush1.msra.mxu1 %v1845_v46  ;;  %7939 = vmatmul.mubr.msk.f32.gmra.mrb[2].mxu0 %vm486_vm1, %v10575_v44  ;;  %v9051_v46 = vpack.c.bf16 %v3678_v36, %v3676_v43  ;;  %v3723_v43 = vld [vmem:[%s12620_s7 + $0x1f8] sm:$0xff] }
  0xfe   : > { %8516 = vmatprep.subr.mxu1 %v10341_v49  ;;  %2003 = vmatprep.mubr.f32.mxu1 %v9978_v0 }
  0xff   : > { %2798 = vmatprep.mubr.f32.mxu0 %v9978_v0 }
 0x100   : > { %7920 = vmatmul.mubr.msk.f32.vlgmr.msra.gmra.mrb[0].mxu1 %vm486_vm1, %v10426_v13  ;;  %v3276_v63 = vpop.permute.xlu1 %3275 }
 0x101   : > { %8517 = vmatpush3.msra.mxu1 %v10341_v49  ;;  %7942 = vmatmul.mubr.msk.f32.vlgmr.msra.gmra.mrb[4].mxu0 %vm486_vm1, %v10556_v42  ;;  %v2910_v49 = vpop.permute.xlu0 %2909 }
 0x102   : > { %2296 = vmatprep.subr.mxu1 %v2203_v50  ;;  %2941 = vmatpush1.msra.mxu0 %v2920_v47  ;;  %v2923_v9 = vsel %vm2919_vm7, %v2910_v49, %v10485_v29  ;;  %v2922_v11 = vsel %vm2919_vm7, %v10451_v18, %v2910_v49  ;;  %v9033_v18 = vpack.c.bf16 %v3663_v14, %v3661_v7  ;;  %v3669_v29 = vld [vmem:[%s12620_s7 + $0x48] sm:$0xff]  ;;  %v3700_v14 = vld [vmem:[%s12620_s7 + $0x140] sm:$0xff]  ;;  %vm5887_vm7 = vcmask 1040384  }
 0x103   : > { %2009 = vmatprep.mubr.f32.mxu1 %v9978_v0  ;;  %2804 = vmatprep.mubr.f32.mxu0 %v9978_v0  ;;  %v3685_v50 = vld [vmem:[%s12620_s7 + $0xc8] sm:$0xff] }
 0x104   : > { %7921 = vmatmul.mubr.msk.f32.gmra.mrb[2].mxu1 %vm486_vm1, %v10447_v17  ;;  %3094 = vmatprep.subr.mxu0 %v2925_v51  ;;  %v3687_v51 = vld [vmem:[%s12620_s7 + $0xd8] sm:$0xff] }
 0x105   : > { %7943 = vmatmul.mubr.msk.f32.gmra.mrb[6].mxu0 %vm486_vm1, %v10575_v44  ;;  %8518 = vmatprep.mubr.msk.f32.mxu1 %vm486_vm1, %v10426_v13  ;;  %v10627_v59 = vpop.permute.xlu0 %3269  ;;  %v9057_v49 = vpack.c.bf16 %v3687_v51, %v3685_v50 }
 0x106   : > { %3004 = vmatprep.mubr.f32.mxu0 %v9978_v0  ;;  %v3283_v13 = vsel %vm3279_vm8, %v10627_v59, %v3272_v56 }
 0x108   : > { %8519 = vmatmul.mubr.msk.f32.vlgmr.msra.gmra.mrb[4].mxu1 %vm486_vm1, %v10447_v17  ;;  %v3282_v17 = vsel %vm3279_vm8, %v10504_v31, %v10627_v59  ;;  %v3668_v31 = vld [vmem:[%s12620_s7 + $0x40] sm:$0xff] }
 0x109   : > { %2297 = vmatpush1.msra.mxu1 %v2202_v57  ;;  %7948 = vmatmul.mubr.msk.f32.vlgmr.msra.gmra.mrb[0].mxu0 %vm486_vm1, %v10613_v53  ;;  %v3274_v62 = vpop.permute.xlu0 %3273  ;;  %v9043_v25 = vpack.c.bf16 %v3670_v32, %v3668_v31  ;;  %v3691_v57 = vld [vmem:[%s12620_s7 + $0xf8] sm:$0xff] }
 0x10a   : > { %8521 = vmatprep.subr.mxu1 %v10374_v60  ;;  %3095 = vmatpush1.msra.mxu0 %v2924_v55  ;;  %v3284_v8 = vsel %vm3279_vm8, %v3272_v56, %v3274_v62  ;;  %v3686_v55 = vld [vmem:[%s12620_s7 + $0xd0] sm:$0xff]  ;;  %v3689_v56 = vld [vmem:[%s12620_s7 + $0xe8] sm:$0xff]  ;;  %v3715_v31 = vld [vmem:[%s12620_s7 + $0x1b8] sm:$0xff] }
 0x10b   : > { %2360 = vmatprep.mubr.f32.mxu1 %v9978_v0  ;;  %3010 = vmatprep.mubr.f32.mxu0 %v9978_v0  ;;  %v9061_v59 = vpack.c.bf16 %v3691_v57, %v3689_v56  ;;  %v3726_v56 = vld [vmem:[%s12620_s7 + $0x210] sm:$0xff] }
 0x10c   : > { %7930 = vmatmul.mubr.msk.f32.vlgmr.msra.gmra.mrb[0].mxu1 %vm486_vm1, %v10494_v22  ;;  %3300 = vmatprep.subr.mxu0 %v3281_v58 }
 0x10d   : > { %8522 = vmatpush3.msra.mxu1 %v10374_v60  ;;  %7949 = vmatmul.mubr.msk.f32.gmra.mrb[2].mxu0 %vm486_vm1, %v10633_v54  ;;  %v3285_v60 = vsel %vm3279_vm8, %v3274_v62, %v3276_v63  ;;  %v3278_v15 = vpop.permute.xlu0 %3277  ;;  %v3693_v62 = vld [vmem:[%s12620_s7 + $0x108] sm:$0xff] }
 0x10e   : > { %2657 = vmatprep.subr.mxu1 %v2563_v61  ;;  %2366 = vmatprep.mubr.f32.mxu1 %v9978_v0  ;;  %v3286_v16 = vsel %vm3279_vm8, %v3276_v63, %v3278_v15  ;;  %v3690_v61 = vld [vmem:[%s12620_s7 + $0xf0] sm:$0xff]  ;;  %v3695_v63 = vld [vmem:[%s12620_s7 + $0x118] sm:$0xff]  ;;  %vm6182_vm8 = vcmask 1042432  }
 0x10f   : > { %3158 = vmatprep.mubr.f32.mxu0 %v9978_v0  ;;  %v3703_v15 = vld [vmem:[%s12620_s7 + $0x158] sm:$0xff] }
 0x110   : > { %7931 = vmatmul.mubr.msk.f32.gmra.mrb[2].mxu1 %vm486_vm1, %v10516_v33 }
 0x111   : > { %7952 = vmatmul.mubr.msk.f32.vlgmr.msra.gmra.mrb[4].mxu0 %vm486_vm1, %v10613_v53  ;;  %8523 = vmatprep.mubr.msk.f32.mxu1 %vm486_vm1, %v10494_v22  ;;  %v3671_v22 = vld [vmem:[%s12620_s7 + $0x58] sm:$0xff]  ;;  %v10918_v51 = vpop.permute.xlu1 %3624 }
 0x112   : > { %3301 = vmatpush1.msra.mxu0 %v3280_v1  ;;  %3164 = vmatprep.mubr.f32.mxu0 %v9978_v0  ;;  %v9041_v27 = vpack.c.bf16 %v3671_v22, %v3669_v29  ;;  %v3708_v22 = vld [vmem:[%s12620_s7 + $0x180] sm:$0xff] }
 0x113   : > { %3454 = vmatprep.subr.mxu0 %v3285_v60  ;;  %v9065_v60 = vpack.c.bf16 %v3695_v63, %v3693_v62 }
 0x114   : > { %8524 = vmatmul.mubr.msk.f32.vlgmr.msra.gmra.mrb[4].mxu1 %vm486_vm1, %v10516_v33  ;;  %v3673_v33 = vld [vmem:[%s12620_s7 + $0x68] sm:$0xff] }
 0x115   : > { %2658 = vmatpush1.msra.mxu1 %v2562_v2  ;;  %7953 = vmatmul.mubr.msk.f32.gmra.mrb[6].mxu0 %vm486_vm1, %v10633_v54  ;;  %v9045_v35 = vpack.c.bf16 %v3675_v34, %v3673_v33  ;;  %v3692_v2 = vld [vmem:[%s12620_s7 + $0x100] sm:$0xff] }
 0x116   : > { %8526 = vmatprep.subr.mxu1 %v2566_v4  ;;  %2721 = vmatprep.mubr.f32.mxu1 %v9978_v0  ;;  %v3712_v34 = vld [vmem:[%s12620_s7 + $0x1a0] sm:$0xff] }
 0x117   : > { %3364 = vmatprep.mubr.f32.mxu0 %v9978_v0 }
 0x118   : > { %7940 = vmatmul.mubr.msk.f32.vlgmr.msra.gmra.mrb[0].mxu1 %vm486_vm1, %v10556_v42 }
 0x119   : > { %8527 = vmatpush3.msra.mxu1 %v2566_v4  ;;  %7958 = vmatmul.mubr.msk.f32.vlgmr.msra.gmra.mrb[0].mxu0 %vm486_vm1, %v7956_v6  ;;  %v3694_v4 = vld [vmem:[%s12620_s7 + $0x110] sm:$0xff] }
 0x11a   : > { %3017 = vmatprep.subr.mxu1 %v2923_v9  ;;  %2727 = vmatprep.mubr.f32.mxu1 %v9978_v0  ;;  %v9067_v9 = vpack.c.bf16 %v3694_v4, %v3692_v2 }
 0x11b   : > { %3370 = vmatprep.mubr.f32.mxu0 %v9978_v0  ;;  %3455 = vmatpush1.msra.mxu0 %v3284_v8  ;;  %v3699_v8 = vld [vmem:[%s12620_s7 + $0x138] sm:$0xff] }
 0x11c   : > { %7941 = vmatmul.mubr.msk.f32.gmra.mrb[2].mxu1 %vm486_vm1, %v10575_v44 }
 0x11d   : > { %7959 = vmatmul.mubr.msk.f32.gmra.mrb[2].mxu0 %vm486_vm1, %v7957_v10  ;;  %8528 = vmatprep.mubr.msk.f32.mxu1 %vm486_vm1, %v10556_v42  ;;  %v9049_v42 = vpack.c.bf16 %v3679_v40, %v3677_v37  ;;  %v3716_v40 = vld [vmem:[%s12620_s7 + $0x1c0] sm:$0xff] }
 0x11e   : > { %3518 = vmatprep.mubr.f32.mxu0 %v9978_v0 }
 0x120   : > { %8529 = vmatmul.mubr.msk.f32.vlgmr.msra.gmra.mrb[4].mxu1 %vm486_vm1, %v10575_v44  ;;  %v3681_v44 = vld [vmem:[%s12620_s7 + $0xa8] sm:$0xff] }
 0x121   : > { %3018 = vmatpush1.msra.mxu1 %v2922_v11  ;;  %7962 = vmatmul.mubr.msk.f32.vlgmr.msra.gmra.mrb[4].mxu0 %vm486_vm1, %v7956_v6  ;;  %v9053_v47 = vpack.c.bf16 %v3683_v45, %v3681_v44  ;;  %v3696_v11 = vld [vmem:[%s12620_s7 + $0x120] sm:$0xff] }
 0x122   : > { %8531 = vmatprep.subr.mxu1 %v2926_v12  ;;  %3081 = vmatprep.mubr.f32.mxu1 %v9978_v0  ;;  %v3720_v45 = vld [vmem:[%s12620_s7 + $0x1e0] sm:$0xff] }
 0x123   : > { %3524 = vmatprep.mubr.f32.mxu0 %v9978_v0 }
 0x124   : > { %7950 = vmatmul.mubr.msk.f32.vlgmr.msra.gmra.mrb[0].mxu1 %vm486_vm1, %v10613_v53 }
 0x125   : > { %8532 = vmatpush3.msra.mxu1 %v2926_v12  ;;  %7963 = vmatmul.mubr.msk.f32.gmra.mrb[6].mxu0 %vm486_vm1, %v7957_v10  ;;  %v3698_v12 = vld [vmem:[%s12620_s7 + $0x130] sm:$0xff] }
 0x126   : > { %3087 = vmatprep.mubr.f32.mxu1 %v9978_v0  ;;  %3377 = vmatprep.subr.mxu1 %v3283_v13  ;;  %v3701_v13 = vld [vmem:[%s12620_s7 + $0x148] sm:$0xff] }
 0x127   : > { %4897 = vmatprep.mubr.f32.mxu0 %v9978_v0  ;;  %v9073_v7 = vpack.c.bf16 %v3703_v15, %v3701_v13 }
 0x128   : > { %7951 = vmatmul.mubr.msk.f32.gmra.mrb[2].mxu1 %vm486_vm1, %v10633_v54 }
 0x129   : > { %8533 = vmatprep.mubr.msk.f32.mxu1 %vm486_vm1, %v10613_v53  ;;  %v3684_v53 = vld [vmem:[%s12620_s7 + $0xc0] sm:$0xff] }
 0x12a   : > { %v9059_v58 = vpack.c.bf16 %v3686_v55, %v3684_v53  ;;  %v3724_v55 = vld [vmem:[%s12620_s7 + $0x200] sm:$0xff] }
 0x12b   : > { %v9099_v63 = vpack.c.bf16 %v3726_v56, %v3724_v55  ;;  %v3752_v55 = vld [vmem:[%s12620_s7 + $0x2e0] sm:$0xff]  ;;  %v3754_v56 = vld [vmem:[%s12620_s7 + $0x2f0] sm:$0xff] }
 0x12c   : > { %8534 = vmatmul.mubr.msk.f32.vlgmr.msra.gmra.mrb[4].mxu1 %vm486_vm1, %v10633_v54  ;;  %v3688_v54 = vld [vmem:[%s12620_s7 + $0xe0] sm:$0xff] }
 0x12d   : > { %3378 = vmatpush1.msra.mxu1 %v3282_v17  ;;  %3441 = vmatprep.mubr.f32.mxu1 %v9978_v0  ;;  %v9063_v1 = vpack.c.bf16 %v3690_v61, %v3688_v54  ;;  %v3702_v17 = vld [vmem:[%s12620_s7 + $0x150] sm:$0xff]  ;;  %v3731_v54 = vld [vmem:[%s12620_s7 + $0x238] sm:$0xff] }
 0x12e   : > { %8536 = vmatprep.subr.mxu1 %v3286_v16  ;;  %v9075_v19 = vpack.c.bf16 %v3702_v17, %v3700_v14  ;;  %v3732_v17 = vld [vmem:[%s12620_s7 + $0x240] sm:$0xff] }
 0x130   : > { %7960 = vmatmul.mubr.msk.f32.vlgmr.msra.gmra.mrb[0].mxu1 %vm486_vm1, %v7956_v6 }
 0x131   : > { %3447 = vmatprep.mubr.f32.mxu1 %v9978_v0  ;;  %8537 = vmatpush3.msra.mxu1 %v3286_v16  ;;  %v9071_v16 = vpack.c.bf16 %v3698_v12, %v3696_v11  ;;  %v3735_v11 = vld [vmem:[%s12620_s7 + $0x258] sm:$0xff] }
 0x132   : > { %9034 = vmatprep.subr.bf16.mxu1 %v9033_v18  ;;  %v3705_v18 = vld [vmem:[%s12620_s7 + $0x168] sm:$0xff] }
 0x133   : > { %v9077_v20 = vpack.c.bf16 %v3707_v3, %v3705_v18  ;;  %v3734_v18 = vld [vmem:[%s12620_s7 + $0x250] sm:$0xff]  ;;  %v3737_v3 = vld [vmem:[%s12620_s7 + $0x268] sm:$0xff] }
 0x134   : > { %7961 = vmatmul.mubr.msk.f32.gmra.mrb[2].mxu1 %vm486_vm1, %v7957_v10 }
 0x135   : > { %8538 = vmatprep.mubr.msk.f32.mxu1 %vm486_vm1, %v7956_v6  ;;  %v3697_v6 = vld [vmem:[%s12620_s7 + $0x128] sm:$0xff] }
 0x138   : > { %8539 = vmatmul.mubr.msk.f32.vlgmr.msra.gmra.mrb[4].mxu1 %vm486_vm1, %v7957_v10  ;;  %v9069_v10 = vpack.c.bf16 %v3699_v8, %v3697_v6  ;;  %v3728_v6 = vld [vmem:[%s12620_s7 + $0x220] sm:$0xff]  ;;  %v3730_v8 = vld [vmem:[%s12620_s7 + $0x230] sm:$0xff] }
 0x139   : > { %9036 = vmatpush1.bf16.msra.mxu1 %v9035_v23  ;;  %v3706_v23 = vld [vmem:[%s12620_s7 + $0x170] sm:$0xff]  ;;  %v9103_v15 = vpack.c.bf16 %v3730_v8, %v3728_v6 }
 0x13a   : > { %9038 = vmatprep.subr.bf16.mxu1 %v9037_v5  ;;  %v3709_v5 = vld [vmem:[%s12620_s7 + $0x188] sm:$0xff]  ;;  %v9079_v28 = vpack.c.bf16 %v3706_v23, %v3704_v21  ;;  %v9107_v21 = vpack.c.bf16 %v3734_v18, %v3732_v17  ;;  %v3766_v17 = vld [vmem:[%s12620_s7 + $0x350] sm:$0xff] }
 0x13b   : > { %v9081_v29 = vpack.c.bf16 %v3711_v24, %v3709_v5  ;;  %v3736_v24 = vld [vmem:[%s12620_s7 + $0x260] sm:$0xff]  ;;  %v3769_v18 = vld [vmem:[%s12620_s7 + $0x368] sm:$0xff] }
 0x13d   : > { %9040 = vmatpush1.bf16.msra.mxu1 %v9039_v26  ;;  %v3710_v26 = vld [vmem:[%s12620_s7 + $0x190] sm:$0xff] }
 0x13e   : > { %9042 = vmatprep.subr.bf16.mxu1 %v9041_v27  ;;  %v3713_v27 = vld [vmem:[%s12620_s7 + $0x1a8] sm:$0xff]  ;;  %v9083_v32 = vpack.c.bf16 %v3710_v26, %v3708_v22  ;;  %v3743_v22 = vld [vmem:[%s12620_s7 + $0x298] sm:$0xff] }
 0x13f   : > { %v9085_v33 = vpack.c.bf16 %v3715_v31, %v3713_v27  ;;  %v3740_v31 = vld [vmem:[%s12620_s7 + $0x280] sm:$0xff] }
 0x141   : > { %9044 = vmatpush1.bf16.msra.mxu1 %v9043_v25  ;;  %v3714_v25 = vld [vmem:[%s12620_s7 + $0x1b0] sm:$0xff] }
 0x142   : > { %9046 = vmatprep.subr.bf16.mxu1 %v9045_v35  ;;  %v3717_v35 = vld [vmem:[%s12620_s7 + $0x1c8] sm:$0xff]  ;;  %v9087_v41 = vpack.c.bf16 %v3714_v25, %v3712_v34  ;;  %v3747_v34 = vld [vmem:[%s12620_s7 + $0x2b8] sm:$0xff] }
 0x143   : > { %v9089_v37 = vpack.c.bf16 %v3719_v38, %v3717_v35  ;;  %v3744_v38 = vld [vmem:[%s12620_s7 + $0x2a0] sm:$0xff] }
 0x145   : > { %9048 = vmatpush1.bf16.msra.mxu1 %v9047_v30  ;;  %v3718_v30 = vld [vmem:[%s12620_s7 + $0x1d0] sm:$0xff] }
 0x146   : > { %9050 = vmatprep.subr.bf16.mxu1 %v9049_v42  ;;  %v3721_v42 = vld [vmem:[%s12620_s7 + $0x1e8] sm:$0xff]  ;;  %v9091_v36 = vpack.c.bf16 %v3718_v30, %v3716_v40  ;;  %v3751_v40 = vld [vmem:[%s12620_s7 + $0x2d8] sm:$0xff] }
 0x147   : > { %v9093_v44 = vpack.c.bf16 %v3723_v43, %v3721_v42 }
 0x149   : > { %9052 = vmatpush1.bf16.msra.mxu1 %v9051_v46  ;;  %v3722_v46 = vld [vmem:[%s12620_s7 + $0x1f0] sm:$0xff] }
 0x14a   : > { %9054 = vmatprep.subr.bf16.mxu1 %v9053_v47  ;;  %v3725_v47 = vld [vmem:[%s12620_s7 + $0x208] sm:$0xff]  ;;  %v9095_v39 = vpack.c.bf16 %v3722_v46, %v3720_v45  ;;  %v3748_v45 = vld [vmem:[%s12620_s7 + $0x2c0] sm:$0xff]  ;;  %v3750_v46 = vld [vmem:[%s12620_s7 + $0x2d0] sm:$0xff] }
 0x14b   : > { %v9097_v50 = vpack.c.bf16 %v3727_v48, %v3725_v47  ;;  %v3753_v47 = vld [vmem:[%s12620_s7 + $0x2e8] sm:$0xff]  ;;  %v3755_v48 = vld [vmem:[%s12620_s7 + $0x2f8] sm:$0xff] }
 0x14d   : > { %9056 = vmatpush1.bf16.msra.mxu1 %v9055_v52 }
 0x14e   : > { %9058 = vmatprep.subr.bf16.mxu1 %v9057_v49 }
 0x151   : > { %9060 = vmatpush1.bf16.msra.mxu1 %v9059_v58  ;;  %v10928_v58 = vpop.permute.xlu0 %3629 }
 0x152   : > { %9062 = vmatprep.subr.bf16.mxu1 %v9061_v59  ;;  %v3729_v59 = vld [vmem:[%s12620_s7 + $0x228] sm:$0xff] }
 0x153   : > { %v9101_v4 = vpack.c.bf16 %v3731_v54, %v3729_v59  ;;  %v3759_v59 = vld [vmem:[%s12620_s7 + $0x318] sm:$0xff] }
 0x155   : > { %9064 = vmatpush1.bf16.msra.mxu1 %v9063_v1 }
 0x156   : > { %9066 = vmatprep.subr.bf16.mxu1 %v9065_v60 }
 0x159   : > { %9068 = vmatpush1.bf16.msra.mxu1 %v9067_v9 }
 0x15a   : > { %9070 = vmatprep.subr.bf16.mxu1 %v9069_v10  ;;  %v3733_v10 = vld [vmem:[%s12620_s7 + $0x248] sm:$0xff] }
 0x15b   : > { %v9105_v14 = vpack.c.bf16 %v3735_v11, %v3733_v10  ;;  %v3762_v10 = vld [vmem:[%s12620_s7 + $0x330] sm:$0xff]  ;;  %v3765_v11 = vld [vmem:[%s12620_s7 + $0x348] sm:$0xff] }
 0x15d   : > { %9072 = vmatpush1.bf16.msra.mxu1 %v9071_v16 }
 0x15e   : > { %9074 = vmatprep.subr.bf16.mxu1 %v9073_v7 }
 0x161   : > { %9076 = vmatpush1.bf16.msra.mxu1 %v9075_v19  ;;  %v3739_v19 = vld [vmem:[%s12620_s7 + $0x278] sm:$0xff] }
 0x162   : > { %9078 = vmatprep.subr.bf16.mxu1 %v9077_v20  ;;  %v9109_v5 = vpack.c.bf16 %v3739_v19, %v3737_v3  ;;  %v3771_v3 = vld [vmem:[%s12620_s7 + $0x378] sm:$0xff] }
 0x165   : > { %9080 = vmatpush1.bf16.msra.mxu1 %v9079_v28  ;;  %v3738_v28 = vld [vmem:[%s12620_s7 + $0x270] sm:$0xff] }
 0x166   : > { %9082 = vmatprep.subr.bf16.mxu1 %v9081_v29  ;;  %v3741_v29 = vld [vmem:[%s12620_s7 + $0x288] sm:$0xff]  ;;  %v9111_v26 = vpack.c.bf16 %v3738_v28, %v3736_v24  ;;  %v3770_v24 = vld [vmem:[%s12620_s7 + $0x370] sm:$0xff] }
 0x167   : > { %v9113_v27 = vpack.c.bf16 %v3743_v22, %v3741_v29  ;;  %v3773_v28 = vld [vmem:[%s12620_s7 + $0x388] sm:$0xff]  ;;  %v3775_v29 = vld [vmem:[%s12620_s7 + $0x398] sm:$0xff] }
 0x169   : > { %9084 = vmatpush1.bf16.msra.mxu1 %v9083_v32  ;;  %v3742_v32 = vld [vmem:[%s12620_s7 + $0x290] sm:$0xff] }
 0x16a   : > { %9086 = vmatprep.subr.bf16.mxu1 %v9085_v33  ;;  %v3745_v33 = vld [vmem:[%s12620_s7 + $0x2a8] sm:$0xff]  ;;  %v9115_v25 = vpack.c.bf16 %v3742_v32, %v3740_v31  ;;  %v3774_v31 = vld [vmem:[%s12620_s7 + $0x390] sm:$0xff] }
 0x16b   : > { %v9117_v35 = vpack.c.bf16 %v3747_v34, %v3745_v33  ;;  %v3777_v32 = vld [vmem:[%s12620_s7 + $0x3a8] sm:$0xff]  ;;  %v3779_v33 = vld [vmem:[%s12620_s7 + $0x3b8] sm:$0xff] }
 0x16d   : > { %9088 = vmatpush1.bf16.msra.mxu1 %v9087_v41  ;;  %v3746_v41 = vld [vmem:[%s12620_s7 + $0x2b0] sm:$0xff] }
 0x16e   : > { %9090 = vmatprep.subr.bf16.mxu1 %v9089_v37  ;;  %v3749_v37 = vld [vmem:[%s12620_s7 + $0x2c8] sm:$0xff]  ;;  %v9119_v43 = vpack.c.bf16 %v3746_v41, %v3744_v38  ;;  %v3778_v38 = vld [vmem:[%s12620_s7 + $0x3b0] sm:$0xff] }
 0x16f   : > { %v3781_v41 = vld [vmem:[%s12620_s7 + $0x3c8] sm:$0xff] }
 0x171   : > { %9092 = vmatpush1.bf16.msra.mxu1 %v9091_v36 }
 0x172   : > { %9094 = vmatprep.subr.bf16.mxu1 %v9093_v44  ;;  %v9121_v44 = vpack.c.bf16 %v3751_v40, %v3749_v37  ;;  %v3783_v37 = vld [vmem:[%s12620_s7 + $0x3d8] sm:$0xff] }
 0x175   : > { %9096 = vmatpush1.bf16.msra.mxu1 %v9095_v39 }
 0x176   : > { %9098 = vmatprep.subr.bf16.mxu1 %v9097_v50 }
 0x1ec   : > { %v3366_v52 = vpop.f32.mrb[0].mxu0 }
 0x1ed   : > { %v3368_v49 = vpop.f32.mrb[1].mxu0  ;;  %v3632_v53 = vadd.f32 %v10918_v51, %v3366_v52 }
 0x1ee   : > { %v3633_v57 = vadd.f32 %v10918_v51, %v3368_v49  ;;  %v9123_v49 = vpack.c.bf16 %v3750_v46, %v3748_v45  ;;  %v3787_v45 = vld [vmem:[%s12620_s7 + $0x3f8] sm:$0xff] }
 0x1ef   : > { %v3646_v2 = vmul.f32 %v3632_v53, %v3632_v53  ;;  %v9125_v53 = vpack.c.bf16 %v3755_v48, %v3753_v47  ;;  %v3784_v48 = vld [vmem:[%s12620_s7 + $0x3e0] sm:$0xff] }
 0x1f0   : > { %v3647_v61 = vmul.f32 %v3633_v57, %v3633_v57  ;;  %v3372_v62 = vpop.f32.mrb[2].mxu0  ;;  %v3757_v57 = vld [vmem:[%s12620_s7 + $0x308] sm:$0xff] }
 0x1f1   : > { %v3639_v1 = vadd.f32 %v10928_v58, %v3372_v62  ;;  %v3374_v60 = vpop.f32.mrb[3].mxu0  ;;  %v9127_v62 = vpack.c.bf16 %v3754_v56, %v3752_v55 }
 0x1f2   : > { %v3640_v9 = vadd.f32 %v10928_v58, %v3374_v60  ;;  %3941 = vmatprep.mubr.f32.mxu1 %v3647_v61  ;;  %v3758_v60 = vld [vmem:[%s12620_s7 + $0x310] sm:$0xff] }
 0x1f3   : > { %3942 = vmatmul.mubr.f32.vlgmr.msra.gmra.mrb[6].mxu1 %v3646_v2  ;;  %v3653_v16 = vmul.f32 %v3639_v1, %v3639_v1  ;;  %v3756_v1 = vld [vmem:[%s12620_s7 + $0x300] sm:$0xff]  ;;  %v3761_v2 = vld [vmem:[%s12620_s7 + $0x328] sm:$0xff] }
 0x1f4   : > { %v3654_v12 = vmul.f32 %v3640_v9, %v3640_v9  ;;  %9100 = vmatpush1.bf16.msra.mxu1 %v9099_v63  ;;  %v10950_v13 = vpop.f32.mrb[4].mxu0  ;;  %v9129_v63 = vpack.c.bf16 %v3759_v59, %v3757_v57  ;;  %v9131_v6 = vpack.c.bf16 %v3758_v60, %v3756_v1  ;;  %v3760_v9 = vld [vmem:[%s12620_s7 + $0x320] sm:$0xff]  ;;  %v3793_v1 = vld [vmem:[%s12620_s7 + $0x428] sm:$0xff] }
 0x1f5   : > { %v10952_v7 = vpop.f32.mrb[5].mxu0  ;;  %9102 = vmatprep.subr.bf16.mxu1 %v9101_v4  ;;  %v3763_v4 = vld [vmem:[%s12620_s7 + $0x338] sm:$0xff]  ;;  %v3788_v59 = vld [vmem:[%s12620_s7 + $0x400] sm:$0xff] }
 0x1f6   : > { %3947 = vmatprep.mubr.f32.mxu1 %v3654_v12  ;;  %v9133_v8 = vpack.c.bf16 %v3763_v4, %v3761_v2  ;;  %v3767_v12 = vld [vmem:[%s12620_s7 + $0x358] sm:$0xff] }
 0x1f7   : > { %3948 = vmatmul.mubr.f32.gmra.mrb[8].mxu1 %v3653_v16  ;;  %v9137_v16 = vpack.c.bf16 %v3767_v12, %v3765_v11  ;;  %v3797_v11 = vld [vmem:[%s12620_s7 + $0x448] sm:$0xff] }
 0x1f8   : > { %9104 = vmatpush1.bf16.msra.mxu1 %v9103_v15  ;;  %v10966_v20 = vpop.f32.mrb[6].mxu0  ;;  %v9135_v15 = vpack.c.bf16 %v3762_v10, %v3760_v9  ;;  %v3637_v9 = vadd.f32 %v10918_v51, %v10952_v7  ;;  %v3796_v7 = vld [vmem:[%s12620_s7 + $0x440] sm:$0xff] }
 0x1f9   : > { %v10968_v23 = vpop.f32.mrb[7].mxu0  ;;  %9106 = vmatprep.subr.bf16.mxu1 %v9105_v14  ;;  %v3764_v14 = vld [vmem:[%s12620_s7 + $0x340] sm:$0xff] }
 0x1fa   : > { %v9139_v19 = vpack.c.bf16 %v3766_v17, %v3764_v14  ;;  %v3798_v14 = vld [vmem:[%s12620_s7 + $0x450] sm:$0xff]  ;;  %v3651_v17 = vmul.f32 %v3637_v9, %v3637_v9  ;;  %v3828_v9 = vld [vmem:[%s12620_s7 + $0x540] sm:$0xff] }
 0x1fc   : > { %9108 = vmatpush1.bf16.msra.mxu1 %v9107_v21  ;;  %v9141_v21 = vpack.c.bf16 %v3771_v3, %v3769_v18  ;;  %v3801_v18 = vld [vmem:[%s12620_s7 + $0x468] sm:$0xff]  ;;  %v3803_v3 = vld [vmem:[%s12620_s7 + $0x478] sm:$0xff] }
 0x1fd   : > { %9110 = vmatprep.subr.bf16.mxu1 %v9109_v5  ;;  %v3768_v5 = vld [vmem:[%s12620_s7 + $0x360] sm:$0xff] }
 0x1fe   : > { %v9143_v22 = vpack.c.bf16 %v3770_v24, %v3768_v5  ;;  %v3800_v5 = vld [vmem:[%s12620_s7 + $0x460] sm:$0xff]  ;;  %v3802_v24 = vld [vmem:[%s12620_s7 + $0x470] sm:$0xff] }
 0x200   : > { %9112 = vmatpush1.bf16.msra.mxu1 %v9111_v26  ;;  %v9145_v26 = vpack.c.bf16 %v3775_v29, %v3773_v28  ;;  %v3805_v28 = vld [vmem:[%s12620_s7 + $0x488] sm:$0xff]  ;;  %v3807_v29 = vld [vmem:[%s12620_s7 + $0x498] sm:$0xff] }
 0x201   : > { %9114 = vmatprep.subr.bf16.mxu1 %v9113_v27  ;;  %v3772_v27 = vld [vmem:[%s12620_s7 + $0x380] sm:$0xff] }
 0x202   : > { %v9147_v34 = vpack.c.bf16 %v3774_v31, %v3772_v27  ;;  %v3804_v27 = vld [vmem:[%s12620_s7 + $0x480] sm:$0xff]  ;;  %v3806_v31 = vld [vmem:[%s12620_s7 + $0x490] sm:$0xff] }
 0x203   : > { %v11006_v30 = vpop.f32.mrb[0].mxu1 }
 0x204   : > { %9116 = vmatpush1.bf16.msra.mxu1 %v9115_v25  ;;  %v3445_v42 = vpop.f32.mrb[1].mxu1  ;;  %v9149_v25 = vpack.c.bf16 %v3779_v33, %v3777_v32  ;;  %v3634_v56 = vadd.f32 %v10918_v51, %v11006_v30  ;;  %v3795_v30 = vld [vmem:[%s12620_s7 + $0x438] sm:$0xff]  ;;  %v3809_v32 = vld [vmem:[%s12620_s7 + $0x4a8] sm:$0xff] }
 0x205   : > { %v3635_v36 = vadd.f32 %v10918_v51, %v3445_v42  ;;  %9118 = vmatprep.subr.bf16.mxu1 %v9117_v35  ;;  %v3776_v35 = vld [vmem:[%s12620_s7 + $0x3a0] sm:$0xff]  ;;  %v9153_v42 = vpack.c.bf16 %v3783_v37, %v3781_v41  ;;  %v3811_v33 = vld [vmem:[%s12620_s7 + $0x4b8] sm:$0xff]  ;;  %v3813_v41 = vld [vmem:[%s12620_s7 + $0x4c8] sm:$0xff] }
 0x206   : > { %v9151_v40 = vpack.c.bf16 %v3778_v38, %v3776_v35  ;;  %v3648_v2 = vmul.f32 %v3634_v56, %v3634_v56  ;;  %v3808_v35 = vld [vmem:[%s12620_s7 + $0x4a0] sm:$0xff]  ;;  %v3810_v38 = vld [vmem:[%s12620_s7 + $0x4b0] sm:$0xff]  ;;  %v3815_v37 = vld [vmem:[%s12620_s7 + $0x4d8] sm:$0xff] }
 0x207   : > { %v3649_v39 = vmul.f32 %v3635_v36, %v3635_v36  ;;  %v11021_v50 = vpop.f32.mrb[2].mxu1  ;;  %v3782_v36 = vld [vmem:[%s12620_s7 + $0x3d0] sm:$0xff] }
 0x208   : > { %9120 = vmatpush1.bf16.msra.mxu1 %v9119_v43  ;;  %v11023_v52 = vpop.f32.mrb[3].mxu1  ;;  %v3780_v43 = vld [vmem:[%s12620_s7 + $0x3c0] sm:$0xff]  ;;  %v3641_v4 = vadd.f32 %v10928_v58, %v11021_v50  ;;  %v3799_v50 = vld [vmem:[%s12620_s7 + $0x458] sm:$0xff] }
 0x209   : > { %9122 = vmatprep.subr.bf16.mxu1 %v9121_v44  ;;  %4018 = vmatprep.mubr.f32.mxu1 %v3649_v39  ;;  %v3785_v44 = vld [vmem:[%s12620_s7 + $0x3e8] sm:$0xff]  ;;  %v9155_v46 = vpack.c.bf16 %v3782_v36, %v3780_v43  ;;  %v3786_v39 = vld [vmem:[%s12620_s7 + $0x3f0] sm:$0xff]  ;;  %v3812_v43 = vld [vmem:[%s12620_s7 + $0x4c0] sm:$0xff] }
 0x20a   : > { %v9157_v47 = vpack.c.bf16 %v3787_v45, %v3785_v44  ;;  %v9159_v55 = vpack.c.bf16 %v3786_v39, %v3784_v48  ;;  %v3814_v36 = vld [vmem:[%s12620_s7 + $0x4d0] sm:$0xff]  ;;  %v3817_v44 = vld [vmem:[%s12620_s7 + $0x4e8] sm:$0xff]  ;;  %v3819_v45 = vld [vmem:[%s12620_s7 + $0x4f8] sm:$0xff] }
 0x20b   : > { %v11037_v54 = vpop.f32.mrb[4].mxu1  ;;  %v3816_v48 = vld [vmem:[%s12620_s7 + $0x4e0] sm:$0xff]  ;;  %v3818_v39 = vld [vmem:[%s12620_s7 + $0x4f0] sm:$0xff] }
 0x20c   : > { %9124 = vmatpush1.bf16.msra.mxu1 %v9123_v49  ;;  %v11039_v61 = vpop.f32.mrb[5].mxu1  ;;  %v3789_v49 = vld [vmem:[%s12620_s7 + $0x408] sm:$0xff] }
 0x20d   : > { %9126 = vmatprep.subr.bf16.mxu1 %v9125_v53  ;;  %v3791_v53 = vld [vmem:[%s12620_s7 + $0x418] sm:$0xff] }
 0x20e   : > { %v9161_v57 = vpack.c.bf16 %v3791_v53, %v3789_v49  ;;  %v3821_v49 = vld [vmem:[%s12620_s7 + $0x508] sm:$0xff]  ;;  %v3823_v53 = vld [vmem:[%s12620_s7 + $0x518] sm:$0xff] }
 0x20f   : > { %v9193_v56 = vpack.c.bf16 %v3823_v53, %v3821_v49  ;;  %v3857_v49 = vld [vmem:[%s12620_s7 + $0x628] sm:$0xff] }
 0x210   : > { %9128 = vmatpush1.bf16.msra.mxu1 %v9127_v62  ;;  %v3790_v62 = vld [vmem:[%s12620_s7 + $0x410] sm:$0xff] }
 0x211   : > { %9130 = vmatprep.subr.bf16.mxu1 %v9129_v63  ;;  %v3642_v63 = vadd.f32 %v10928_v58, %v11023_v52  ;;  %v9163_v60 = vpack.c.bf16 %v3790_v62, %v3788_v59  ;;  %v3792_v52 = vld [vmem:[%s12620_s7 + $0x420] sm:$0xff]  ;;  %v3822_v59 = vld [vmem:[%s12620_s7 + $0x510] sm:$0xff]  ;;  %v3825_v62 = vld [vmem:[%s12620_s7 + $0x528] sm:$0xff] }
 0x213   : > { %v3656_v10 = vmul.f32 %v3642_v63, %v3642_v63  ;;  %v3827_v63 = vld [vmem:[%s12620_s7 + $0x538] sm:$0xff] }
 0x214   : > { %9132 = vmatpush1.bf16.msra.mxu1 %v9131_v6  ;;  %v9165_v6 = vpack.c.bf16 %v3795_v30, %v3793_v1  ;;  %v9197_v30 = vpack.c.bf16 %v3827_v63, %v3825_v62  ;;  %v3861_v63 = vld [vmem:[%s12620_s7 + $0x648] sm:$0xff] }
 0x215   : > { %9134 = vmatprep.subr.bf16.mxu1 %v9133_v8  ;;  %v3794_v8 = vld [vmem:[%s12620_s7 + $0x430] sm:$0xff] }
 0x216   : > { %v9167_v12 = vpack.c.bf16 %v3794_v8, %v3792_v52 }
 0x218   : > { %9136 = vmatpush1.bf16.msra.mxu1 %v9135_v15  ;;  %v3655_v15 = vmul.f32 %v3641_v4, %v3641_v4  ;;  %v3829_v4 = vld [vmem:[%s12620_s7 + $0x548] sm:$0xff] }
 0x219   : > { %9138 = vmatprep.subr.bf16.mxu1 %v9137_v16  ;;  %v9169_v16 = vpack.c.bf16 %v3799_v50, %v3797_v11  ;;  %v3833_v11 = vld [vmem:[%s12620_s7 + $0x568] sm:$0xff]  ;;  %v3835_v50 = vld [vmem:[%s12620_s7 + $0x578] sm:$0xff] }
 0x21c   : > { %9140 = vmatpush1.bf16.msra.mxu1 %v9139_v19  ;;  %v9171_v19 = vpack.c.bf16 %v3798_v14, %v3796_v7  ;;  %v3834_v7 = vld [vmem:[%s12620_s7 + $0x570] sm:$0xff]  ;;  %v3837_v14 = vld [vmem:[%s12620_s7 + $0x588] sm:$0xff] }
 0x21d   : > { %9142 = vmatprep.subr.bf16.mxu1 %v9141_v21  ;;  %v9173_v21 = vpack.c.bf16 %v3803_v3, %v3801_v18 }
 0x220   : > { %9144 = vmatpush1.bf16.msra.mxu1 %v9143_v22  ;;  %v9175_v22 = vpack.c.bf16 %v3802_v24, %v3800_v5  ;;  %v3841_v5 = vld [vmem:[%s12620_s7 + $0x5a8] sm:$0xff]  ;;  %v3843_v24 = vld [vmem:[%s12620_s7 + $0x5b8] sm:$0xff] }
 0x221   : > { %9146 = vmatprep.subr.bf16.mxu1 %v9145_v26  ;;  %v9177_v26 = vpack.c.bf16 %v3807_v29, %v3805_v28  ;;  %v9213_v29 = vpack.c.bf16 %v3843_v24, %v3841_v5  ;;  %v5316_v5 = vld [vmem:[%s12617_s4] sm:$0xff]  ;;  %v5318_v24 = vld [vmem:[%s12617_s4 + $0x10] sm:$0xff] }
 0x224   : > { %9148 = vmatpush1.bf16.msra.mxu1 %v9147_v34  ;;  %v9179_v34 = vpack.c.bf16 %v3806_v31, %v3804_v27  ;;  %v3845_v27 = vld [vmem:[%s12620_s7 + $0x5c8] sm:$0xff]  ;;  %v3847_v31 = vld [vmem:[%s12620_s7 + $0x5d8] sm:$0xff] }
 0x225   : > { %9150 = vmatprep.subr.bf16.mxu1 %v9149_v25  ;;  %v9181_v25 = vpack.c.bf16 %v3811_v33, %v3809_v32  ;;  %v9217_v33 = vpack.c.bf16 %v3847_v31, %v3845_v27 }
 0x228   : > { %9152 = vmatpush1.bf16.msra.mxu1 %v9151_v40  ;;  %v9183_v40 = vpack.c.bf16 %v3810_v38, %v3808_v35  ;;  %v3849_v35 = vld [vmem:[%s12620_s7 + $0x5e8] sm:$0xff]  ;;  %v3851_v38 = vld [vmem:[%s12620_s7 + $0x5f8] sm:$0xff] }
 0x229   : > { %9154 = vmatprep.subr.bf16.mxu1 %v9153_v42  ;;  %v9185_v42 = vpack.c.bf16 %v3815_v37, %v3813_v41  ;;  %v9221_v37 = vpack.c.bf16 %v3851_v38, %v3849_v35 }
 0x22c   : > { %9156 = vmatpush1.bf16.msra.mxu1 %v9155_v46  ;;  %v9187_v46 = vpack.c.bf16 %v3814_v36, %v3812_v43  ;;  %v3853_v43 = vld [vmem:[%s12620_s7 + $0x608] sm:$0xff]  ;;  %v3855_v36 = vld [vmem:[%s12620_s7 + $0x618] sm:$0xff] }
 0x22d   : > { %9158 = vmatprep.subr.bf16.mxu1 %v9157_v47  ;;  %v9189_v47 = vpack.c.bf16 %v3819_v45, %v3817_v44  ;;  %v3636_v45 = vadd.f32 %v10918_v51, %v10950_v13  ;;  %v3859_v13 = vld [vmem:[%s12620_s7 + $0x638] sm:$0xff] }
 0x230   : > { %9160 = vmatpush1.bf16.msra.mxu1 %v9159_v55  ;;  %v9191_v55 = vpack.c.bf16 %v3818_v39, %v3816_v48  ;;  %v3854_v48 = vld [vmem:[%s12620_s7 + $0x610] sm:$0xff]  ;;  %v3644_v39 = vadd.f32 %v10928_v58, %v10968_v23  ;;  %v3856_v23 = vld [vmem:[%s12620_s7 + $0x620] sm:$0xff] }
 0x231   : > { %9162 = vmatprep.subr.bf16.mxu1 %v9161_v57  ;;  %v3820_v57 = vld [vmem:[%s12620_s7 + $0x500] sm:$0xff] }
 0x232   : > { %v9195_v1 = vpack.c.bf16 %v3822_v59, %v3820_v57  ;;  %v9229_v57 = vpack.c.bf16 %v3859_v13, %v3857_v49  ;;  %v3858_v59 = vld [vmem:[%s12620_s7 + $0x630] sm:$0xff]  ;;  %v3658_v62 = vmul.f32 %v3644_v39, %v3644_v39 }
 0x233   : > { %4019 = vmatmul.mubr.f32.vlgmr.msra.gmra.mrb[6].mxu1 %v3648_v2  ;;  %v3826_v2 = vld [vmem:[%s12620_s7 + $0x530] sm:$0xff] }
 0x234   : > { %4024 = vmatprep.mubr.f32.mxu1 %v3656_v10  ;;  %9164 = vmatpush1.bf16.msra.mxu1 %v9163_v60  ;;  %v3824_v60 = vld [vmem:[%s12620_s7 + $0x520] sm:$0xff]  ;;  %v3830_v10 = vld [vmem:[%s12620_s7 + $0x550] sm:$0xff] }
 0x235   : > { %9166 = vmatprep.subr.bf16.mxu1 %v9165_v6  ;;  %v3831_v6 = vld [vmem:[%s12620_s7 + $0x558] sm:$0xff]  ;;  %v9199_v52 = vpack.c.bf16 %v3826_v2, %v3824_v60  ;;  %v3860_v2 = vld [vmem:[%s12620_s7 + $0x640] sm:$0xff] }
 0x236   : > { %v9201_v8 = vpack.c.bf16 %v3831_v6, %v3829_v4  ;;  %v3862_v4 = vld [vmem:[%s12620_s7 + $0x650] sm:$0xff]  ;;  %v3865_v6 = vld [vmem:[%s12620_s7 + $0x668] sm:$0xff] }
 0x237   : > { %4025 = vmatmul.mubr.f32.gmra.mrb[8].mxu1 %v3655_v15  ;;  %v9205_v15 = vpack.c.bf16 %v3835_v50, %v3833_v11  ;;  %v3866_v11 = vld [vmem:[%s12620_s7 + $0x670] sm:$0xff] }
 0x238   : > { %9168 = vmatpush1.bf16.msra.mxu1 %v9167_v12  ;;  %4095 = vmatprep.mubr.f32.mxu1 %v3651_v17  ;;  %v9203_v12 = vpack.c.bf16 %v3830_v10, %v3828_v9  ;;  %v3839_v17 = vld [vmem:[%s12620_s7 + $0x598] sm:$0xff]  ;;  %v3864_v10 = vld [vmem:[%s12620_s7 + $0x660] sm:$0xff] }
 0x239   : > { %9170 = vmatprep.subr.bf16.mxu1 %v9169_v16  ;;  %v3832_v16 = vld [vmem:[%s12620_s7 + $0x560] sm:$0xff]  ;;  %v9209_v3 = vpack.c.bf16 %v3839_v17, %v3837_v14  ;;  %v9239_v50 = vpack.c.bf16 %v3866_v11, %v3864_v10 }
 0x23a   : > { %v9207_v18 = vpack.c.bf16 %v3834_v7, %v3832_v16  ;;  %v3868_v16 = vld [vmem:[%s12620_s7 + $0x680] sm:$0xff]  ;;  %v3645_v7 = vadd.f32 %v11037_v54, %v10928_v58 }
 0x23c   : > { %9172 = vmatpush1.bf16.msra.mxu1 %v9171_v19  ;;  %v3836_v19 = vld [vmem:[%s12620_s7 + $0x580] sm:$0xff]  ;;  %v3659_v17 = vmul.f32 %v3645_v7, %v3645_v7 }
 0x23d   : > { %9174 = vmatprep.subr.bf16.mxu1 %v9173_v21  ;;  %v3838_v21 = vld [vmem:[%s12620_s7 + $0x590] sm:$0xff] }
 0x23e   : > { %v9211_v28 = vpack.c.bf16 %v3838_v21, %v3836_v19 }
 0x240   : > { %9176 = vmatpush1.bf16.msra.mxu1 %v9175_v22  ;;  %v3840_v22 = vld [vmem:[%s12620_s7 + $0x5a0] sm:$0xff] }
 0x241   : > { %9178 = vmatprep.subr.bf16.mxu1 %v9177_v26  ;;  %v3842_v26 = vld [vmem:[%s12620_s7 + $0x5b0] sm:$0xff] }
 0x242   : > { %v9215_v32 = vpack.c.bf16 %v3842_v26, %v3840_v22 }
 0x244   : > { %9180 = vmatpush1.bf16.msra.mxu1 %v9179_v34  ;;  %v3844_v34 = vld [vmem:[%s12620_s7 + $0x5c0] sm:$0xff] }
 0x245   : > { %9182 = vmatprep.subr.bf16.mxu1 %v9181_v25  ;;  %v3846_v25 = vld [vmem:[%s12620_s7 + $0x5d0] sm:$0xff] }
 0x246   : > { %v9219_v41 = vpack.c.bf16 %v3846_v25, %v3844_v34 }
 0x248   : > { %9184 = vmatpush1.bf16.msra.mxu1 %v9183_v40  ;;  %v3848_v40 = vld [vmem:[%s12620_s7 + $0x5e0] sm:$0xff] }
 0x249   : > { %9186 = vmatprep.subr.bf16.mxu1 %v9185_v42  ;;  %v3850_v42 = vld [vmem:[%s12620_s7 + $0x5f0] sm:$0xff] }
 0x24a   : > { %v9223_v44 = vpack.c.bf16 %v3850_v42, %v3848_v40 }
 0x24c   : > { %9188 = vmatpush1.bf16.msra.mxu1 %v9187_v46  ;;  %v9225_v46 = vpack.c.bf16 %v3855_v36, %v3853_v43 }
 0x24d   : > { %9190 = vmatprep.subr.bf16.mxu1 %v9189_v47  ;;  %v3852_v47 = vld [vmem:[%s12620_s7 + $0x600] sm:$0xff] }
 0x24e   : > { %v9227_v53 = vpack.c.bf16 %v3854_v48, %v3852_v47 }
 0x250   : > { %9192 = vmatpush1.bf16.msra.mxu1 %v9191_v55  ;;  %v3650_v55 = vmul.f32 %v3636_v45, %v3636_v45 }
 0x251   : > { %9194 = vmatprep.subr.bf16.mxu1 %v9193_v56  ;;  %v3643_v56 = vadd.f32 %v10928_v58, %v10966_v20  ;;  %v9231_v20 = vpack.c.bf16 %v3858_v59, %v3856_v23 }
 0x254   : > { %9196 = vmatpush1.bf16.msra.mxu1 %v9195_v1  ;;  %v3863_v1 = vld [vmem:[%s12620_s7 + $0x658] sm:$0xff] }
 0x255   : > { %9198 = vmatprep.subr.bf16.mxu1 %v9197_v30  ;;  %v3657_v30 = vmul.f32 %v3643_v56, %v3643_v56  ;;  %v9233_v60 = vpack.c.bf16 %v3863_v1, %v3861_v63  ;;  %v8004_v63 = vld [vmem:[%s12616_s3 + $0xa0] sm:$0xff] }
 0x258   : > { %9200 = vmatpush1.bf16.msra.mxu1 %v9199_v52  ;;  %v3867_v52 = vld [vmem:[%s12620_s7 + $0x678] sm:$0xff] }
 0x259   : > { %9202 = vmatprep.subr.bf16.mxu1 %v9201_v8  ;;  %v9235_v8 = vpack.c.bf16 %v3862_v4, %v3860_v2  ;;  %v9237_v9 = vpack.c.bf16 %v3867_v52, %v3865_v6  ;;  %v7970_v2 = vld [vmem:[%s12616_s3 + $0x30] sm:$0xff] }
 0x25c   : > { %9204 = vmatpush1.bf16.msra.mxu1 %v9203_v12  ;;  %v3869_v12 = vld [vmem:[%s12620_s7 + $0x688] sm:$0xff] }
 0x25d   : > { %9206 = vmatprep.subr.bf16.mxu1 %v9205_v15  ;;  %v3638_v15 = vadd.f32 %v10918_v51, %v11039_v61 }
 0x25f   : > { %v3652_v14 = vmul.f32 %v3638_v15, %v3638_v15  ;;  %v8006_v15 = vld [vmem:[%s12616_s3 + $0xb0] sm:$0xff] }
 0x260   : > { %9208 = vmatpush1.bf16.msra.mxu1 %v9207_v18 }
 0x261   : > { %9210 = vmatprep.subr.bf16.mxu1 %v9209_v3 }
 0x264   : > { %9212 = vmatpush1.bf16.msra.mxu1 %v9211_v28  ;;  %v5317_v28 = vld [vmem:[%s12617_s4 + $0x8] sm:$0xff] }
 0x265   : > { %9214 = vmatprep.subr.bf16.mxu1 %v9213_v29  ;;  %v5319_v29 = vld [vmem:[%s12617_s4 + $0x18] sm:$0xff] }
 0x268   : > { %9216 = vmatpush1.bf16.msra.mxu1 %v9215_v32 }
 0x269   : > { %9218 = vmatprep.subr.bf16.mxu1 %v9217_v33 }
 0x26c   : > { %9220 = vmatpush1.bf16.msra.mxu1 %v9219_v41 }
 0x26d   : > { %9222 = vmatprep.subr.bf16.mxu1 %v9221_v37 }
 0x270   : > { %9224 = vmatpush1.bf16.msra.mxu1 %v9223_v44 }
 0x271   : > { %9226 = vmatprep.subr.bf16.mxu1 %v9225_v46  ;;  %v7968_v46 = vld [vmem:[%s12616_s3 + $0x20] sm:$0xff] }
 0x273   : > { %4096 = vmatmul.mubr.f32.vlgmr.msra.gmra.mrb[6].mxu1 %v3650_v55 }
 0x274   : > { %4101 = vmatprep.mubr.f32.mxu1 %v3658_v62  ;;  %9228 = vmatpush1.bf16.msra.mxu1 %v9227_v53 }
 0x275   : > { %9230 = vmatprep.subr.bf16.mxu1 %v9229_v57  ;;  %v7969_v57 = vld [vmem:[%s12616_s3 + $0x28] sm:$0xff] }
 0x277   : > { %4102 = vmatmul.mubr.f32.gmra.mrb[8].mxu1 %v3657_v30 }
 0x278   : > { %9232 = vmatpush1.bf16.msra.mxu1 %v9231_v20  ;;  %4172 = vmatprep.mubr.f32.mxu1 %v9978_v0 }
 0x279   : > { %9234 = vmatprep.subr.bf16.mxu1 %v9233_v60 }
 0x27c   : > { %9236 = vmatpush1.bf16.msra.mxu1 %v9235_v8  ;;  %v8005_v8 = vld [vmem:[%s12616_s3 + $0xa8] sm:$0xff] }
 0x27d   : > { %9238 = vmatprep.subr.bf16.mxu1 %v9237_v9 }
 0x280   : > { %9240 = vmatpush1.bf16.msra.mxu1 %v9239_v50  ;;  %v7971_v50 = vld [vmem:[%s12616_s3 + $0x38] sm:$0xff] }
 0x281   : > { %4124 = vmatprep.subr.mxu1 %v3869_v12 }
 0x284   : > { %4125 = vmatpush1.msra.mxu1 %v3868_v16 }
 0x285   : > { %7966 = vmatmul.mubr.msk.f32.vlgmr.msra.gmra.mrb[6].mxu1 %vm3870_vm9, %v3652_v14 }
 0x286   : > { %4178 = vmatprep.mubr.f32.mxu1 %v9978_v0 }
 0x289   : > { %7967 = vmatmul.mubr.msk.f32.gmra.mrb[8].mxu1 %vm3870_vm9, %v3659_v17  ;;  %vm6080_vm9 = vcmask 1043456  }
 0x28a   : > { %4289 = vmatprep.mubr.f32.mxu1 %v9978_v0 }
 0x358   : > { %v11398_v51 = vpop.f32.mrb[6].mxu1 }
 0x359   : > { %v11400_v61 = vpop.f32.mrb[7].mxu1 }
 0x35a   : > { %v9844_v18 = vpack.i.bf16 %v11400_v61, %v11398_v51 }
 0x35c   : > { %9845 = vrot.lane.b32.xlu0 %v9844_v18, %s9988_s30  ;;  %9835 = vrot.lane.b32.xlu1 %v9844_v18, %s12641_s21  ;;  %v11405_v58 = vpop.f32.mrb[8].mxu1 }
 0x35d   : > { %v4182_v54 = vpop.f32.mrb[9].mxu1  ;;  %v9247_v3 = vpack.c.bf16 %v11405_v58, %v11398_v51 }
 0x35e   : > { %v9839_v19 = vpack.i.bf16 %v4182_v54, %v11405_v58  ;;  %v9245_v21 = vpack.c.bf16 %v4182_v54, %v11400_v61  ;;  %v4185_v58 = vld [vmem:[%s12616_s3] sm:$0xff] }
 0x360   : > { %9855 = vrot.lane.b32.xlu0 %v9844_v18, %s12642_s22  ;;  %9840 = vrot.lane.b32.xlu1 %v9839_v19, %s12641_s21 }
 0x364   : > { %9860 = vrot.lane.b32.xlu0 %v9844_v18, %s9989_s23  ;;  %9850 = vrot.lane.b32.xlu1 %v9839_v19, %s9988_s30 }
 0x368   : > { %9875 = vrot.lane.b32.xlu0 %v9844_v18, %s9990_s24  ;;  %9865 = vrot.lane.b32.xlu1 %v9839_v19, %s12642_s22  ;;  %s431_s22 = sand.u32 1, %s9968_s26  }
 0x369   : > { %s7805_s21 = scalar_lea.sflag [#allocation3], %s431_s22 }
 0x36c   : > { %9880 = vrot.lane.b32.xlu0 %v9844_v18, %s9991_s20  ;;  %9870 = vrot.lane.b32.xlu1 %v9839_v19, %s9989_s23 }
 0x370   : > { %9895 = vrot.lane.b32.xlu0 %v9844_v18, %s9992_s15  ;;  %9885 = vrot.lane.b32.xlu1 %v9839_v19, %s9990_s24 }
 0x374   : > { %9900 = vrot.lane.b32.xlu0 %v9844_v18, %s12643_s16  ;;  %9890 = vrot.lane.b32.xlu1 %v9839_v19, %s9991_s20  ;;  %s8241_s20 = sshll.u32 %s10087_s29, 4  ;;  %s9995_s29 = smov [#allocation2]  }
 0x375   : > { %s12571_s30 = scalar_lea.hbm %s12626_s13, %s8241_s20  ;;  %s9918_s24 = sshll.u32 %s9995_s29, 4  ;;  %s9919_s24 = int_to_ptr.vmem [resolvable:$false] %s9918_s24 }
 0x376   : > { %s9920_s2 = scalar_lea.vmem %s9919_s24, 32 }
 0x378   : > { %5322 = vperm.xlu0 %9833, %v5316_v5   ;;  %9905 = vrot.lane.b32.xlu1 %v9839_v19, %s9992_s15  ;;  %s432_s15 = scalar_lea.vmem [#allocation2], %s431_s22 }
 0x37c   : > { %5332 = vperm.xlu0 %9833, %v5318_v24   ;;  %9910 = vrot.lane.b32.xlu1 %v9839_v19, %s12643_s16  ;;  %s7817_s16 = sshll.u32 %s432_s15, 4  ;;  %s12573_s16 = int_to_ptr.vmem [resolvable:$true] %s7817_s16 }
 0x37d   : > { %s9914_s23 = scalar_lea.vmem %s12573_s16, 16  ;;  %p9921_p0 = scmp.lt.s32.totalorder %s12573_s16, %s9919_s24 }
 0x37e   : > { %p9915_p11 = scmp.ne.s32.totalorder %s12573_s16, %s9914_s23  ;;  %p9922_p1 = scmp.lt.s32.totalorder %s9920_s2, %s9914_s23 }
 0x380   : > { %5327 = vperm.xlu1 %9832, %v5317_v28   ;;  %p9916_p12 = pnand %p9915_p11, %p10104_p5  ;;  %p9923_p2 = por %p9922_p1, %p9921_p0 }
 0x382   : > { %p9917_p13 = pneg %p9916_p12 }
 0x384   : > { %5337 = vperm.xlu1 %9832, %v5319_v29   ;;  %p9924_p3 = pnand %p9923_p2, %p9917_p13 }
 0x3ce   : > { %v9846_v22 = vpop.permute.xlu0 %9845  ;;  %v9836_v26 = vpop.permute.xlu1 %9835 }
 0x3cf   : > { %v9838_v27 = vunpack.i.h.bf16 %v9836_v26  ;;  %v9837_v31 = vunpack.i.l.bf16 %v9836_v26  ;;  %v9848_v35 = vunpack.i.h.bf16 %v9846_v22  ;;  %v9847_v38 = vunpack.i.l.bf16 %v9846_v22 }
 0x3d1   : > { %v4206_v41 = vsel %vm472_vm0, %v9837_v31, %v9838_v27  ;;  %v4815_v47 = vsel %vm4814_vm10, %v9847_v38, %v9848_v35  ;;  %v8012_v31 = vld [vmem:[%s12616_s3 + $0xc0] sm:$0xff]  ;;  %v4187_v38 = vld [vmem:[%s12616_s3 + $0x10] sm:$0xff] }
 0x3d2   : > { %v11428_v32 = vpop.permute.xlu0 %9855  ;;  %v9841_v33 = vpop.permute.xlu1 %9840 }
 0x3d3   : > { %v9843_v34 = vunpack.i.h.bf16 %v9841_v33  ;;  %v9842_v25 = vunpack.i.l.bf16 %v9841_v33  ;;  %v9858_v55 = vunpack.i.h.bf16 %v11428_v32  ;;  %v9857_v12 = vunpack.i.l.bf16 %v11428_v32 }
 0x3d5   : > { %v9241_v37 = vpack.c.bf16 %v9843_v34, %v9838_v27  ;;  %v4207_v40 = vsel %vm472_vm0, %v9842_v25, %v9843_v34  ;;  %v4428_v54 = vsel %vm1128_vm2, %v9857_v12, %v9858_v55  ;;  %v4186_v27 = vld [vmem:[%s12616_s3 + $0x8] sm:$0xff]  ;;  %vm5366_vm0 = vcmask 326656  }
 0x3d6   : > { %v9243_v42 = vpack.c.bf16 %v4207_v40, %v4206_v41  ;;  %v9861_v43 = vpop.permute.xlu0 %9860  ;;  %v9851_v36 = vpop.permute.xlu1 %9850  ;;  %v8029_v12 = vld [vmem:[%s12616_s3 + $0x108] sm:$0xff]  ;;  %vm11653_vm1 = vmpackc.low %vm5366_vm0, %vm5366_vm0 }
 0x3d7   : > { %v9853_v44 = vunpack.i.h.bf16 %v9851_v36  ;;  %v9852_v45 = vunpack.i.l.bf16 %v9851_v36  ;;  %9242 = vmatprep.subr.bf16.mxu1 %v9241_v37  ;;  %v9863_v23 = vunpack.i.h.bf16 %v9861_v43  ;;  %v9862_v59 = vunpack.i.l.bf16 %v9861_v43  ;;  %v8013_v37 = vld [vmem:[%s12616_s3 + $0xc8] sm:$0xff]  ;;  %v8014_v36 = vld [vmem:[%s12616_s3 + $0xd0] sm:$0xff] }
 0x3d8   : > { %9244 = vmatpush1.bf16.msra.mxu1 %v9243_v42  ;;  %v4188_v42 = vld [vmem:[%s12616_s3 + $0x18] sm:$0xff] }
 0x3d9   : > { %v9261_v48 = vpack.c.bf16 %v9853_v44, %v9848_v35  ;;  %v4816_v39 = vsel %vm4814_vm10, %v9852_v45, %v9853_v44  ;;  %9246 = vmatprep.subr.bf16.mxu1 %v9245_v21  ;;  %v4944_v4 = vsel %vm4943_vm12, %v9862_v59, %v9863_v23  ;;  %v8007_v21 = vld [vmem:[%s12616_s3 + $0xb8] sm:$0xff]  ;;  %vm6393_vm10 = vcmask 523264  }
 0x3da   : > { %v9263_v49 = vpack.c.bf16 %v4816_v39, %v4815_v47  ;;  %v11435_v13 = vpop.permute.xlu0 %9875  ;;  %v9866_v53 = vpop.permute.xlu1 %9865  ;;  %v7980_v47 = vld [vmem:[%s12616_s3 + $0x40] sm:$0xff] }
 0x3db   : > { %v9868_v56 = vunpack.i.h.bf16 %v9866_v53  ;;  %7972 = vmatmul.mubr.msk.f32.vlgmr.msra.gmra.mrb[10].mxu1 %vm4212_vm11, %v7968_v46  ;;  %9262 = vmatprep.subr.bf16.mxu0 %v9261_v48  ;;  %v9867_v11 = vunpack.i.l.bf16 %v9866_v53  ;;  %v9877_v43 = vunpack.i.l.bf16 %v11435_v13 }
 0x3dc   : > { %9248 = vmatpush1.bf16.msra.mxu1 %v9247_v3  ;;  %9264 = vmatpush1.bf16.msra.mxu0 %v9263_v49  ;;  %v9878_v3 = vunpack.i.h.bf16 %v11435_v13  ;;  %v8015_v49 = vld [vmem:[%s12616_s3 + $0xd8] sm:$0xff] }
 0x3dd   : > { %v9249_v62 = vpack.c.bf16 %v9868_v56, %v9858_v55  ;;  %4295 = vmatprep.mubr.f32.mxu1 %v9978_v0  ;;  %v4429_v14 = vsel %vm1128_vm2, %v9867_v11, %v9868_v56  ;;  %v8028_v11 = vld [vmem:[%s12616_s3 + $0x100] sm:$0xff]  ;;  %vm9994_vm2 = vmmov 0  }
 0x3de   : > { %v9871_v1 = vpop.permute.xlu1 %9870  ;;  %v9881_v60 = vpop.permute.xlu0 %9880  ;;  %v9251_v5 = vpack.c.bf16 %v4429_v14, %v4428_v54  ;;  %v4557_v48 = vsel %vm4556_vm14, %v9877_v43, %v9878_v3  ;;  %v8031_v14 = vld [vmem:[%s12616_s3 + $0x118] sm:$0xff]  ;;  %v9993_v54 = vmov 0.0|0.0  }
 0x3df   : > { %v9873_v20 = vunpack.i.h.bf16 %v9871_v1  ;;  %v9872_v30 = vunpack.i.l.bf16 %v9871_v1  ;;  %7973 = vmatmul.mubr.msk.f32.gmra.mrb[12].mxu1 %vm4212_vm11, %v7969_v57  ;;  %9250 = vmatprep.subr.bf16.mxu1 %v9249_v62  ;;  %v9883_v17 = vunpack.i.h.bf16 %v9881_v60  ;;  %v9882_v24 = vunpack.i.l.bf16 %v9881_v60  ;;  %v7981_v57 = vld [vmem:[%s12616_s3 + $0x48] sm:$0xff] }
 0x3e0   : > { %8008 = vmatmul.mubr.msk.f32.vlgmr.msra.gmra.mrb[8].mxu0 %vm4212_vm11, %v8004_v63  ;;  %4301 = vmatprep.mubr.f32.mxu1 %v9978_v0  ;;  %v7982_v63 = vld [vmem:[%s12616_s3 + $0x50] sm:$0xff]  ;;  %v8021_v1 = vld [vmem:[%s12616_s3 + $0xe8] sm:$0xff] }
 0x3e1   : > { %v9265_v6 = vpack.c.bf16 %v9873_v20, %v9863_v23  ;;  %v4945_v52 = vsel %vm4943_vm12, %v9872_v30, %v9873_v20  ;;  %4903 = vmatprep.mubr.f32.mxu0 %v9978_v0  ;;  %v5073_v32 = vsel %vm5072_vm13, %v9882_v24, %v9883_v17  ;;  %v8020_v23 = vld [vmem:[%s12616_s3 + $0xe0] sm:$0xff]  ;;  %v7983_v30 = vld [vmem:[%s12616_s3 + $0x58] sm:$0xff] }
 0x3e2   : > { %v9267_v9 = vpack.c.bf16 %v4945_v52, %v4944_v4  ;;  %v11456_v10 = vpop.permute.xlu1 %9885  ;;  %v11469_v16 = vpop.permute.xlu0 %9895 }
 0x3e3   : > { %7974 = vmatmul.mubr.msk.f32.gmra.mrb[14].mxu1 %vm4212_vm11, %v7970_v2  ;;  %9266 = vmatprep.subr.bf16.mxu0 %v9265_v6  ;;  %v9888_v51 = vunpack.i.h.bf16 %v11456_v10  ;;  %v9887_v40 = vunpack.i.l.bf16 %v11456_v10  ;;  %v9898_v39 = vunpack.i.h.bf16 %v11469_v16  ;;  %v9897_v60 = vunpack.i.l.bf16 %v11469_v16  ;;  %v8022_v2 = vld [vmem:[%s12616_s3 + $0xf0] sm:$0xff]  ;;  %v7988_v6 = vld [vmem:[%s12616_s3 + $0x60] sm:$0xff]  ;;  %v7989_v10 = vld [vmem:[%s12616_s3 + $0x68] sm:$0xff] }
 0x3e4   : > { %8009 = vmatmul.mubr.msk.f32.gmra.mrb[10].mxu0 %vm4212_vm11, %v8005_v8  ;;  %4307 = vmatprep.mubr.f32.mxu1 %v9978_v0  ;;  %v8023_v8 = vld [vmem:[%s12616_s3 + $0xf8] sm:$0xff]  ;;  %v8030_v16 = vld [vmem:[%s12616_s3 + $0x110] sm:$0xff] }
 0x3e5   : > { %9268 = vmatpush1.bf16.msra.mxu0 %v9267_v9  ;;  %4909 = vmatprep.mubr.f32.mxu0 %v9978_v0  ;;  %v9253_v29 = vpack.c.bf16 %v9888_v51, %v9878_v3  ;;  %v4558_v44 = vsel %vm4556_vm14, %v9887_v40, %v9888_v51  ;;  %v4686_v52 = vsel %vm4685_vm15, %v9897_v60, %v9898_v39  ;;  %v7998_v51 = vld [vmem:[%s12616_s3 + $0x90] sm:$0xff]  ;;  %v5485_v3 = vld [vmem:[%s12618_s5 + $0x8] sm:$0xff] }
 0x3e6   : > { %v9891_v7 = vpop.permute.xlu1 %9890  ;;  %v9901_v22 = vpop.permute.xlu0 %9900  ;;  %v9255_v13 = vpack.c.bf16 %v4558_v44, %v4557_v48 }
 0x3e7   : > { %v9893_v61 = vunpack.i.h.bf16 %v9891_v7  ;;  %7975 = vmatmul.mubr.msk.f32.gmra.mrb[16].mxu1 %vm4212_vm11, %v7971_v50  ;;  %v9892_v18 = vunpack.i.l.bf16 %v9891_v7  ;;  %v9903_v34 = vunpack.i.h.bf16 %v9901_v22  ;;  %v9902_v53 = vunpack.i.l.bf16 %v9901_v22  ;;  %v7990_v50 = vld [vmem:[%s12616_s3 + $0x70] sm:$0xff]  ;;  %v7996_v7 = vld [vmem:[%s12616_s3 + $0x80] sm:$0xff] }
 0x3e8   : > { %8010 = vmatmul.mubr.msk.f32.gmra.mrb[12].mxu0 %vm4212_vm11, %v8006_v15  ;;  %4390 = vmatprep.mubr.f32.mxu1 %v9978_v0  ;;  %v7991_v15 = vld [vmem:[%s12616_s3 + $0x78] sm:$0xff] }
 0x3e9   : > { %v9269_v19 = vpack.c.bf16 %v9893_v61, %v9883_v17  ;;  %4915 = vmatprep.mubr.f32.mxu0 %v9978_v0  ;;  %v5074_v26 = vsel %vm5072_vm13, %v9892_v18, %v9893_v61  ;;  %v5201_v59 = vsel %vm1485_vm3, %v9902_v53, %v9903_v34  ;;  %v7997_v17 = vld [vmem:[%s12616_s3 + $0x88] sm:$0xff]  ;;  %v7999_v61 = vld [vmem:[%s12616_s3 + $0x98] sm:$0xff] }
 0x3ea   : > { %v11485_v28 = vpop.permute.xlu1 %9905  ;;  %v9271_v25 = vpack.c.bf16 %v5074_v26, %v5073_v32  ;;  %v5357_v18 = vld [vmem:[%s12621_s8 + $0x8] sm:$0xff] }
 0x3eb   : > { %7976 = vmatmul.mubr.msk.f32.vlgmr.msra.gmra.mrb[10].mxu1 %vm4212_vm11, %v4185_v58  ;;  %9270 = vmatprep.subr.bf16.mxu0 %v9269_v19  ;;  %v9908_v45 = vunpack.i.h.bf16 %v11485_v28  ;;  %v9907_v20 = vunpack.i.l.bf16 %v11485_v28  ;;  %v5484_v58 = vld [vmem:[%s12618_s5] sm:$0xff]  ;;  %v5486_v19 = vld [vmem:[%s12618_s5 + $0x10] sm:$0xff] }
 0x3ec   : > { %9252 = vmatpush1.bf16.msra.mxu1 %v9251_v5  ;;  %8011 = vmatmul.mubr.msk.f32.gmra.mrb[14].mxu0 %vm4212_vm11, %v8007_v21  ;;  %v5487_v21 = vld [vmem:[%s12618_s5 + $0x18] sm:$0xff]  ;;  %v9294_v5 = vpack.c.bf16 %v5485_v3, %v5484_v58  ;;  %v5360_v58 = vld [vmem:[%s12621_s8 + $0x20] sm:$0xff] }
 0x3ed   : > { %9254 = vmatprep.subr.bf16.mxu1 %v9253_v29  ;;  %4396 = vmatprep.mubr.f32.mxu1 %v9978_v0  ;;  %v9257_v55 = vpack.c.bf16 %v9908_v45, %v9898_v39  ;;  %v4687_v4 = vsel %vm4685_vm15, %v9907_v20, %v9908_v45  ;;  %v9297_v24 = vpack.c.bf16 %v5487_v21, %v5486_v19  ;;  %v5363_v3 = vld [vmem:[%s12621_s8 + $0x38] sm:$0xff]  ;;  %v5362_v19 = vld [vmem:[%s12621_s8 + $0x30] sm:$0xff]  ;;  %v5365_v21 = vld [vmem:[%s12621_s8 + $0x48] sm:$0xff] }
 0x3ee   : > { %v9911_v33 = vpop.permute.xlu1 %9910  ;;  %5026 = vmatprep.mubr.f32.mxu0 %v9978_v0  ;;  %v9259_v9 = vpack.c.bf16 %v4687_v4, %v4686_v52 }
 0x3ef   : > { %v9913_v35 = vunpack.i.h.bf16 %v9911_v33  ;;  %7977 = vmatmul.mubr.msk.f32.gmra.mrb[12].mxu1 %vm4212_vm11, %v4186_v27  ;;  %v9912_v46 = vunpack.i.l.bf16 %v9911_v33 }
 0x3f0   : > { %8016 = vmatmul.mubr.msk.f32.vlgmr.msra.gmra.mrb[8].mxu0 %vm4212_vm11, %v8012_v31  ;;  %4402 = vmatprep.mubr.f32.mxu1 %v9978_v0 }
 0x3f1   : > { %v9273_v41 = vpack.c.bf16 %v9913_v35, %v9903_v34  ;;  %9272 = vmatpush1.bf16.msra.mxu0 %v9271_v25  ;;  %5032 = vmatprep.mubr.f32.mxu0 %v9978_v0  ;;  %v5202_v56 = vsel %vm1485_vm3, %v9912_v46, %v9913_v35  ;;  %vm5505_vm3 = vcmask 261120  }
 0x3f2   : > { %v9275_v62 = vpack.c.bf16 %v5202_v56, %v5201_v59 }
 0x3f3   : > { %7978 = vmatmul.mubr.msk.f32.gmra.mrb[14].mxu1 %vm4212_vm11, %v4187_v38  ;;  %9274 = vmatprep.subr.bf16.mxu0 %v9273_v41 }
 0x3f4   : > { %8017 = vmatmul.mubr.msk.f32.gmra.mrb[10].mxu0 %vm4212_vm11, %v8013_v37  ;;  %4408 = vmatprep.mubr.f32.mxu1 %v9978_v0 }
 0x3f5   : > { %5038 = vmatprep.mubr.f32.mxu0 %v9978_v0 }
 0x3f7   : > { %7979 = vmatmul.mubr.msk.f32.gmra.mrb[16].mxu1 %vm4212_vm11, %v4188_v42  ;;  %v5323_v41 = vpop.permute.xlu0 %5322 }
 0x3f8   : > { %8018 = vmatmul.mubr.msk.f32.gmra.mrb[12].mxu0 %vm4212_vm11, %v8014_v36  ;;  %4510 = vmatprep.mubr.f32.mxu1 %v9978_v0 }
 0x3f9   : > { %5044 = vmatprep.mubr.f32.mxu0 %v9978_v0 }
 0x3fb   : > { %7984 = vmatmul.mubr.msk.f32.vlgmr.msra.gmra.mrb[10].mxu1 %vm4212_vm11, %v7980_v47 }
 0x3fc   : > { %9256 = vmatpush1.bf16.msra.mxu1 %v9255_v13  ;;  %8019 = vmatmul.mubr.msk.f32.gmra.mrb[14].mxu0 %vm4212_vm11, %v8015_v49 }
 0x3fd   : > { %9258 = vmatprep.subr.bf16.mxu1 %v9257_v55  ;;  %4516 = vmatprep.mubr.f32.mxu1 %v9978_v0 }
 0x3fe   : > { %5155 = vmatprep.mubr.f32.mxu0 %v9978_v0 }
 0x3ff   : > { %7985 = vmatmul.mubr.msk.f32.gmra.mrb[12].mxu1 %vm4212_vm11, %v7981_v57  ;;  %v5328_v36 = vpop.permute.xlu1 %5327 }
 0x400   : > { %8024 = vmatmul.mubr.msk.f32.vlgmr.msra.gmra.mrb[8].mxu0 %vm4212_vm11, %v8020_v23  ;;  %4522 = vmatprep.mubr.f32.mxu1 %v9978_v0 }
 0x401   : > { %9276 = vmatpush1.bf16.msra.mxu0 %v9275_v62  ;;  %5161 = vmatprep.mubr.f32.mxu0 %v9978_v0  ;;  %v5333_v62 = vpop.permute.xlu0 %5332 }
 0x402   : > { %9293 = vmatprep.subr.bf16.mxu0 %v9993_v54 }
 0x403   : > { %7986 = vmatmul.mubr.msk.f32.gmra.mrb[14].mxu1 %vm4212_vm11, %v7982_v63 }
 0x404   : > { %8025 = vmatmul.mubr.msk.f32.gmra.mrb[10].mxu0 %vm4212_vm11, %v8021_v1  ;;  %4528 = vmatprep.mubr.f32.mxu1 %v9978_v0 }
 0x405   : > { %5167 = vmatprep.mubr.f32.mxu0 %v9978_v0 }
 0x407   : > { %7987 = vmatmul.mubr.msk.f32.gmra.mrb[16].mxu1 %vm4212_vm11, %v7983_v30 }
 0x408   : > { %8026 = vmatmul.mubr.msk.f32.gmra.mrb[12].mxu0 %vm4212_vm11, %v8022_v2  ;;  %4639 = vmatprep.mubr.f32.mxu1 %v9978_v0  ;;  %v5338_v2 = vpop.permute.xlu1 %5337 }
 0x409   : > { %5173 = vmatprep.mubr.f32.mxu0 %v9978_v0 }
 0x40b   : > { %7992 = vmatmul.mubr.msk.f32.vlgmr.msra.gmra.mrb[10].mxu1 %vm4212_vm11, %v7988_v6 }
 0x40c   : > { %9260 = vmatpush1.bf16.msra.mxu1 %v9259_v9  ;;  %8027 = vmatmul.mubr.msk.f32.gmra.mrb[14].mxu0 %vm4212_vm11, %v8023_v8 }
 0x40d   : > { %4645 = vmatprep.mubr.f32.mxu1 %v9978_v0  ;;  %5283 = vmatprep.mubr.f32.mxu0 %v9978_v0 }
 0x40f   : > { %7993 = vmatmul.mubr.msk.f32.gmra.mrb[12].mxu1 %vm4212_vm11, %v7989_v10 }
 0x410   : > { %8032 = vmatmul.mubr.msk.f32.vlgmr.msra.gmra.mrb[8].mxu0 %vm4212_vm11, %v8028_v11  ;;  %4651 = vmatprep.mubr.f32.mxu1 %v9978_v0 }
 0x411   : > { %5289 = vmatprep.mubr.f32.mxu0 %v9978_v0  ;;  %9295 = vmatpush3.bf16.msra.mxu0 %v9294_v5  ;;  %v5364_v5 = vld [vmem:[%s12621_s8 + $0x40] sm:$0xff] }
 0x412   : > { %9296 = vmatprep.subr.bf16.mxu0 %v9993_v54 }
 0x413   : > { %7994 = vmatmul.mubr.msk.f32.gmra.mrb[14].mxu1 %vm4212_vm11, %v7990_v50 }
 0x414   : > { %8033 = vmatmul.mubr.msk.f32.gmra.mrb[10].mxu0 %vm4212_vm11, %v8029_v12  ;;  %4657 = vmatprep.mubr.f32.mxu1 %v9978_v0 }
 0x415   : > { %5295 = vmatprep.mubr.f32.mxu0 %v9978_v0  ;;  %9298 = vmatpush3.bf16.msra.mxu0 %v9297_v24  ;;  %v8047_v24 = vld [vmem:[%s12618_s5 + $0x30] sm:$0xff] }
 0x416   : > { %9305 = vmatprep.subr.bf16.mxu0 %v9993_v54 }
 0x417   : > { %7995 = vmatmul.mubr.msk.f32.gmra.mrb[16].mxu1 %vm4212_vm11, %v7991_v15 }
 0x418   : > { %8034 = vmatmul.mubr.msk.f32.gmra.mrb[12].mxu0 %vm4212_vm11, %v8030_v16  ;;  %4768 = vmatprep.mubr.f32.mxu1 %v9978_v0  ;;  %v8045_v16 = vld [vmem:[%s12618_s5 + $0x20] sm:$0xff] }
 0x419   : > { %5301 = vmatprep.mubr.f32.mxu0 %v9978_v0 }
 0x41b   : > { %8000 = vmatmul.mubr.msk.f32.vlgmr.msra.gmra.mrb[10].mxu1 %vm4212_vm11, %v7996_v7  ;;  %v8046_v7 = vld [vmem:[%s12618_s5 + $0x28] sm:$0xff] }
 0x41c   : > { %8035 = vmatmul.mubr.msk.f32.gmra.mrb[14].mxu0 %vm4212_vm11, %v8031_v14  ;;  %4774 = vmatprep.mubr.f32.mxu1 %v9978_v0  ;;  %v5356_v14 = vld [vmem:[%s12621_s8] sm:$0xff] }
 0x41d   : > { %8566 = vmatprep.mubr.msk.f32.mxu0 %vm9994_vm2, %v9978_v0 }
 0x41f   : > { %8001 = vmatmul.mubr.msk.f32.gmra.mrb[12].mxu1 %vm4212_vm11, %v7997_v17  ;;  %v9288_v17 = vpack.c.bf16 %v8046_v7, %v8045_v16 }
 0x420   : > { %4780 = vmatprep.mubr.f32.mxu1 %v9978_v0 }
 0x423   : > { %8002 = vmatmul.mubr.msk.f32.gmra.mrb[14].mxu1 %vm4212_vm11, %v7998_v51  ;;  %v5359_v51 = vld [vmem:[%s12621_s8 + $0x18] sm:$0xff] }
 0x424   : > { %4786 = vmatprep.mubr.f32.mxu1 %v9978_v0 }
 0x427   : > { %8003 = vmatmul.mubr.msk.f32.gmra.mrb[16].mxu1 %vm4212_vm11, %v7999_v61  ;;  %v5358_v61 = vld [vmem:[%s12621_s8 + $0x10] sm:$0xff]  ;;  %vm7802_vm11 = vcmask 49152  }
 0x428   : > { %8040 = vmatprep.mubr.msk.f32.mxu1 %vm5366_vm0, %v5357_v18  ;;  %v5361_v18 = vld [vmem:[%s12621_s8 + $0x28] sm:$0xff] }
 0x4e3   : > { %v5285_v28 = vpop.f32.mrb[8].mxu0 }
 0x4e4   : > { %v5287_v29 = vpop.f32.mrb[9].mxu0 }
 0x4e7   : > { %v5291_v22 = vpop.f32.mrb[10].mxu0 }
 0x4e8   : > { %v5293_v26 = vpop.f32.mrb[11].mxu0 }
 0x4eb   : > { %v5297_v27 = vpop.f32.mrb[12].mxu0 }
 0x4ec   : > { %v5299_v31 = vpop.f32.mrb[13].mxu0 }
 0x4ee   : > { %v4770_v32 = vpop.f32.mrb[10].mxu1 }
 0x4ef   : > { %v9557_v33 = vadd.f32 %v5285_v28, %v4770_v32  ;;  %v5303_v34 = vpop.f32.mrb[14].mxu0  ;;  %v4772_v25 = vpop.f32.mrb[11].mxu1  ;;  %v8048_v28 = vld [vmem:[%s12618_s5 + $0x38] sm:$0xff] }
 0x4f0   : > { %v9558_v35 = vadd.f32 %v5287_v29, %v4772_v25  ;;  %v5305_v38 = vpop.f32.mrb[15].mxu0  ;;  %v9291_v29 = vpack.c.bf16 %v8048_v28, %v8047_v24  ;;  %v8065_v32 = vld [vmem:[%s12618_s5 + $0x78] sm:$0xff]  ;;  %v8069_v28 = vld [vmem:[%s12618_s5 + $0x80] sm:$0xff] }
 0x4f1   : > { %v5340_v40 = vadd.f32 %v9557_v33, %v5323_v41 }
 0x4f2   : > { %v4776_v37 = vpop.f32.mrb[12].mxu1  ;;  %v5341_v44 = vadd.f32 %v9558_v35, %v5323_v41  ;;  %v8055_v35 = vld [vmem:[%s12618_s5 + $0x40] sm:$0xff]  ;;  %v11736_v41 = vld [vmem:[%s12618_s5 + $0x50] sm:$0xff] }
 0x4f3   : > { %v9559_v42 = vadd.f32 %v5291_v22, %v4776_v37  ;;  %v4778_v43 = vpop.f32.mrb[13].mxu1  ;;  %v5348_v39 = vmul.f32 %v5340_v40, %v5340_v40  ;;  %v8062_v22 = vld [vmem:[%s12618_s5 + $0x60] sm:$0xff]  ;;  %v8058_v37 = vld [vmem:[%s12618_s5 + $0x58] sm:$0xff] }
 0x4f4   : > { %v9560_v45 = vadd.f32 %v5293_v26, %v4778_v43  ;;  %v5349_v55 = vmul.f32 %v5341_v44, %v5341_v44  ;;  %v8063_v26 = vld [vmem:[%s12618_s5 + $0x68] sm:$0xff] }
 0x4f5   : > { %v5342_v46 = vadd.f32 %v9559_v42, %v5328_v36 }
 0x4f6   : > { %v5343_v47 = vadd.f32 %v9560_v45, %v5328_v36  ;;  %v4782_v48 = vpop.f32.mrb[14].mxu1  ;;  %v8076_v45 = vld [vmem:[%s12618_s5 + $0xa0] sm:$0xff] }
 0x4f7   : > { %v5350_v49 = vmul.f32 %v5342_v46, %v5342_v46  ;;  %v9561_v13 = vadd.f32 %v5297_v27, %v4782_v48  ;;  %v4784_v53 = vpop.f32.mrb[15].mxu1  ;;  %v9306_v27 = vpack.c.bf16 %v8063_v26, %v8062_v22 }
 0x4f8   : > { %v5351_v56 = vmul.f32 %v5343_v47, %v5343_v47  ;;  %v9562_v57 = vadd.f32 %v5299_v31, %v4784_v53  ;;  %v8064_v31 = vld [vmem:[%s12618_s5 + $0x70] sm:$0xff] }
 0x4f9   : > { %v9280_v23 = vpack.c.bf16 %v5350_v49, %v5348_v39  ;;  %v5344_v20 = vadd.f32 %v9561_v13, %v5333_v62  ;;  %v9309_v25 = vpack.c.bf16 %v8065_v32, %v8064_v31  ;;  %v8077_v39 = vld [vmem:[%s12618_s5 + $0xa8] sm:$0xff] }
 0x4fa   : > { %v9277_v63 = vpack.c.bf16 %v5351_v56, %v5349_v55  ;;  %v4788_v1 = vpop.f32.mrb[16].mxu1  ;;  %v5345_v4 = vadd.f32 %v9562_v57, %v5333_v62  ;;  %v9303_v62 = vpack.c.bf16 %v8058_v37, %v11736_v41  ;;  %v8071_v41 = vld [vmem:[%s12618_s5 + $0x90] sm:$0xff]  ;;  %v8072_v37 = vld [vmem:[%s12618_s5 + $0x98] sm:$0xff] }
 0x4fb   : > { %v9563_v30 = vadd.f32 %v5303_v34, %v4788_v1  ;;  %v4790_v60 = vpop.f32.mrb[17].mxu1  ;;  %v5352_v9 = vmul.f32 %v5344_v20, %v5344_v20 }
 0x4fc   : > { %v9564_v6 = vadd.f32 %v5305_v38, %v4790_v60  ;;  %9279 = vmatprep.subr.msk.bf16.mxu1 %vm11653_vm1, %v9277_v63  ;;  %v5353_v11 = vmul.f32 %v5345_v4, %v5345_v4  ;;  %v8056_v38 = vld [vmem:[%s12618_s5 + $0x48] sm:$0xff]  ;;  %v9318_v63 = vpack.c.bf16 %v8077_v39, %v8076_v45  ;;  %v8093_v39 = vld [vmem:[%s12618_s5 + $0xf8] sm:$0xff] }
 0x4fd   : > { %v5346_v52 = vadd.f32 %v9563_v30, %v5338_v2  ;;  %9281 = vmatpush1.bf16.xpose.msra.mxu1 %v9280_v23  ;;  %v9300_v53 = vpack.c.bf16 %v8056_v38, %v8055_v35  ;;  %v8091_v45 = vld [vmem:[%s12618_s5 + $0xe8] sm:$0xff] }
 0x4fe   : > { %v5347_v8 = vadd.f32 %v9564_v6, %v5338_v2 }
 0x4ff   : > { %v5354_v10 = vmul.f32 %v5346_v52, %v5346_v52 }
 0x500   : > { %v5355_v50 = vmul.f32 %v5347_v8, %v5347_v8 }
 0x501   : > { %v9285_v12 = vpack.c.bf16 %v5354_v10, %v5352_v9 }
 0x502   : > { %v9282_v15 = vpack.c.bf16 %v5355_v50, %v5353_v11  ;;  %v8078_v11 = vld [vmem:[%s12618_s5 + $0xb0] sm:$0xff]  ;;  %v8079_v50 = vld [vmem:[%s12618_s5 + $0xb8] sm:$0xff] }
 0x504   : > { %9284 = vmatprep.subr.msk.bf16.mxu1 %vm11653_vm1, %v9282_v15 }
 0x505   : > { %9286 = vmatpush1.bf16.xpose.msra.mxu1 %v9285_v12 }
 0x506   : > { %9287 = vmatprep.subr.bf16.mxu1 %v9993_v54 }
 0x50c   : > { %5459 = vmatmul.mubr.f32.vlgmr.msra.gmra.mrb[18].mxu1 %v5356_v14 }
 0x50d   : > { %8041 = vmatprep.mubr.msk.f32.mxu1 %vm5366_vm0, %v5359_v51  ;;  %9289 = vmatpush3.bf16.msra.mxu1 %v9288_v17 }
 0x50e   : > { %9290 = vmatprep.subr.bf16.mxu1 %v9993_v54 }
 0x510   : > { %5464 = vmatmul.mubr.f32.gmra.mrb[20].mxu1 %v5358_v61 }
 0x511   : > { %8042 = vmatprep.mubr.msk.f32.mxu1 %vm5366_vm0, %v5361_v18  ;;  %9292 = vmatpush3.bf16.msra.mxu1 %v9291_v29  ;;  %v8070_v29 = vld [vmem:[%s12618_s5 + $0x88] sm:$0xff] }
 0x512   : > { %9299 = vmatprep.subr.bf16.mxu1 %v9993_v54  ;;  %v9312_v38 = vpack.c.bf16 %v8070_v29, %v8069_v28 }
 0x514   : > { %5469 = vmatmul.mubr.f32.gmra.mrb[22].mxu1 %v5360_v58 }
 0x515   : > { %8043 = vmatprep.mubr.msk.f32.mxu1 %vm5366_vm0, %v5363_v3  ;;  %v9321_v3 = vpack.c.bf16 %v8079_v50, %v8078_v11  ;;  %v6391_v11 = vld [vmem:[%s12622_s9 + $0x30] sm:$0xff]  ;;  %v6392_v50 = vld [vmem:[%s12622_s9 + $0x38] sm:$0xff] }
 0x518   : > { %5474 = vmatmul.mubr.f32.gmra.mrb[24].mxu1 %v5362_v19 }
 0x519   : > { %8044 = vmatprep.mubr.msk.f32.mxu1 %vm5366_vm0, %v5365_v21 }
 0x51c   : > { %5479 = vmatmul.mubr.f32.gmra.mrb[26].mxu1 %v5364_v5 }
 0x51d   : > { %8549 = vmatprep.mubr.msk.f32.mxu1 %vm9994_vm2, %v9978_v0 }
 0x5df   : > { %v5460_v33 = vpop.f32.mrb[18].mxu1 }
 0x5e0   : > { %8567 = vmatmul.mubr.msk.f32.vlgmr.msra.gmra.mrb[16].mxu0 %vm5505_vm3, %v5460_v33  ;;  %v5462_v34 = vpop.f32.mrb[19].mxu1  ;;  %v5498_v40 = vrot.slane %v5460_v33, 1  ;;  %v5684_v42 = vrot.slane %v5460_v33, 2  ;;  %v5786_v43 = vrot.slane %v5460_v33, 6  ;;  %v5888_v36 = vrot.slane %v5460_v33, 7 }
 0x5e1   : > { %8569 = vmatprep.mubr.msk.f32.mxu0 %vm9994_vm2, %v9978_v0  ;;  %9307 = vmatpush3.bf16.msra.mxu0 %v9306_v27 }
 0x5e2   : > { %9308 = vmatprep.subr.bf16.mxu0 %v9993_v54 }
 0x5e3   : > { %v11741_v44 = vpop.f32.mrb[20].mxu1 }
 0x5e4   : > { %8570 = vmatmul.mubr.msk.f32.gmra.mrb[18].mxu0 %vm5505_vm3, %v11741_v44  ;;  %v5467_v46 = vpop.f32.mrb[21].mxu1  ;;  %v5499_v47 = vrot.slane %v11741_v44, 1  ;;  %v5787_v48 = vrot.slane %v11741_v44, 6  ;;  %v5685_v49 = vrot.slane %v11741_v44, 2  ;;  %v5889_v13 = vrot.slane %v11741_v44, 7 }
 0x5e5   : > { %8572 = vmatprep.mubr.msk.f32.mxu0 %vm9994_vm2, %v9978_v0  ;;  %9310 = vmatpush3.bf16.msra.mxu0 %v9309_v25  ;;  %v6183_v4 = vrot.slane %v11741_v44, 5  ;;  %v6081_v52 = vrot.slane %v11741_v44, 4  ;;  %v9315_v46 = vpack.c.bf16 %v8072_v37, %v8071_v41 }
 0x5e6   : > { %v5500_v55 = vsel %vm5497_vm4, %v5498_v40, %v5499_v47  ;;  %v5788_v56 = vsel %vm5785_vm5, %v5786_v43, %v5787_v48  ;;  %9317 = vmatprep.subr.bf16.mxu0 %v9993_v54  ;;  %v11761_v57 = vsel %vm5683_vm6, %v5684_v42, %v5685_v49  ;;  %v11764_v23 = vsel %vm5887_vm7, %v5888_v36, %v5889_v13  ;;  %v8090_v36 = vld [vmem:[%s12618_s5 + $0xe0] sm:$0xff] }
 0x5e7   : > { %v11766_v59 = vpop.f32.mrb[22].mxu1  ;;  %8550 = vmatmul.mubr.msk.f32.vlgmr.msra.gmra.mrb[28].mxu1 %vm5505_vm3, %v5500_v55  ;;  %v8085_v55 = vld [vmem:[%s12618_s5 + $0xd0] sm:$0xff] }
 0x5e8   : > { %8573 = vmatmul.mubr.msk.f32.gmra.mrb[20].mxu0 %vm5505_vm3, %v11766_v59  ;;  %v5472_v1 = vpop.f32.mrb[23].mxu1  ;;  %8552 = vmatprep.mubr.msk.f32.mxu1 %vm9994_vm2, %v9978_v0  ;;  %v5501_v20 = vrot.slane %v11766_v59, 1  ;;  %v5789_v30 = vrot.slane %v11766_v59, 6  ;;  %v5687_v60 = vrot.slane %v11766_v59, 2  ;;  %v5891_v2 = vrot.slane %v11766_v59, 7 }
 0x5e9   : > { %8600 = vmatprep.mubr.msk.f32.mxu0 %vm9994_vm2, %v9978_v0  ;;  %9301 = vmatpush3.bf16.msra.mxu1 %v9300_v53  ;;  %v6184_v6 = vrot.slane %v11766_v59, 5  ;;  %v6082_v8 = vrot.slane %v11766_v59, 4  ;;  %v8084_v53 = vld [vmem:[%s12618_s5 + $0xc8] sm:$0xff]  ;;  %v8100_v1 = vld [vmem:[%s12618_s5 + $0x118] sm:$0xff] }
 0x5ea   : > { %v5502_v9 = vsel %vm5497_vm4, %v5499_v47, %v5501_v20  ;;  %9302 = vmatprep.subr.bf16.mxu1 %v9993_v54  ;;  %v11787_v10 = vsel %vm5785_vm5, %v5787_v48, %v5789_v30  ;;  %v5688_v12 = vsel %vm5683_vm6, %v5685_v49, %v5687_v60  ;;  %v11797_v15 = vsel %vm5887_vm7, %v5889_v13, %v5891_v2  ;;  %v8092_v48 = vld [vmem:[%s12618_s5 + $0xf0] sm:$0xff]  ;;  %v8083_v13 = vld [vmem:[%s12618_s5 + $0xc0] sm:$0xff] }
 0x5eb   : > { %v11799_v16 = vpop.f32.mrb[24].mxu1  ;;  %8553 = vmatmul.mubr.msk.f32.gmra.mrb[30].mxu1 %vm5505_vm3, %v5502_v9  ;;  %v11803_v7 = vsel %vm6182_vm8, %v6183_v4, %v6184_v6  ;;  %v11806_v14 = vsel %vm6080_vm9, %v6081_v52, %v6082_v8  ;;  %v9330_v47 = vpack.c.bf16 %v8091_v45, %v8090_v36  ;;  %v9333_v49 = vpack.c.bf16 %v8093_v39, %v8092_v48  ;;  %v6387_v4 = vld [vmem:[%s12622_s9 + $0x10] sm:$0xff]  ;;  %v6390_v9 = vld [vmem:[%s12622_s9 + $0x28] sm:$0xff] }
 0x5ec   : > { %8601 = vmatmul.mubr.msk.f32.vlgmr.msra.gmra.mrb[22].mxu0 %vm5505_vm3, %v5788_v56  ;;  %8555 = vmatprep.mubr.msk.f32.mxu1 %vm9994_vm2, %v9978_v0  ;;  %v5477_v17 = vpop.f32.mrb[25].mxu1  ;;  %v5503_v51 = vrot.slane %v11799_v16, 1  ;;  %v5791_v61 = vrot.slane %v11799_v16, 6  ;;  %v5689_v18 = vrot.slane %v11799_v16, 2  ;;  %v5893_v58 = vrot.slane %v11799_v16, 7  ;;  %v8086_v56 = vld [vmem:[%s12618_s5 + $0xd8] sm:$0xff] }
 0x5ed   : > { %8603 = vmatprep.mubr.msk.f32.mxu0 %vm9994_vm2, %v9978_v0  ;;  %9304 = vmatpush3.bf16.msra.mxu1 %v9303_v62  ;;  %v6186_v19 = vrot.slane %v11799_v16, 5  ;;  %v6084_v21 = vrot.slane %v11799_v16, 4 }
 0x5ee   : > { %v5504_v5 = vsel %vm5497_vm4, %v5501_v20, %v5503_v51  ;;  %9319 = vmatpush3.bf16.msra.mxu0 %v9318_v63  ;;  %v11821_v24 = vsel %vm5785_vm5, %v5789_v30, %v5791_v61  ;;  %9311 = vmatprep.subr.bf16.mxu1 %v9993_v54  ;;  %v5690_v22 = vsel %vm5683_vm6, %v5687_v60, %v5689_v18  ;;  %v8099_v63 = vld [vmem:[%s12618_s5 + $0x110] sm:$0xff]  ;;  %v6385_v30 = vld [vmem:[%s12622_s9] sm:$0xff]  ;;  %v6386_v60 = vld [vmem:[%s12622_s9 + $0x8] sm:$0xff] }
 0x5ef   : > { %8556 = vmatmul.mubr.msk.f32.gmra.mrb[32].mxu1 %vm5505_vm3, %v5504_v5  ;;  %v5480_v26 = vpop.f32.mrb[26].mxu1  ;;  %9320 = vmatprep.subr.bf16.mxu0 %v9993_v54  ;;  %v11834_v27 = vsel %vm5887_vm7, %v5891_v2, %v5893_v58  ;;  %v11837_v31 = vsel %vm6182_vm8, %v6184_v6, %v6186_v19  ;;  %v11840_v32 = vsel %vm6080_vm9, %v6082_v8, %v6084_v21  ;;  %v6388_v6 = vld [vmem:[%s12622_s9 + $0x18] sm:$0xff]  ;;  %v6389_v8 = vld [vmem:[%s12622_s9 + $0x20] sm:$0xff] }
 0x5f0   : > { %v6086_v33 = vrot.slane %v5480_v26, 4  ;;  %v6188_v34 = vrot.slane %v5480_v26, 5  ;;  %v6284_v25 = vrot.slane %v5480_v26, 6  ;;  %8604 = vmatmul.mubr.msk.f32.gmra.mrb[24].mxu0 %vm5505_vm3, %v11787_v10  ;;  %8583 = vmatprep.mubr.msk.f32.mxu1 %vm9994_vm2, %v9978_v0  ;;  %v5482_v35 = vpop.f32.mrb[27].mxu1  ;;  %v9339_v20 = vpack.c.bf16 %v8100_v1, %v8099_v63 }
 0x5f1   : > { %8606 = vmatprep.mubr.msk.f32.mxu0 %vm9994_vm2, %v9978_v0  ;;  %v9342_v2 = vpack.c.bf16 %v6386_v60, %v6385_v30  ;;  %v9345_v52 = vpack.c.bf16 %v6388_v6, %v6387_v4 }
 0x5f2   : > { %9322 = vmatpush3.bf16.msra.mxu0 %v9321_v3  ;;  %v6189_v40 = vsel %vm6182_vm8, %v6186_v19, %v6188_v34  ;;  %v11856_v42 = vsel %vm6080_vm9, %v6084_v21, %v6086_v33  ;;  %v11859_v43 = vsel %vm5785_vm5, %v5791_v61, %v6284_v25 }
 0x5f3   : > { %8584 = vmatmul.mubr.msk.f32.vlgmr.msra.gmra.mrb[34].mxu1 %vm5505_vm3, %v11761_v57  ;;  %9329 = vmatprep.subr.bf16.mxu0 %v9993_v54  ;;  %v9327_v57 = vpack.c.bf16 %v8086_v56, %v8085_v55 }
 0x5f4   : > { %8607 = vmatmul.mubr.msk.f32.gmra.mrb[26].mxu0 %vm5505_vm3, %v11821_v24  ;;  %8586 = vmatprep.mubr.msk.f32.mxu1 %vm9994_vm2, %v9978_v0 }
 0x5f5   : > { %8634 = vmatprep.mubr.msk.f32.mxu0 %vm9994_vm2, %v9978_v0  ;;  %9313 = vmatpush3.bf16.msra.mxu1 %v9312_v38 }
 0x5f6   : > { %9314 = vmatprep.subr.bf16.mxu1 %v9993_v54 }
 0x5f7   : > { %8587 = vmatmul.mubr.msk.f32.gmra.mrb[36].mxu1 %vm5505_vm3, %v5688_v12  ;;  %v9351_v12 = vpack.c.bf16 %v6392_v50, %v6391_v11 }
 0x5f8   : > { %8635 = vmatmul.mubr.msk.f32.vlgmr.msra.gmra.mrb[28].mxu0 %vm5505_vm3, %v11741_v44  ;;  %8589 = vmatprep.mubr.msk.f32.mxu1 %vm9994_vm2, %v9978_v0  ;;  %v9324_v44 = vpack.c.bf16 %v8084_v53, %v8083_v13 }
 0x5f9   : > { %8637 = vmatprep.mubr.msk.f32.mxu0 %vm9994_vm2, %v9978_v0  ;;  %9316 = vmatpush3.bf16.msra.mxu1 %v9315_v46 }
 0x5fa   : > { %9331 = vmatpush3.bf16.msra.mxu0 %v9330_v47  ;;  %9323 = vmatprep.subr.bf16.mxu1 %v9993_v54 }
 0x5fb   : > { %8590 = vmatmul.mubr.msk.f32.gmra.mrb[38].mxu1 %vm5505_vm3, %v5690_v22  ;;  %9332 = vmatprep.subr.bf16.mxu0 %v9993_v54 }
 0x5fc   : > { %8638 = vmatmul.mubr.msk.f32.gmra.mrb[30].mxu0 %vm5505_vm3, %v11766_v59  ;;  %8617 = vmatprep.mubr.msk.f32.mxu1 %vm9994_vm2, %v9978_v0  ;;  %v8098_v59 = vld [vmem:[%s12618_s5 + $0x108] sm:$0xff] }
 0x5fd   : > { %8640 = vmatprep.mubr.msk.f32.mxu0 %vm9994_vm2, %v9978_v0 }
 0x5fe   : > { %9334 = vmatpush3.bf16.msra.mxu0 %v9333_v49 }
 0x5ff   : > { %8618 = vmatmul.mubr.msk.f32.vlgmr.msra.gmra.mrb[40].mxu1 %vm5505_vm3, %v11764_v23  ;;  %9341 = vmatprep.subr.bf16.mxu0 %v9993_v54  ;;  %v8097_v23 = vld [vmem:[%s12618_s5 + $0x100] sm:$0xff] }
 0x600   : > { %8641 = vmatmul.mubr.msk.f32.gmra.mrb[32].mxu0 %vm5505_vm3, %v11799_v16  ;;  %8620 = vmatprep.mubr.msk.f32.mxu1 %vm9994_vm2, %v9978_v0  ;;  %v9336_v62 = vpack.c.bf16 %v8098_v59, %v8097_v23 }
 0x601   : > { %8668 = vmatprep.mubr.msk.f32.mxu0 %vm9994_vm2, %v9978_v0  ;;  %9325 = vmatpush3.bf16.msra.mxu1 %v9324_v44 }
 0x602   : > { %9326 = vmatprep.subr.bf16.mxu1 %v9993_v54 }
 0x603   : > { %8621 = vmatmul.mubr.msk.f32.gmra.mrb[42].mxu1 %vm5505_vm3, %v11797_v15 }
 0x604   : > { %8669 = vmatmul.mubr.msk.f32.vlgmr.msra.gmra.mrb[34].mxu0 %vm5505_vm3, %v11803_v7  ;;  %8623 = vmatprep.mubr.msk.f32.mxu1 %vm9994_vm2, %v9978_v0 }
 0x605   : > { %8671 = vmatprep.mubr.msk.f32.mxu0 %vm9994_vm2, %v9978_v0  ;;  %9328 = vmatpush3.bf16.msra.mxu1 %v9327_v57 }
 0x606   : > { %9335 = vmatprep.subr.bf16.mxu1 %v9993_v54  ;;  %9343 = vmatpush3.bf16.msra.mxu0 %v9342_v2 }
 0x607   : > { %8624 = vmatmul.mubr.msk.f32.gmra.mrb[44].mxu1 %vm5505_vm3, %v11834_v27  ;;  %9344 = vmatprep.subr.bf16.mxu0 %v9993_v54 }
 0x608   : > { %8672 = vmatmul.mubr.msk.f32.gmra.mrb[36].mxu0 %vm5505_vm3, %v11837_v31  ;;  %8651 = vmatprep.mubr.msk.f32.mxu1 %vm9994_vm2, %v9978_v0 }
 0x609   : > { %8674 = vmatprep.mubr.msk.f32.mxu0 %vm9994_vm2, %v9978_v0 }
 0x60a   : > { %9346 = vmatpush3.bf16.msra.mxu0 %v9345_v52 }
 0x60b   : > { %8652 = vmatmul.mubr.msk.f32.vlgmr.msra.gmra.mrb[46].mxu1 %vm5505_vm3, %v11806_v14  ;;  %9347 = vmatprep.subr.bf16.mxu0 %v9993_v54 }
 0x60c   : > { %8675 = vmatmul.mubr.msk.f32.gmra.mrb[38].mxu0 %vm5505_vm3, %v6189_v40  ;;  %8654 = vmatprep.mubr.msk.f32.mxu1 %vm9994_vm2, %v9978_v0 }
 0x60d   : > { %9337 = vmatpush3.bf16.msra.mxu1 %v9336_v62  ;;  %8710 = vmatprep.mubr.msk.f32.mxu0 %vm9994_vm2, %v9978_v0 }
 0x60e   : > { %9338 = vmatprep.subr.bf16.mxu1 %v9993_v54 }
 0x60f   : > { %8655 = vmatmul.mubr.msk.f32.gmra.mrb[48].mxu1 %vm5505_vm3, %v11840_v32 }
 0x610   : > { %8657 = vmatprep.mubr.msk.f32.mxu1 %vm9994_vm2, %v9978_v0 }
 0x611   : > { %9340 = vmatpush3.bf16.msra.mxu1 %v9339_v20 }
 0x612   : > { %9533 = vmatprep.subr.bf16.mxu1 %v9993_v54 }
 0x613   : > { %8658 = vmatmul.mubr.msk.f32.gmra.mrb[50].mxu1 %vm5505_vm3, %v11856_v42 }
 0x614   : > { %8685 = vmatprep.mubr.msk.f32.mxu1 %vm9994_vm2, %v9978_v0 }
 0x617   : > { %8686 = vmatmul.mubr.msk.f32.vlgmr.msra.gmra.mrb[52].mxu1 %vm5505_vm3, %v11787_v10  ;;  %v9348_v10 = vpack.c.bf16 %v6390_v9, %v6389_v8 }
 0x618   : > { %8688 = vmatprep.mubr.msk.f32.mxu1 %vm9994_vm2, %v9978_v0 }
 0x619   : > { %9349 = vmatpush3.bf16.msra.mxu0 %v9348_v10 }
 0x61a   : > { %9350 = vmatprep.subr.bf16.mxu0 %v9993_v54 }
 0x61b   : > { %8689 = vmatmul.mubr.msk.f32.gmra.mrb[54].mxu1 %vm5505_vm3, %v11821_v24 }
 0x61c   : > { %8691 = vmatprep.mubr.msk.f32.mxu1 %vm9994_vm2, %v9978_v0 }
 0x61d   : > { %9352 = vmatpush3.bf16.msra.mxu0 %v9351_v12 }
 0x61e   : > { %9353 = vmatprep.subr.bf16.mxu0 %v9993_v54 }
 0x61f   : > { %8692 = vmatmul.mubr.msk.f32.gmra.mrb[56].mxu1 %vm5505_vm3, %v11859_v43 }
 0x620   : > { %9030 = vmatprep.mubr.msk.f32.mxu1 %vm9994_vm2, %v9978_v0 }
 0x6b3   : > { %v5664_v15 = vpop.f32.mrb[16].mxu0 }
 0x6b4   : > { %v8568_v16 = vpop.f32.mrb[17].mxu0 }
 0x6b7   : > { %v5669_v7 = vpop.f32.mrb[18].mxu0 }
 0x6b8   : > { %v8571_v14 = vpop.f32.mrb[19].mxu0 }
 0x6ba   : > { %v5578_v17 = vpop.f32.mrb[28].mxu1 }
 0x6bb   : > { %v5665_v51 = vadd.f32 %v5664_v15, %v5578_v17  ;;  %v8551_v61 = vpop.f32.mrb[29].mxu1  ;;  %v5674_v18 = vpop.f32.mrb[20].mxu0 }
 0x6bc   : > { %v8574_v58 = vpop.f32.mrb[21].mxu0 }
 0x6bd   : > { %v8104_v58 = vld [vmem:[%s12619_s6] ss:$0 sm:$0xff] }
 0x6be   : > { %v5583_v3 = vpop.f32.mrb[30].mxu1 }
 0x6bf   : > { %v5670_v19 = vadd.f32 %v5669_v7, %v5583_v3  ;;  %v8554_v21 = vpop.f32.mrb[31].mxu1  ;;  %v5865_v5 = vpop.f32.mrb[22].mxu0 }
 0x6c0   : > { %v8602_v24 = vpop.f32.mrb[23].mxu0  ;;  %v8106_v21 = vld [vmem:[%s12622_s9 + $0x40] sm:$0xff] }
 0x6c2   : > { %v5588_v28 = vpop.f32.mrb[32].mxu1 }
 0x6c3   : > { %v5675_v29 = vadd.f32 %v5674_v18, %v5588_v28  ;;  %v8557_v22 = vpop.f32.mrb[33].mxu1  ;;  %v5870_v26 = vpop.f32.mrb[24].mxu0 }
 0x6c4   : > { %v8605_v27 = vpop.f32.mrb[25].mxu0 }
 0x6c6   : > { %v5763_v31 = vpop.f32.mrb[34].mxu1 }
 0x6c7   : > { %v5777_v32 = vadd.f32 %v5763_v31, %v5665_v51  ;;  %v8585_v33 = vpop.f32.mrb[35].mxu1  ;;  %v5875_v34 = vpop.f32.mrb[26].mxu0  ;;  %v8108_v31 = vld [vmem:[%s12622_s9 + $0x50] sm:$0xff] }
 0x6c8   : > { %v8608_v25 = vpop.f32.mrb[27].mxu0 }
 0x6c9   : > { %v5879_v35 = vadd.f32 %v5865_v5, %v5777_v32  ;;  %v8107_v5 = vld [vmem:[%s12622_s9 + $0x48] sm:$0xff]  ;;  %v8109_v32 = vld [vmem:[%s12622_s9 + $0x58] sm:$0xff] }
 0x6ca   : > { %v5768_v38 = vpop.f32.mrb[36].mxu1  ;;  %v9357_v25 = vpack.c.bf16 %v8109_v32, %v8108_v31  ;;  %v8147_v31 = vld [vmem:[%s12622_s9 + $0x168] sm:$0xff] }
 0x6cb   : > { %v5778_v41 = vadd.f32 %v5768_v38, %v5670_v19  ;;  %v8588_v37 = vpop.f32.mrb[37].mxu1  ;;  %v6057_v40 = vpop.f32.mrb[28].mxu0 }
 0x6cc   : > { %v8636_v42 = vpop.f32.mrb[29].mxu0  ;;  %v8111_v37 = vld [vmem:[%s12622_s9 + $0x68] sm:$0xff] }
 0x6cd   : > { %v5880_v43 = vadd.f32 %v5870_v26, %v5778_v41  ;;  %v8110_v41 = vld [vmem:[%s12622_s9 + $0x60] sm:$0xff] }
 0x6ce   : > { %v5773_v36 = vpop.f32.mrb[38].mxu1  ;;  %v9360_v42 = vpack.c.bf16 %v8111_v37, %v8110_v41  ;;  %v8152_v41 = vld [vmem:[%s12622_s9 + $0x188] sm:$0xff] }
 0x6cf   : > { %v5779_v45 = vadd.f32 %v5773_v36, %v5675_v29  ;;  %v8591_v46 = vpop.f32.mrb[39].mxu1  ;;  %v6062_v47 = vpop.f32.mrb[30].mxu0  ;;  %v9354_v29 = vpack.c.bf16 %v8107_v5, %v8106_v21  ;;  %v8113_v36 = vld [vmem:[%s12622_s9 + $0x78] sm:$0xff]  ;;  %v8143_v21 = vld [vmem:[%s12622_s9 + $0x148] sm:$0xff] }
 0x6d0   : > { %v8639_v48 = vpop.f32.mrb[31].mxu0  ;;  %v8115_v46 = vld [vmem:[%s12622_s9 + $0x80] sm:$0xff] }
 0x6d1   : > { %v5881_v39 = vadd.f32 %v5875_v34, %v5779_v45 }
 0x6d2   : > { %v5967_v49 = vpop.f32.mrb[40].mxu1 }
 0x6d3   : > { %v5981_v13 = vadd.f32 %v5967_v49, %v5879_v35  ;;  %v8619_v53 = vpop.f32.mrb[41].mxu1  ;;  %v6067_v44 = vpop.f32.mrb[32].mxu0  ;;  %v8117_v49 = vld [vmem:[%s12622_s9 + $0x90] sm:$0xff] }
 0x6d4   : > { %v8642_v55 = vpop.f32.mrb[33].mxu0 }
 0x6d5   : > { %v6071_v56 = vadd.f32 %v6057_v40, %v5981_v13  ;;  %v8118_v13 = vld [vmem:[%s12622_s9 + $0x98] sm:$0xff]  ;;  %v8120_v55 = vld [vmem:[%s12622_s9 + $0xa8] sm:$0xff] }
 0x6d6   : > { %v5972_v57 = vpop.f32.mrb[42].mxu1  ;;  %v9369_v53 = vpack.c.bf16 %v8118_v13, %v8117_v49  ;;  %v8160_v13 = vld [vmem:[%s12622_s9 + $0x1c0] sm:$0xff] }
 0x6d7   : > { %v5982_v23 = vadd.f32 %v5972_v57, %v5880_v43  ;;  %v8622_v59 = vpop.f32.mrb[43].mxu1  ;;  %v6262_v62 = vpop.f32.mrb[34].mxu0  ;;  %v8112_v43 = vld [vmem:[%s12622_s9 + $0x70] sm:$0xff] }
 0x6d8   : > { %v8670_v63 = vpop.f32.mrb[35].mxu0  ;;  %v9363_v45 = vpack.c.bf16 %v8113_v36, %v8112_v43  ;;  %v8121_v57 = vld [vmem:[%s12622_s9 + $0xb0] sm:$0xff]  ;;  %v8154_v36 = vld [vmem:[%s12622_s9 + $0x198] sm:$0xff] }
 0x6d9   : > { %v6072_v1 = vadd.f32 %v6062_v47, %v5982_v23  ;;  %v8116_v47 = vld [vmem:[%s12622_s9 + $0x88] sm:$0xff]  ;;  %v8122_v23 = vld [vmem:[%s12622_s9 + $0xb8] sm:$0xff]  ;;  %v8153_v43 = vld [vmem:[%s12622_s9 + $0x190] sm:$0xff] }
 0x6da   : > { %v5977_v20 = vpop.f32.mrb[44].mxu1  ;;  %v9366_v48 = vpack.c.bf16 %v8116_v47, %v8115_v46  ;;  %v9375_v59 = vpack.c.bf16 %v8122_v23, %v8121_v57  ;;  %v8125_v63 = vld [vmem:[%s12622_s9 + $0xc8] sm:$0xff]  ;;  %v8163_v57 = vld [vmem:[%s12622_s9 + $0x1d8] sm:$0xff] }
 0x6db   : > { %v5983_v30 = vadd.f32 %v5977_v20, %v5881_v39  ;;  %v8625_v60 = vpop.f32.mrb[45].mxu1  ;;  %v6267_v2 = vpop.f32.mrb[36].mxu0  ;;  %v8156_v46 = vld [vmem:[%s12622_s9 + $0x1a8] sm:$0xff] }
 0x6dc   : > { %v8673_v4 = vpop.f32.mrb[37].mxu0  ;;  %v8127_v60 = vld [vmem:[%s12622_s9 + $0xd8] sm:$0xff] }
 0x6dd   : > { %v6073_v6 = vadd.f32 %v6067_v44, %v5983_v30  ;;  %v8119_v44 = vld [vmem:[%s12622_s9 + $0xa0] sm:$0xff]  ;;  %v8126_v30 = vld [vmem:[%s12622_s9 + $0xd0] sm:$0xff] }
 0x6de   : > { %v6160_v52 = vpop.f32.mrb[46].mxu1  ;;  %v8128_v4 = vld [vmem:[%s12622_s9 + $0xe0] sm:$0xff] }
 0x6df   : > { %v6174_v8 = vadd.f32 %v6160_v52, %v6071_v56  ;;  %v8653_v9 = vpop.f32.mrb[47].mxu1  ;;  %v6272_v10 = vpop.f32.mrb[38].mxu0  ;;  %v9372_v56 = vpack.c.bf16 %v8120_v55, %v8119_v44 }
 0x6e0   : > { %v8676_v11 = vpop.f32.mrb[39].mxu0  ;;  %v8131_v9 = vld [vmem:[%s12622_s9 + $0xf8] sm:$0xff] }
 0x6e1   : > { %v6276_v50 = vadd.f32 %v6262_v62, %v6174_v8  ;;  %v8124_v62 = vld [vmem:[%s12622_s9 + $0xc0] sm:$0xff]  ;;  %v8130_v8 = vld [vmem:[%s12622_s9 + $0xf0] sm:$0xff] }
 0x6e2   : > { %v6165_v12 = vpop.f32.mrb[48].mxu1  ;;  %v8133_v11 = vld [vmem:[%s12622_s9 + $0x100] sm:$0xff] }
 0x6e3   : > { %v6175_v15 = vadd.f32 %v6165_v12, %v6072_v1  ;;  %v8656_v16 = vpop.f32.mrb[49].mxu1  ;;  %v9378_v1 = vpack.c.bf16 %v8125_v63, %v8124_v62  ;;  %v8166_v63 = vld [vmem:[%s12622_s9 + $0x1f0] sm:$0xff] }
 0x6e4   : > { %v8135_v16 = vld [vmem:[%s12622_s9 + $0x110] sm:$0xff] }
 0x6e5   : > { %v6277_v7 = vadd.f32 %v6267_v2, %v6175_v15  ;;  %v9381_v2 = vpack.c.bf16 %v8127_v60, %v8126_v30  ;;  %v8169_v30 = vld [vmem:[%s12622_s9 + $0x200] sm:$0xff]  ;;  %v8170_v60 = vld [vmem:[%s12622_s9 + $0x208] sm:$0xff] }
 0x6e6   : > { %v6170_v14 = vpop.f32.mrb[50].mxu1 }
 0x6e7   : > { %v6176_v17 = vadd.f32 %v6170_v14, %v6073_v6  ;;  %v8659_v51 = vpop.f32.mrb[51].mxu1  ;;  %v8129_v6 = vld [vmem:[%s12622_s9 + $0xe8] sm:$0xff] }
 0x6e8   : > { %v9384_v52 = vpack.c.bf16 %v8129_v6, %v8128_v4  ;;  %v8138_v51 = vld [vmem:[%s12622_s9 + $0x128] sm:$0xff]  ;;  %v8171_v6 = vld [vmem:[%s12622_s9 + $0x210] sm:$0xff] }
 0x6e9   : > { %v6278_v61 = vadd.f32 %v6272_v10, %v6176_v17  ;;  %v9387_v10 = vpack.c.bf16 %v8131_v9, %v8130_v8  ;;  %v8137_v17 = vld [vmem:[%s12622_s9 + $0x120] sm:$0xff]  ;;  %v7716_v9 = vld [vmem:[%s12624_s11 + $0x8] sm:$0xff] }
 0x6ea   : > { %v6354_v18 = vpop.f32.mrb[52].mxu1  ;;  %v7715_v8 = vld [vmem:[%s12624_s11] sm:$0xff] }
 0x6eb   : > { %v6368_v3 = vadd.f32 %v6354_v18, %v6276_v50  ;;  %v8687_v19 = vpop.f32.mrb[53].mxu1  ;;  %v8134_v50 = vld [vmem:[%s12622_s9 + $0x108] sm:$0xff]  ;;  %v8139_v18 = vld [vmem:[%s12622_s9 + $0x130] sm:$0xff] }
 0x6ec   : > { %v9390_v12 = vpack.c.bf16 %v8134_v50, %v8133_v11  ;;  %v8142_v19 = vld [vmem:[%s12622_s9 + $0x140] sm:$0xff]  ;;  %v9534_v50 = vpack.c.bf16 %v7716_v9, %v7715_v8 }
 0x6ed   : > { %v6378_v24 = vadd.f32 %v8104_v58, %v6368_v3  ;;  %v9402_v5 = vpack.c.bf16 %v8143_v21, %v8142_v19  ;;  %v7722_v19 = vld [vmem:[%s12624_s11 + $0x38] sm:$0xff]  ;;  %v8200_v9 = vld [vmem:[%s12622_s9 + $0x2e0] sm:$0xff] }
 0x6ee   : > { %v6359_v28 = vpop.f32.mrb[54].mxu1  ;;  %9535 = vmatpush3.bf16.msra.mxu1 %v9534_v50  ;;  %v8202_v50 = vld [vmem:[%s12622_s9 + $0x2f0] sm:$0xff] }
 0x6ef   : > { %v12016_v22 = vmul.f32 %v6378_v24, %v6378_v24  ;;  %v6369_v26 = vadd.f32 %v6359_v28, %v6277_v7  ;;  %v8690_v27 = vpop.f32.mrb[55].mxu1  ;;  %v8136_v7 = vld [vmem:[%s12622_s9 + $0x118] sm:$0xff]  ;;  %v8144_v28 = vld [vmem:[%s12622_s9 + $0x150] sm:$0xff]  ;;  %9536 = vmatprep.subr.bf16.mxu1 %v9993_v54 }
 0x6f0   : > { %v9393_v14 = vpack.c.bf16 %v8136_v7, %v8135_v16  ;;  %v8146_v27 = vld [vmem:[%s12622_s9 + $0x160] sm:$0xff]  ;;  %v8174_v16 = vld [vmem:[%s12622_s9 + $0x228] sm:$0xff] }
 0x6f1   : > { %v12024_v33 = vadd.f32 %v8104_v58, %v6369_v26  ;;  %8711 = vmatmul.mubr.msk.f32.vlgmr.msra.gmra.mrb[40].mxu0 %vm6393_vm10, %v12016_v22  ;;  %v6477_v39 = vrot.slane %v12016_v22, 1  ;;  %v6560_v20 = vrot.slane %v12016_v22, 2  ;;  %v6643_v15 = vrot.slane %v12016_v22, 3 }
 0x6f2   : > { %9355 = vmatpush3.bf16.msra.mxu0 %v9354_v29  ;;  %v6364_v34 = vpop.f32.mrb[56].mxu1  ;;  %8729 = vmatprep.mubr.msk.f32.mxu0 %vm9994_vm2, %v9978_v0  ;;  %v6726_v24 = vrot.slane %v12016_v22, 6  ;;  %v8145_v29 = vld [vmem:[%s12622_s9 + $0x158] sm:$0xff]  ;;  %v9408_v32 = vpack.c.bf16 %v8147_v31, %v8146_v27 }
 0x6f3   : > { %v6370_v35 = vadd.f32 %v6364_v34, %v6278_v61  ;;  %v8693_v38 = vpop.f32.mrb[57].mxu1  ;;  %9356 = vmatprep.subr.bf16.mxu0 %v9993_v54  ;;  %v9396_v61 = vpack.c.bf16 %v8138_v51, %v8137_v17  ;;  %v9405_v26 = vpack.c.bf16 %v8145_v29, %v8144_v28  ;;  %v8148_v34 = vld [vmem:[%s12622_s9 + $0x170] sm:$0xff]  ;;  %v12215_v55 = vmul.f32 %v12024_v33, %v12024_v33  ;;  %v8164_v33 = vld [vmem:[%s12622_s9 + $0x1e0] sm:$0xff]  ;;  %v7720_v17 = vld [vmem:[%s12624_s11 + $0x28] sm:$0xff] }
 0x6f4   : > { %v8151_v38 = vld [vmem:[%s12622_s9 + $0x180] sm:$0xff] }
 0x6f5   : > { %v12037_v40 = vadd.f32 %v8104_v58, %v6370_v35  ;;  %v8140_v58 = vld [vmem:[%s12622_s9 + $0x138] sm:$0xff]  ;;  %v9414_v37 = vpack.c.bf16 %v8152_v41, %v8151_v38  ;;  %v6975_v4 = vrot.slane %v12215_v55, 1  ;;  %v7723_v29 = vld [vmem:[%s12624_s11 + $0x40] sm:$0xff]  ;;  %v7058_v31 = vrot.slane %v12215_v55, 4 }
 0x6f6   : > { %9358 = vmatpush3.bf16.msra.mxu0 %v9357_v25  ;;  %v9399_v3 = vpack.c.bf16 %v8140_v58, %v8139_v18  ;;  %v8149_v25 = vld [vmem:[%s12622_s9 + $0x178] sm:$0xff] }
 0x6f7   : > { %9359 = vmatprep.subr.bf16.mxu0 %v9993_v54  ;;  %v9411_v35 = vpack.c.bf16 %v8149_v25, %v8148_v34  ;;  %v8176_v18 = vld [vmem:[%s12622_s9 + $0x238] sm:$0xff] }
 0x6f8   : > { %v8181_v34 = vld [vmem:[%s12622_s9 + $0x258] sm:$0xff] }
 0x6f9   : > { %v7726_v38 = vld [vmem:[%s12624_s11 + $0x58] sm:$0xff] }
 0x6fa   : > { %9361 = vmatpush3.bf16.msra.mxu0 %v9360_v42  ;;  %v6809_v42 = vrot.slane %v12016_v22, 7  ;;  %v8155_v22 = vld [vmem:[%s12622_s9 + $0x1a0] sm:$0xff] }
 0x6fb   : > { %9362 = vmatprep.subr.bf16.mxu0 %v9993_v54  ;;  %v9420_v47 = vpack.c.bf16 %v8156_v46, %v8155_v22  ;;  %v8184_v46 = vld [vmem:[%s12622_s9 + $0x270] sm:$0xff] }
 0x6fe   : > { %9364 = vmatpush3.bf16.msra.mxu0 %v9363_v45  ;;  %v9417_v45 = vpack.c.bf16 %v8154_v36, %v8153_v43  ;;  %v7727_v36 = vld [vmem:[%s12624_s11 + $0x60] sm:$0xff] }
 0x6ff   : > { %9365 = vmatprep.subr.bf16.mxu0 %v9993_v54 }
 0x701   : > { %8730 = vmatmul.mubr.msk.f32.vlgmr.msra.gmra.mrb[40].mxu0 %vm6393_vm10, %v6477_v39  ;;  %v8158_v39 = vld [vmem:[%s12622_s9 + $0x1b8] sm:$0xff] }
 0x702   : > { %9367 = vmatpush3.bf16.msra.mxu0 %v9366_v48  ;;  %8748 = vmatprep.mubr.msk.f32.mxu0 %vm9994_vm2, %v9978_v0  ;;  %v8157_v48 = vld [vmem:[%s12622_s9 + $0x1b0] sm:$0xff] }
 0x703   : > { %9368 = vmatprep.subr.bf16.mxu0 %v9993_v54  ;;  %v9423_v49 = vpack.c.bf16 %v8158_v39, %v8157_v48 }
 0x706   : > { %9370 = vmatpush3.bf16.msra.mxu0 %v9369_v53  ;;  %v8161_v53 = vld [vmem:[%s12622_s9 + $0x1c8] sm:$0xff] }
 0x707   : > { %9371 = vmatprep.subr.bf16.mxu0 %v9993_v54  ;;  %v9426_v44 = vpack.c.bf16 %v8161_v53, %v8160_v13  ;;  %v8188_v13 = vld [vmem:[%s12622_s9 + $0x288] sm:$0xff] }
 0x70a   : > { %9373 = vmatpush3.bf16.msra.mxu0 %v9372_v56  ;;  %v8162_v56 = vld [vmem:[%s12622_s9 + $0x1d0] sm:$0xff] }
 0x70b   : > { %9374 = vmatprep.subr.bf16.mxu0 %v9993_v54  ;;  %v9429_v23 = vpack.c.bf16 %v8163_v57, %v8162_v56  ;;  %v8189_v56 = vld [vmem:[%s12622_s9 + $0x290] sm:$0xff]  ;;  %v8190_v57 = vld [vmem:[%s12622_s9 + $0x298] sm:$0xff] }
 0x70e   : > { %9376 = vmatpush3.bf16.msra.mxu0 %v9375_v59  ;;  %v8165_v59 = vld [vmem:[%s12622_s9 + $0x1e8] sm:$0xff] }
 0x70f   : > { %9377 = vmatprep.subr.bf16.mxu0 %v9993_v54  ;;  %v9432_v62 = vpack.c.bf16 %v8165_v59, %v8164_v33  ;;  %v8191_v33 = vld [vmem:[%s12622_s9 + $0x2a0] sm:$0xff]  ;;  %v8192_v59 = vld [vmem:[%s12622_s9 + $0x2a8] sm:$0xff] }
 0x711   : > { %8749 = vmatmul.mubr.msk.f32.vlgmr.msra.gmra.mrb[40].mxu0 %vm6393_vm10, %v6560_v20 }
 0x712   : > { %9379 = vmatpush3.bf16.msra.mxu0 %v9378_v1  ;;  %8767 = vmatprep.mubr.msk.f32.mxu0 %vm9994_vm2, %v9978_v0  ;;  %v8167_v1 = vld [vmem:[%s12622_s9 + $0x1f8] sm:$0xff] }
 0x713   : > { %9380 = vmatprep.subr.bf16.mxu0 %v9993_v54  ;;  %v9435_v20 = vpack.c.bf16 %v8167_v1, %v8166_v63  ;;  %v8193_v63 = vld [vmem:[%s12622_s9 + $0x2b0] sm:$0xff]  ;;  %v8194_v1 = vld [vmem:[%s12622_s9 + $0x2b8] sm:$0xff] }
 0x716   : > { %9382 = vmatpush3.bf16.msra.mxu0 %v9381_v2  ;;  %v9438_v2 = vpack.c.bf16 %v8170_v60, %v8169_v30  ;;  %v8196_v30 = vld [vmem:[%s12622_s9 + $0x2c0] sm:$0xff]  ;;  %v8197_v60 = vld [vmem:[%s12622_s9 + $0x2c8] sm:$0xff] }
 0x717   : > { %9383 = vmatprep.subr.bf16.mxu0 %v9993_v54 }
 0x71a   : > { %9385 = vmatpush3.bf16.msra.mxu0 %v9384_v52  ;;  %v8172_v52 = vld [vmem:[%s12622_s9 + $0x218] sm:$0xff] }
 0x71b   : > { %9386 = vmatprep.subr.bf16.mxu0 %v9993_v54  ;;  %v9441_v11 = vpack.c.bf16 %v8172_v52, %v8171_v6  ;;  %v8198_v6 = vld [vmem:[%s12622_s9 + $0x2d0] sm:$0xff]  ;;  %v8199_v52 = vld [vmem:[%s12622_s9 + $0x2d8] sm:$0xff] }
 0x71c   : > { %v9477_v8 = vpack.c.bf16 %v8199_v52, %v8198_v6  ;;  %v7729_v6 = vld [vmem:[%s12624_s11 + $0x70] sm:$0xff]  ;;  %v7730_v52 = vld [vmem:[%s12624_s11 + $0x78] sm:$0xff] }
 0x71e   : > { %9388 = vmatpush3.bf16.msra.mxu0 %v9387_v10  ;;  %v7717_v10 = vld [vmem:[%s12624_s11 + $0x10] sm:$0xff] }
 0x71f   : > { %9389 = vmatprep.subr.bf16.mxu0 %v9993_v54 }
 0x721   : > { %8768 = vmatmul.mubr.msk.f32.vlgmr.msra.gmra.mrb[40].mxu0 %vm6393_vm10, %v6643_v15  ;;  %v8173_v15 = vld [vmem:[%s12622_s9 + $0x220] sm:$0xff] }
 0x722   : > { %9391 = vmatpush3.bf16.msra.mxu0 %v9390_v12  ;;  %8786 = vmatprep.mubr.msk.f32.mxu0 %vm9994_vm2, %v9978_v0  ;;  %v7718_v12 = vld [vmem:[%s12624_s11 + $0x18] sm:$0xff]  ;;  %v9444_v51 = vpack.c.bf16 %v8174_v16, %v8173_v15  ;;  %v8205_v16 = vld [vmem:[%s12622_s9 + $0x300] sm:$0xff] }
 0x723   : > { %9392 = vmatprep.subr.bf16.mxu0 %v9993_v54  ;;  %v9537_v7 = vpack.c.bf16 %v7718_v12, %v7717_v10  ;;  %v8201_v10 = vld [vmem:[%s12622_s9 + $0x2e8] sm:$0xff]  ;;  %v8203_v12 = vld [vmem:[%s12622_s9 + $0x2f8] sm:$0xff] }
 0x724   : > { %v9483_v15 = vpack.c.bf16 %v8203_v12, %v8202_v50  ;;  %v7731_v12 = vld [vmem:[%s12625_s12] sm:$0x1] }
 0x725   : > { %9538 = vmatpush3.bf16.msra.mxu1 %v9537_v7  ;;  %v8206_v7 = vld [vmem:[%s12622_s9 + $0x308] sm:$0xff] }
 0x726   : > { %9394 = vmatpush3.bf16.msra.mxu0 %v9393_v14  ;;  %v7719_v14 = vld [vmem:[%s12624_s11 + $0x20] sm:$0xff]  ;;  %9539 = vmatprep.subr.bf16.mxu1 %v9993_v54 }
 0x727   : > { %9395 = vmatprep.subr.bf16.mxu0 %v9993_v54  ;;  %v9540_v58 = vpack.c.bf16 %v7720_v17, %v7719_v14  ;;  %v9486_v14 = vpack.c.bf16 %v8206_v7, %v8205_v16  ;;  %v7307_v17 = vrot.slane %v12215_v55, 7 }
 0x729   : > { %9541 = vmatpush3.bf16.msra.mxu1 %v9540_v58  ;;  %v8210_v58 = vld [vmem:[%s12622_s9 + $0x328] sm:$0xff] }
 0x72a   : > { %9397 = vmatpush3.bf16.msra.mxu0 %v9396_v61  ;;  %v8175_v61 = vld [vmem:[%s12622_s9 + $0x230] sm:$0xff]  ;;  %9542 = vmatprep.subr.bf16.mxu1 %v9993_v54 }
 0x72b   : > { %9398 = vmatprep.subr.bf16.mxu0 %v9993_v54  ;;  %v9447_v21 = vpack.c.bf16 %v8176_v18, %v8175_v61  ;;  %v8208_v61 = vld [vmem:[%s12622_s9 + $0x318] sm:$0xff] }
 0x72e   : > { %9400 = vmatpush3.bf16.msra.mxu0 %v9399_v3  ;;  %v7721_v3 = vld [vmem:[%s12624_s11 + $0x30] sm:$0xff] }
 0x72f   : > { %9401 = vmatprep.subr.bf16.mxu0 %v9993_v54  ;;  %v9543_v28 = vpack.c.bf16 %v7722_v19, %v7721_v3  ;;  %v8211_v19 = vld [vmem:[%s12622_s9 + $0x330] sm:$0xff] }
 0x731   : > { %8787 = vmatmul.mubr.msk.f32.vlgmr.msra.gmra.mrb[40].mxu0 %vm6393_vm10, %v6726_v24  ;;  %v8179_v24 = vld [vmem:[%s12622_s9 + $0x248] sm:$0xff]  ;;  %9544 = vmatpush3.bf16.msra.mxu1 %v9543_v28  ;;  %v8214_v28 = vld [vmem:[%s12622_s9 + $0x340] sm:$0xff] }
 0x732   : > { %9403 = vmatpush3.bf16.msra.mxu0 %v9402_v5  ;;  %8805 = vmatprep.mubr.msk.f32.mxu0 %vm9994_vm2, %v9978_v0  ;;  %v8178_v5 = vld [vmem:[%s12622_s9 + $0x240] sm:$0xff] }
 0x733   : > { %9404 = vmatprep.subr.bf16.mxu0 %v9993_v54  ;;  %v9450_v27 = vpack.c.bf16 %v8179_v24, %v8178_v5  ;;  %9545 = vmatprep.subr.bf16.mxu1 %v9993_v54  ;;  %v12453_v24 = vmul.f32 %v12037_v40, %v12037_v40  ;;  %v8216_v40 = vld [vmem:[%s12622_s9 + $0x350] sm:$0xff] }
 0x736   : > { %9406 = vmatpush3.bf16.msra.mxu0 %v9405_v26  ;;  %v7724_v26 = vld [vmem:[%s12624_s11 + $0x48] sm:$0xff] }
 0x737   : > { %9407 = vmatprep.subr.bf16.mxu0 %v9993_v54  ;;  %v9546_v25 = vpack.c.bf16 %v7724_v26, %v7723_v29  ;;  %v8215_v29 = vld [vmem:[%s12622_s9 + $0x348] sm:$0xff] }
 0x738   : > { %v9498_v26 = vpack.c.bf16 %v8215_v29, %v8214_v28 }
 0x739   : > { %9547 = vmatpush3.bf16.msra.mxu1 %v9546_v25  ;;  %v8219_v25 = vld [vmem:[%s12622_s9 + $0x368] sm:$0xff] }
 0x73a   : > { %9409 = vmatpush3.bf16.msra.mxu0 %v9408_v32  ;;  %v8180_v32 = vld [vmem:[%s12622_s9 + $0x250] sm:$0xff]  ;;  %9548 = vmatprep.subr.bf16.mxu1 %v9993_v54 }
 0x73b   : > { %9410 = vmatprep.subr.bf16.mxu0 %v9993_v54  ;;  %v9453_v41 = vpack.c.bf16 %v8181_v34, %v8180_v32  ;;  %v8218_v34 = vld [vmem:[%s12622_s9 + $0x360] sm:$0xff] }
 0x73e   : > { %9412 = vmatpush3.bf16.msra.mxu0 %v9411_v35  ;;  %v7725_v35 = vld [vmem:[%s12624_s11 + $0x50] sm:$0xff] }
 0x73f   : > { %9413 = vmatprep.subr.bf16.mxu0 %v9993_v54  ;;  %v9549_v43 = vpack.c.bf16 %v7726_v38, %v7725_v35  ;;  %v9504_v35 = vpack.c.bf16 %v8219_v25, %v8218_v34  ;;  %v8220_v38 = vld [vmem:[%s12622_s9 + $0x370] sm:$0xff] }
 0x741   : > { %8806 = vmatmul.mubr.msk.f32.vlgmr.msra.gmra.mrb[40].mxu0 %vm6393_vm10, %v6809_v42  ;;  %v8183_v42 = vld [vmem:[%s12622_s9 + $0x268] sm:$0xff]  ;;  %9550 = vmatpush3.bf16.msra.mxu1 %v9549_v43 }
 0x742   : > { %9415 = vmatpush3.bf16.msra.mxu0 %v9414_v37  ;;  %8824 = vmatprep.mubr.msk.f32.mxu0 %vm9994_vm2, %v9978_v0  ;;  %v8182_v37 = vld [vmem:[%s12622_s9 + $0x260] sm:$0xff]  ;;  %v8224_v43 = vld [vmem:[%s12622_s9 + $0x388] sm:$0xff] }
 0x743   : > { %9416 = vmatprep.subr.bf16.mxu0 %v9993_v54  ;;  %v9456_v22 = vpack.c.bf16 %v8183_v42, %v8182_v37  ;;  %9551 = vmatprep.subr.bf16.mxu1 %v9993_v54  ;;  %v8223_v42 = vld [vmem:[%s12622_s9 + $0x380] sm:$0xff] }
 0x746   : > { %9418 = vmatpush3.bf16.msra.mxu0 %v9417_v45  ;;  %v7728_v45 = vld [vmem:[%s12624_s11 + $0x68] sm:$0xff] }
 0x747   : > { %9419 = vmatprep.subr.bf16.mxu0 %v9993_v54  ;;  %v9552_v48 = vpack.c.bf16 %v7728_v45, %v7727_v36  ;;  %v9510_v36 = vpack.c.bf16 %v8224_v43, %v8223_v42  ;;  %v7474_v45 = vrot.slane %v12453_v24, 3 }
 0x749   : > { %9553 = vmatpush3.bf16.msra.mxu1 %v9552_v48  ;;  %v8227_v48 = vld [vmem:[%s12622_s9 + $0x3a0] sm:$0xff] }
 0x74a   : > { %9421 = vmatpush3.bf16.msra.mxu0 %v9420_v47  ;;  %v8185_v47 = vld [vmem:[%s12622_s9 + $0x278] sm:$0xff]  ;;  %9554 = vmatprep.subr.bf16.mxu1 %v9993_v54 }
 0x74b   : > { %9422 = vmatprep.subr.bf16.mxu0 %v9993_v54  ;;  %v9459_v39 = vpack.c.bf16 %v8185_v47, %v8184_v46  ;;  %v8226_v46 = vld [vmem:[%s12622_s9 + $0x398] sm:$0xff] }
 0x74e   : > { %9424 = vmatpush3.bf16.msra.mxu0 %v9423_v49  ;;  %v8187_v49 = vld [vmem:[%s12622_s9 + $0x280] sm:$0xff] }
 0x74f   : > { %9425 = vmatprep.subr.bf16.mxu0 %v9993_v54  ;;  %v9462_v53 = vpack.c.bf16 %v8188_v13, %v8187_v49  ;;  %v8229_v13 = vld [vmem:[%s12622_s9 + $0x3b0] sm:$0xff] }
 0x751   : > { %8825 = vmatmul.mubr.msk.f32.vlgmr.msra.gmra.mrb[40].mxu0 %vm6393_vm10, %v12215_v55 }
 0x752   : > { %9427 = vmatpush3.bf16.msra.mxu0 %v9426_v44  ;;  %8843 = vmatprep.mubr.msk.f32.mxu0 %vm9994_vm2, %v9978_v0  ;;  %v7141_v44 = vrot.slane %v12215_v55, 5 }
 0x753   : > { %9428 = vmatprep.subr.bf16.mxu0 %v9993_v54 }
 0x756   : > { %9430 = vmatpush3.bf16.msra.mxu0 %v9429_v23  ;;  %v9465_v23 = vpack.c.bf16 %v8190_v57, %v8189_v56  ;;  %v8232_v56 = vld [vmem:[%s12622_s9 + $0x3c0] sm:$0xff]  ;;  %v8233_v57 = vld [vmem:[%s12622_s9 + $0x3c8] sm:$0xff] }
 0x757   : > { %9431 = vmatprep.subr.bf16.mxu0 %v9993_v54 }
 0x75a   : > { %9433 = vmatpush3.bf16.msra.mxu0 %v9432_v62  ;;  %v9468_v62 = vpack.c.bf16 %v8192_v59, %v8191_v33  ;;  %v7557_v33 = vrot.slane %v12453_v24, 4  ;;  %v8234_v59 = vld [vmem:[%s12622_s9 + $0x3d0] sm:$0xff] }
 0x75b   : > { %9434 = vmatprep.subr.bf16.mxu0 %v9993_v54 }
 0x75e   : > { %9436 = vmatpush3.bf16.msra.mxu0 %v9435_v20  ;;  %v9471_v20 = vpack.c.bf16 %v8194_v1, %v8193_v63  ;;  %v8236_v1 = vld [vmem:[%s12622_s9 + $0x3e0] sm:$0xff] }
 0x75f   : > { %9437 = vmatprep.subr.bf16.mxu0 %v9993_v54 }
 0x761   : > { %8844 = vmatmul.mubr.msk.f32.vlgmr.msra.gmra.mrb[40].mxu0 %vm6393_vm10, %v6975_v4  ;;  %v7224_v4 = vrot.slane %v12215_v55, 6  ;;  %v8209_v55 = vld [vmem:[%s12622_s9 + $0x320] sm:$0xff] }
 0x762   : > { %9439 = vmatpush3.bf16.msra.mxu0 %v9438_v2  ;;  %8862 = vmatprep.mubr.msk.f32.mxu0 %vm9994_vm2, %v9978_v0  ;;  %v9474_v2 = vpack.c.bf16 %v8197_v60, %v8196_v30  ;;  %v9492_v3 = vpack.c.bf16 %v8210_v58, %v8209_v55  ;;  %v8238_v60 = vld [vmem:[%s12622_s9 + $0x3f0] sm:$0xff] }
 0x763   : > { %9440 = vmatprep.subr.bf16.mxu0 %v9993_v54 }
 0x766   : > { %9442 = vmatpush3.bf16.msra.mxu0 %v9441_v11  ;;  %v9480_v11 = vpack.c.bf16 %v8201_v10, %v8200_v9 }
 0x767   : > { %9443 = vmatprep.subr.bf16.mxu0 %v9993_v54 }
 0x76a   : > { %9445 = vmatpush3.bf16.msra.mxu0 %v9444_v51  ;;  %v8207_v51 = vld [vmem:[%s12622_s9 + $0x310] sm:$0xff] }
 0x76b   : > { %9446 = vmatprep.subr.bf16.mxu0 %v9993_v54  ;;  %v9489_v18 = vpack.c.bf16 %v8208_v61, %v8207_v51 }
 0x76e   : > { %9448 = vmatpush3.bf16.msra.mxu0 %v9447_v21  ;;  %v8212_v21 = vld [vmem:[%s12622_s9 + $0x338] sm:$0xff] }
 0x76f   : > { %9449 = vmatprep.subr.bf16.mxu0 %v9993_v54  ;;  %v9495_v5 = vpack.c.bf16 %v8212_v21, %v8211_v19 }
 0x771   : > { %8863 = vmatmul.mubr.msk.f32.vlgmr.msra.gmra.mrb[40].mxu0 %vm6393_vm10, %v7058_v31  ;;  %v8217_v31 = vld [vmem:[%s12622_s9 + $0x358] sm:$0xff] }
 0x772   : > { %9451 = vmatpush3.bf16.msra.mxu0 %v9450_v27  ;;  %8881 = vmatprep.mubr.msk.f32.mxu0 %vm9994_vm2, %v9978_v0  ;;  %v7391_v27 = vrot.slane %v12453_v24, 2  ;;  %v9501_v32 = vpack.c.bf16 %v8217_v31, %v8216_v40 }
 0x773   : > { %9452 = vmatprep.subr.bf16.mxu0 %v9993_v54 }
 0x776   : > { %9454 = vmatpush3.bf16.msra.mxu0 %v9453_v41  ;;  %v8221_v41 = vld [vmem:[%s12622_s9 + $0x378] sm:$0xff] }
 0x777   : > { %9455 = vmatprep.subr.bf16.mxu0 %v9993_v54  ;;  %v9507_v37 = vpack.c.bf16 %v8221_v41, %v8220_v38 }
 0x77a   : > { %9457 = vmatpush3.bf16.msra.mxu0 %v9456_v22  ;;  %v8225_v22 = vld [vmem:[%s12622_s9 + $0x390] sm:$0xff] }
 0x77b   : > { %9458 = vmatprep.subr.bf16.mxu0 %v9993_v54  ;;  %v9513_v47 = vpack.c.bf16 %v8226_v46, %v8225_v22 }
 0x77e   : > { %9460 = vmatpush3.bf16.msra.mxu0 %v9459_v39  ;;  %v8228_v39 = vld [vmem:[%s12622_s9 + $0x3a8] sm:$0xff] }
 0x77f   : > { %9461 = vmatprep.subr.bf16.mxu0 %v9993_v54  ;;  %v9516_v49 = vpack.c.bf16 %v8228_v39, %v8227_v48 }
 0x781   : > { %8882 = vmatmul.mubr.msk.f32.vlgmr.msra.gmra.mrb[40].mxu0 %vm6393_vm10, %v7141_v44 }
 0x782   : > { %9463 = vmatpush3.bf16.msra.mxu0 %v9462_v53  ;;  %8900 = vmatprep.mubr.msk.f32.mxu0 %vm9994_vm2, %v9978_v0  ;;  %v8230_v53 = vld [vmem:[%s12622_s9 + $0x3b8] sm:$0xff] }
 0x783   : > { %9464 = vmatprep.subr.bf16.mxu0 %v9993_v54  ;;  %v9519_v44 = vpack.c.bf16 %v8230_v53, %v8229_v13 }
 0x786   : > { %9466 = vmatpush3.bf16.msra.mxu0 %v9465_v23  ;;  %v9522_v23 = vpack.c.bf16 %v8233_v57, %v8232_v56 }
 0x787   : > { %9467 = vmatprep.subr.bf16.mxu0 %v9993_v54 }
 0x78a   : > { %9469 = vmatpush3.bf16.msra.mxu0 %v9468_v62  ;;  %v8235_v62 = vld [vmem:[%s12622_s9 + $0x3d8] sm:$0xff] }
 0x78b   : > { %9470 = vmatprep.subr.bf16.mxu0 %v9993_v54  ;;  %v9525_v63 = vpack.c.bf16 %v8235_v62, %v8234_v59 }
 0x78e   : > { %9472 = vmatpush3.bf16.msra.mxu0 %v9471_v20  ;;  %v8237_v20 = vld [vmem:[%s12622_s9 + $0x3e8] sm:$0xff] }
 0x78f   : > { %9473 = vmatprep.subr.bf16.mxu0 %v9993_v54  ;;  %v9528_v30 = vpack.c.bf16 %v8237_v20, %v8236_v1 }
 0x791   : > { %8901 = vmatmul.mubr.msk.f32.vlgmr.msra.gmra.mrb[40].mxu0 %vm6393_vm10, %v7224_v4  ;;  %v7640_v4 = vrot.slane %v12453_v24, 5 }
 0x792   : > { %9475 = vmatpush3.bf16.msra.mxu0 %v9474_v2  ;;  %8919 = vmatprep.mubr.msk.f32.mxu0 %vm9994_vm2, %v9978_v0 }
 0x793   : > { %9476 = vmatprep.subr.bf16.mxu0 %v9993_v54 }
 0x796   : > { %9478 = vmatpush3.bf16.msra.mxu0 %v9477_v8  ;;  %v9555_v8 = vpack.c.bf16 %v7730_v52, %v7729_v6 }
 0x797   : > { %9479 = vmatprep.subr.bf16.mxu0 %v9993_v54 }
 0x798   : > { %9556 = vmatpush3.bf16.msra.mxu1 %v9555_v8 }
 0x79a   : > { %9481 = vmatpush3.bf16.msra.mxu0 %v9480_v11 }
 0x79b   : > { %9482 = vmatprep.subr.bf16.mxu0 %v9993_v54 }
 0x79e   : > { %9484 = vmatpush3.bf16.msra.mxu0 %v9483_v15 }
 0x79f   : > { %9485 = vmatprep.subr.bf16.mxu0 %v9993_v54 }
 0x7a1   : > { %8920 = vmatmul.mubr.msk.f32.vlgmr.msra.gmra.mrb[40].mxu0 %vm6393_vm10, %v7307_v17 }
 0x7a2   : > { %9487 = vmatpush3.bf16.msra.mxu0 %v9486_v14  ;;  %8938 = vmatprep.mubr.msk.f32.mxu0 %vm9994_vm2, %v9978_v0 }
 0x7a3   : > { %9488 = vmatprep.subr.bf16.mxu0 %v9993_v54 }
 0x7a6   : > { %9490 = vmatpush3.bf16.msra.mxu0 %v9489_v18 }
 0x7a7   : > { %9491 = vmatprep.subr.bf16.mxu0 %v9993_v54 }
 0x7aa   : > { %9493 = vmatpush3.bf16.msra.mxu0 %v9492_v3 }
 0x7ab   : > { %9494 = vmatprep.subr.bf16.mxu0 %v9993_v54 }
 0x7ae   : > { %9496 = vmatpush3.bf16.msra.mxu0 %v9495_v5 }
 0x7af   : > { %9497 = vmatprep.subr.bf16.mxu0 %v9993_v54 }
 0x7b1   : > { %8939 = vmatmul.mubr.msk.f32.vlgmr.msra.gmra.mrb[40].mxu0 %vm6393_vm10, %v7391_v27 }
 0x7b2   : > { %9499 = vmatpush3.bf16.msra.mxu0 %v9498_v26  ;;  %8957 = vmatprep.mubr.msk.f32.mxu0 %vm9994_vm2, %v9978_v0 }
 0x7b3   : > { %9500 = vmatprep.subr.bf16.mxu0 %v9993_v54 }
 0x7b6   : > { %9502 = vmatpush3.bf16.msra.mxu0 %v9501_v32 }
 0x7b7   : > { %9503 = vmatprep.subr.bf16.mxu0 %v9993_v54 }
 0x7ba   : > { %9505 = vmatpush3.bf16.msra.mxu0 %v9504_v35 }
 0x7bb   : > { %9506 = vmatprep.subr.bf16.mxu0 %v9993_v54 }
 0x7be   : > { %9508 = vmatpush3.bf16.msra.mxu0 %v9507_v37 }
 0x7bf   : > { %9509 = vmatprep.subr.bf16.mxu0 %v9993_v54 }
 0x7c1   : > { %8958 = vmatmul.mubr.msk.f32.vlgmr.msra.gmra.mrb[40].mxu0 %vm6393_vm10, %v7474_v45 }
 0x7c2   : > { %9511 = vmatpush3.bf16.msra.mxu0 %v9510_v36  ;;  %8976 = vmatprep.mubr.msk.f32.mxu0 %vm9994_vm2, %v9978_v0 }
 0x7c3   : > { %9512 = vmatprep.subr.bf16.mxu0 %v9993_v54 }
 0x7c6   : > { %9514 = vmatpush3.bf16.msra.mxu0 %v9513_v47 }
 0x7c7   : > { %9515 = vmatprep.subr.bf16.mxu0 %v9993_v54 }
 0x7ca   : > { %9517 = vmatpush3.bf16.msra.mxu0 %v9516_v49 }
 0x7cb   : > { %9518 = vmatprep.subr.bf16.mxu0 %v9993_v54 }
 0x7ce   : > { %9520 = vmatpush3.bf16.msra.mxu0 %v9519_v44 }
 0x7cf   : > { %9521 = vmatprep.subr.bf16.mxu0 %v9993_v54 }
 0x7d1   : > { %8977 = vmatmul.mubr.msk.f32.vlgmr.msra.gmra.mrb[40].mxu0 %vm6393_vm10, %v7557_v33 }
 0x7d2   : > { %9523 = vmatpush3.bf16.msra.mxu0 %v9522_v23  ;;  %8995 = vmatprep.mubr.msk.f32.mxu0 %vm9994_vm2, %v9978_v0  ;;  %v8239_v0 = vld [vmem:[%s12622_s9 + $0x3f8] sm:$0xff] }
 0x7d3   : > { %9524 = vmatprep.subr.bf16.mxu0 %v9993_v54  ;;  %v9531_v2 = vpack.c.bf16 %v8239_v0, %v8238_v60 }
 0x7d6   : > { %9526 = vmatpush3.bf16.msra.mxu0 %v9525_v63 }
 0x7d7   : > { %9527 = vmatprep.subr.bf16.mxu0 %v9993_v54 }
 0x7da   : > { %9529 = vmatpush3.bf16.msra.mxu0 %v9528_v30 }
 0x7db   : > { %9530 = vmatprep.subr.bf16.mxu0 %v9993_v54  ;;  %v6384_v54 = vld [vmem:[%s12623_s10] sm:$0x1] }
 0x7de   : > { %9532 = vmatpush3.bf16.msra.mxu0 %v9531_v2 }
 0x7e1   : > { %8996 = vmatmul.mubr.msk.f32.vlgmr.msra.gmra.mrb[40].mxu0 %vm6393_vm10, %v7640_v4 }
 0x8b4   : > { %v7709_v9 = vpop.f32.mrb[40].mxu0 }
 0x8b5   : > { %v9565_v10 = vadd.f32 %v7709_v9, %v6384_v54  ;;  %v8997_v11 = vpop.f32.mrb[41].mxu0 }
 0x8b7   : > { %v7714_v50 = vmul.f32 %v9565_v10, %v9565_v10 }
 0x8b9   : > { %9031 = vmatmul.mubr.f32.vlgmr.msra.gmra.mrb[58].mxu1 %v7714_v50 }
 0x98c   : > { %v7798_v15 = vpop.f32.mrb[58].mxu1 }
 0x98d   : > { %v7799_v16 = vadd.f32 %v7798_v15, %v7731_v12  ;;  %v9032_v7 = vpop.f32.mrb[59].mxu1 }
 0x98f   : > { %7803 = vst.msk [vmem:[%s432_s15] sm:$0x1] %vm7802_vm11, %v7799_v16 }
 0x990   : > { %9927 = shalt.err (!%p9924_p3)
}
 0x991   : > { %s9928_s22 = scalar_lea.hbm %s12571_s30, 16  ;;  %s9932_s0 = scalar_lea.hbm %s12626_s13, 32 }
 0x992   : > { %p9929_p4 = scmp.ne.s32.totalorder %s12571_s30, %s9928_s22  ;;  %p9933_p9 = scmp.lt.u32.totalorder %s12571_s30, %s12626_s13 }
 0x993   : > { %p9934_p10 = scmp.lt.u32.totalorder %s9932_s0, %s9928_s22  ;;  %p9936_p12 = scmp.lt.u32.totalorder %s9928_s22, %s12571_s30 }
 0x994   : > { %p9930_p7 = pnand %p9929_p4, %p10104_p5 }
 0x995   : > { %p9935_p11 = por %p9934_p10, %p9933_p9 }
 0x996   : > { %p9931_p8 = pneg %p9930_p7 }
 0x997   : > { %p9937_p13 = por %p9936_p12, %p9935_p11 }
 0x999   : > { %p9938_p0 = pnand %p9937_p13, %p9931_p8 }
 0x99b   : > { %9941 = shalt.err (!%p9938_p0)
}
 0x99c   : > { %9776 = dma.vmem_to_hbm [thread:$0]  (%p10104_p5), %s12573_s16, 16, %s12571_s30, %s7805_s21  }
 0x99d PF: > { %p9782_p1 = scmp.ge.s32.totalorder %s9976_s28, 2  ;;  %s7829_s2 = sand.u32 1, %s9964_s25  }
 0x99e   : > { %s7830_s23 = scalar_lea.sflag [#allocation3], %s7829_s2 }
 0x99f   : > { %p9779_p2 = pnand %p9782_p1, %p10108_p6 }
 0x9a1   : > { %9959 = dma.done.wait (!%p9779_p2), %s7830_s23, 16  }
 0x9a2   : > { %9961 = vsyncadd (!%p9779_p2), %s7830_s23, 4294967280  ;;  %p23_p3 = scmp.ge.s32.totalorder %s10091_s14, 4   ;;  %s12646_s25 = smov %s9968_s26 }
 0x9a3   : > { %s12647_s26 = smov %s9972_s27  ;;  %s12648_s27 = smov %s10102_s17 }
 0x9a4   : > { %s12649_s28 = smov %s10091_s14  ;;  %25 = sbr.rel (!%p23_p3) target bundleno = 7 (0x7), region = 146 }
 0x9ab   :  { %7834 = vsyncpa [#allocation3], 1 }
 0x9ac   :  { %7836 = vsyncpa [#allocation3 + $0x1], 1 }

</bundles_post_ra>
